<compile_context>
chip_gen: v6e
topology: v6e:2x2x1
jax: 0.10.0
libtpu: 0.0.40
codegen_flags: <defaults>
</compile_context>

<pallas_src>
import jax
import jax.numpy as jnp
from jax.experimental import pallas as pl
from jax.experimental.pallas import tpu as pltpu


# ----------------------------- fused Pallas kernel ---------------------------

def _fused_forward_kernel(
    a_ref, x_ref, pool_ref, gex_ref,
    g1w1_ref, gcn_w_ref, gcn_b_ref, molw_ref, molb_ref,
    w1g_ref, w1m_ref, b1_ref,
    w2_ref, b2_ref, w3_ref, b3_ref, w4_ref, b4_ref,
    o_ref,
    h1_ref, acc_ref,
):
    f32 = jnp.float32
    bf16 = jnp.bfloat16
    k = pl.program_id(0)

    # -------- step 0: 3x ResGCNConv, global mean pool, mol_lin, lin1 ---------
    @pl.when(k == 0)
    def _():
        a = a_ref[...]                                            # [N, N]

        def res_block(x_in, w1_, w2_, b1_, b2_):
            # GCNConv1 -> relu -> GCNConv2 -> +residual -> relu
            h = jnp.dot(x_in, w1_, preferred_element_type=f32)
            h = jnp.dot(a, h, preferred_element_type=f32) + b1_
            h = jnp.maximum(h, 0.0)
            out = jnp.dot(h, w2_, preferred_element_type=f32)
            out = jnp.dot(a, out, preferred_element_type=f32) + b2_
            # residual broadcasts [N,1] -> [N,32] for block 1, as in PyTorch.
            return jnp.maximum(out + x_in, 0.0)

        # TODO(synk): F.dropout is identity in eval mode; training-mode dropout
        # is not implemented (eval forward only).
        xb = res_block(x_ref[...], g1w1_ref[...], gcn_w_ref[0],
                       gcn_b_ref[0], gcn_b_ref[1])                # [N, 32]
        xb = res_block(xb, gcn_w_ref[1], gcn_w_ref[2],
                       gcn_b_ref[2], gcn_b_ref[3])                # [N, 32]
        xb = res_block(xb, gcn_w_ref[3], gcn_w_ref[4],
                       gcn_b_ref[4], gcn_b_ref[5])                # [N, 32]

        # global_mean_pool as a matmul with the row-normalized assignment matrix.
        pooled = jnp.dot(pool_ref[...], xb, preferred_element_type=f32)     # [B, 32]
        molembed = (jnp.dot(pooled, molw_ref[...], preferred_element_type=f32)
                    + molb_ref[...])                                        # [B, mol_dim]

        # lin1 with torch.cat((gexprs, molembed), 1) fused as two dots summed.
        h1 = (jnp.dot(gex_ref[...].astype(bf16), w1g_ref[...],
                      preferred_element_type=f32)
              + jnp.dot(molembed.astype(bf16), w1m_ref[...],
                        preferred_element_type=f32)
              + b1_ref[...])
        h1_ref[...] = jnp.maximum(h1, 0.0).astype(bf16)           # [B, 1024]
        acc_ref[...] = jnp.zeros_like(acc_ref)

    # -------- every step: one column block of lin2 / matching row block of lin3
    h2_blk = jnp.maximum(
        jnp.dot(h1_ref[...], w2_ref[...], preferred_element_type=f32) + b2_ref[...],
        0.0)                                                      # [B, block_k]
    acc_ref[...] += jnp.dot(h2_blk.astype(bf16), w3_ref[...],
                            preferred_element_type=f32)           # [B, 1024]

    # -------- last step: lin3 bias + relu, then lin4 --------------------------
    @pl.when(k == pl.num_programs(0) - 1)
    def _():
        h3 = jnp.maximum(acc_ref[...] + b3_ref[...], 0.0)
        out = (jnp.dot(h3.astype(bf16), w4_ref[...], preferred_element_type=f32)
               + b4_ref[...])                                     # [B, 1]
        o_ref[...] = out.astype(o_ref.dtype)


def sensitivity_predictor(packed, gexprs, node_x, a_norm, pool_mat, *, block_k=256):
    batch, num_genes = gexprs.shape
    num_nodes = node_x.shape[0]
    hidden = packed["w2"].shape[0]
    mol_dim = packed["w1m"].shape[0]
    assert hidden % block_k == 0
    n_k = hidden // block_k

    grid_spec = pltpu.PrefetchScalarGridSpec(
        num_scalar_prefetch=0,
        grid=(n_k,),
        in_specs=[
            pl.BlockSpec((num_nodes, num_nodes), lambda k: (0, 0)),   # a_norm
            pl.BlockSpec((num_nodes, 1), lambda k: (0, 0)),           # node_x
            pl.BlockSpec((batch, num_nodes), lambda k: (0, 0)),       # pool_mat
            pl.BlockSpec((batch, num_genes), lambda k: (0, 0)),       # gexprs
            pl.BlockSpec((1, 32), lambda k: (0, 0)),                  # g1w1
            pl.BlockSpec((5, 32, 32), lambda k: (0, 0, 0)),           # packed GCN weights
            pl.BlockSpec((6, 1, 32), lambda k: (0, 0, 0)),            # packed GCN biases
            pl.BlockSpec((32, mol_dim), lambda k: (0, 0)),            # mol_lin w
            pl.BlockSpec((1, mol_dim), lambda k: (0, 0)),             # mol_lin b
            pl.BlockSpec((num_genes, hidden), lambda k: (0, 0)),      # w1 rows for gexprs (bf16)
            pl.BlockSpec((mol_dim, hidden), lambda k: (0, 0)),        # w1 rows for molembed (bf16)
            pl.BlockSpec((1, hidden), lambda k: (0, 0)),              # b1
            pl.BlockSpec((hidden, block_k), lambda k: (0, k)),        # w2 column block (bf16)
            pl.BlockSpec((1, block_k), lambda k: (0, k)),             # b2 block
            pl.BlockSpec((block_k, hidden), lambda k: (k, 0)),        # w3 row block (bf16)
            pl.BlockSpec((1, hidden), lambda k: (0, 0)),              # b3
            pl.BlockSpec((hidden, 1), lambda k: (0, 0)),              # w4 (bf16)
            pl.BlockSpec((1, 1), lambda k: (0, 0)),                   # b4
        ],
        out_specs=pl.BlockSpec((batch, 1), lambda k: (0, 0)),
        scratch_shapes=[
            pltpu.VMEM((batch, hidden), jnp.bfloat16),   # h1 (lin1 activations)
            pltpu.VMEM((batch, hidden), jnp.float32),    # lin3 pre-activation accumulator
        ],
    )

    return pl.pallas_call(
        _fused_forward_kernel,
        out_shape=jax.ShapeDtypeStruct((batch, 1), jnp.float32),
        grid_spec=grid_spec,
        compiler_params=pltpu.CompilerParams(
            dimension_semantics=("arbitrary",)),
    )(
        a_norm, node_x, pool_mat, gexprs,
        packed["g1w1"], packed["gcn_w"], packed["gcn_b"],
        packed["mol_w"], packed["mol_b"],
        packed["w1g"], packed["w1m"], packed["b1"],
        packed["w2"], packed["b2"], packed["w3"], packed["b3"],
        packed["w4"], packed["b4"],
    )


# ------------------------------- glue (JAX) ----------------------------------

def build_norm_adj(edge_index, num_nodes):
    """Dense symmetric-normalized adjacency with self loops (PyG GCNConv norm)."""
    src, dst = edge_index[0], edge_index[1]
    a = jnp.zeros((num_nodes, num_nodes), jnp.float32).at[dst, src].set(1.0)
    a_hat = a + jnp.eye(num_nodes, dtype=jnp.float32)
    deg = a_hat.sum(axis=1)
    dinv = jax.lax.rsqrt(deg)
    return dinv[:, None] * a_hat * dinv[None, :]


def build_pool_matrix(batch, num_graphs):
    onehot = (batch[None, :] == jnp.arange(num_graphs)[:, None]).astype(jnp.float32)
    counts = jnp.maximum(onehot.sum(axis=1, keepdims=True), 1.0)
    return onehot / counts


def init_params(key, mol_dim, num_genes):
    """PyTorch-layout f32 parameters (weights stored [in, out])."""
    scale = 0.05

    def dense(k, fan_in, fan_out):
        kw, kb = jax.random.split(k)
        w = jax.random.normal(kw, (fan_in, fan_out), jnp.float32) * scale
        b = jax.random.normal(kb, (1, fan_out), jnp.float32) * scale
        return w, b

    keys = iter(jax.random.split(key, 16))
    params = {"gcn": []}
    # MoleculeEncoder: ResGCNConv(1,32,32), ResGCNConv(32,32,32), ResGCNConv(32,32,32)
    for (din, dh, dout) in [(1, 32, 32), (32, 32, 32), (32, 32, 32)]:
        w1, b1 = dense(next(keys), din, dh)
        w2, b2 = dense(next(keys), dh, dout)
        params["gcn"].append({"w1": w1, "b1": b1, "w2": w2, "b2": b2})
    params["mol_lin"] = dense(next(keys), 32, mol_dim)
    params["lin1"] = dense(next(keys), mol_dim + num_genes, 1024)
    params["lin2"] = dense(next(keys), 1024, 1024)
    params["lin3"] = dense(next(keys), 1024, 1024)
    params["lin4"] = dense(next(keys), 1024, 1)
    return params


def preprocess_params(params, num_genes):
    """One-time transforms: pack tiny GCN operands, split lin1 rows (concat
    elimination), cast head weights to bf16.  Done once, NOT per call."""
    bf16 = jnp.bfloat16
    g1, g2, g3 = params["gcn"]
    gcn_w = jnp.stack([g1["w2"], g2["w1"], g2["w2"], g3["w1"], g3["w2"]])           # [5,32,32]
    gcn_b = jnp.stack([g1["b1"], g1["b2"], g2["b1"], g2["b2"], g3["b1"], g3["b2"]])  # [6,1,32]
    w1, b1 = params["lin1"]
    w2, b2 = params["lin2"]
    w3, b3 = params["lin3"]
    w4, b4 = params["lin4"]
    return {
        "g1w1": g1["w1"],                                   # [1, 32] f32
        "gcn_w": gcn_w, "gcn_b": gcn_b,                     # f32
        "mol_w": params["mol_lin"][0], "mol_b": params["mol_lin"][1],
        "w1g": w1[:num_genes, :].astype(bf16),              # acts on gexprs
        "w1m": w1[num_genes:, :].astype(bf16),              # acts on molembed
        "b1": b1,
        "w2": w2.astype(bf16), "b2": b2,
        "w3": w3.astype(bf16), "b3": b3,
        "w4": w4.astype(bf16), "b4": b4,
    }


def reference_forward(params, gexprs, node_x, a_norm, pool_mat):
    """Pure-JAX f32 reference (eval-mode PyTorch semantics)."""
    x = node_x
    for g in params["gcn"]:
        h = jnp.maximum(a_norm @ (x @ g["w1"]) + g["b1"], 0.0)
        out = a_norm @ (h @ g["w2"]) + g["b2"]
        x = jnp.maximum(out + x, 0.0)
    pooled = pool_mat @ x
    mol_w, mol_b = params["mol_lin"]
    molembed = pooled @ mol_w + mol_b
    w1, b1 = params["lin1"]
    w2, b2 = params["lin2"]
    w3, b3 = params["lin3"]
    w4, b4 = params["lin4"]
    h = jnp.maximum(jnp.concatenate([gexprs, molembed], axis=1) @ w1 + b1, 0.0)
    h = jnp.maximum(h @ w2 + b2, 0.0)
    h = jnp.maximum(h @ w3 + b3, 0.0)
    return h @ w4 + b4


# --------------------------------- main ---------------------------------------

if __name__ == "__main__":
    key = jax.random.PRNGKey(0)
    k_par, k_gex, k_node = jax.random.split(key, 3)

    mol_dim = 32
    num_genes = 64
    num_graphs = 2            # batch of 2 molecules / 2 cell-line expression rows
    num_nodes = 16            # graph0: 7 nodes, graph1: 9 nodes

    params = init_params(k_par, mol_dim, num_genes)
    packed = preprocess_params(params, num_genes)     # one-time preprocessing

    # gene expression input [B, num_genes]
    gexprs = jax.random.normal(k_gex, (num_graphs, num_genes), jnp.float32)

    # molecular graph: node features [N, 1], undirected chain edges per graph
    node_x = jax.random.normal(k_node, (num_nodes, 1), jnp.float32)
    e0 = [(i, i + 1) for i in range(6)]                     # graph 0: nodes 0..6
    e1 = [(7 + i, 7 + i + 1) for i in range(8)]             # graph 1: nodes 7..15
    edges = e0 + [(b, a) for a, b in e0] + e1 + [(b, a) for a, b in e1]
    edge_index = jnp.array(list(zip(*edges)), dtype=jnp.int32)      # [2, E]
    batch = jnp.array([0] * 7 + [1] * 9, dtype=jnp.int32)           # [N]

    a_norm = build_norm_adj(edge_index, num_nodes)
    pool_mat = build_pool_matrix(batch, num_graphs)

    out = sensitivity_predictor(packed, gexprs, node_x, a_norm, pool_mat)
    out = jax.block_until_ready(out)
    assert out.shape == (num_graphs, 1), out.shape

    # Tolerance check vs f32 reference (bf16 head weights -> ~1% level error).
    ref = reference_forward(params, gexprs, node_x, a_norm, pool_mat)
    assert jnp.allclose(out, ref, rtol=1e-1, atol=1e-1), (out, ref)
    print("KERNEL_OK")
</pallas_src>

<mosaic_0001>
module attributes {stable_mosaic.version = 11 : i64} {
  func.func @_fused_forward_kernel(%arg0: i32, %arg1: memref<16x16xf32, #tpu.memory_space<vmem>>, %arg2: memref<16x1xf32, #tpu.memory_space<vmem>>, %arg3: memref<2x16xf32, #tpu.memory_space<vmem>>, %arg4: memref<2x64xf32, #tpu.memory_space<vmem>>, %arg5: memref<1x32xf32, #tpu.memory_space<vmem>>, %arg6: memref<5x32x32xf32, #tpu.memory_space<vmem>>, %arg7: memref<6x1x32xf32, #tpu.memory_space<vmem>>, %arg8: memref<32x32xf32, #tpu.memory_space<vmem>>, %arg9: memref<1x32xf32, #tpu.memory_space<vmem>>, %arg10: memref<64x1024xbf16, #tpu.memory_space<vmem>>, %arg11: memref<32x1024xbf16, #tpu.memory_space<vmem>>, %arg12: memref<1x1024xf32, #tpu.memory_space<vmem>>, %arg13: memref<1024x256xbf16, #tpu.memory_space<vmem>>, %arg14: memref<1x256xf32, #tpu.memory_space<vmem>>, %arg15: memref<256x1024xbf16, #tpu.memory_space<vmem>>, %arg16: memref<1x1024xf32, #tpu.memory_space<vmem>>, %arg17: memref<1024x1xbf16, #tpu.memory_space<vmem>>, %arg18: memref<1x1xf32, #tpu.memory_space<vmem>>, %arg19: memref<2x1xf32, #tpu.memory_space<vmem>>, %arg20: memref<2x1024xbf16, #tpu.memory_space<vmem>>, %arg21: memref<2x1024xf32, #tpu.memory_space<vmem>>) attributes {dimension_semantics = [#tpu.dimension_semantics<arbitrary>], iteration_bounds = array<i64: 4>, scalar_prefetch = 0 : i64, scratch_operands = 2 : i64, tpu.core_type = #tpu.core_type<tc>, window_params = [{pipeline_mode = #tpu.pipeline_mode<synchronous>, transform_indices = @transform_0, window_bounds = array<i64: 16, 16>}, {pipeline_mode = #tpu.pipeline_mode<synchronous>, transform_indices = @transform_1, window_bounds = array<i64: 16, 1>}, {pipeline_mode = #tpu.pipeline_mode<synchronous>, transform_indices = @transform_2, window_bounds = array<i64: 2, 16>}, {pipeline_mode = #tpu.pipeline_mode<synchronous>, transform_indices = @transform_3, window_bounds = array<i64: 2, 64>}, {pipeline_mode = #tpu.pipeline_mode<synchronous>, transform_indices = @transform_4, window_bounds = array<i64: 1, 32>}, {pipeline_mode = #tpu.pipeline_mode<synchronous>, transform_indices = @transform_5, window_bounds = array<i64: 5, 32, 32>}, {pipeline_mode = #tpu.pipeline_mode<synchronous>, transform_indices = @transform_6, window_bounds = array<i64: 6, 1, 32>}, {pipeline_mode = #tpu.pipeline_mode<synchronous>, transform_indices = @transform_7, window_bounds = array<i64: 32, 32>}, {pipeline_mode = #tpu.pipeline_mode<synchronous>, transform_indices = @transform_8, window_bounds = array<i64: 1, 32>}, {pipeline_mode = #tpu.pipeline_mode<synchronous>, transform_indices = @transform_9, window_bounds = array<i64: 64, 1024>}, {pipeline_mode = #tpu.pipeline_mode<synchronous>, transform_indices = @transform_10, window_bounds = array<i64: 32, 1024>}, {pipeline_mode = #tpu.pipeline_mode<synchronous>, transform_indices = @transform_11, window_bounds = array<i64: 1, 1024>}, {transform_indices = @transform_12, window_bounds = array<i64: 1024, 256>}, {transform_indices = @transform_13, window_bounds = array<i64: 1, 256>}, {transform_indices = @transform_14, window_bounds = array<i64: 256, 1024>}, {pipeline_mode = #tpu.pipeline_mode<synchronous>, transform_indices = @transform_15, window_bounds = array<i64: 1, 1024>}, {pipeline_mode = #tpu.pipeline_mode<synchronous>, transform_indices = @transform_16, window_bounds = array<i64: 1024, 1>}, {pipeline_mode = #tpu.pipeline_mode<synchronous>, transform_indices = @transform_17, window_bounds = array<i64: 1, 1>}, {pipeline_mode = #tpu.pipeline_mode<synchronous>, transform_indices = @transform_18, window_bounds = array<i64: 2, 1>}]} {
    %c0_i32 = arith.constant 0 : i32
    %0 = arith.cmpi eq, %arg0, %c0_i32 : i32
    %1 = arith.extui %0 : i1 to i32
    %c0_i32_0 = arith.constant 0 : i32
    %2 = arith.cmpi ne, %1, %c0_i32_0 : i32
    scf.if %2 {
      %c0_15 = arith.constant 0 : index
      %c0_16 = arith.constant 0 : index
      %20 = vector.load %arg1[%c0_15, %c0_16] : memref<16x16xf32, #tpu.memory_space<vmem>>, vector<16x16xf32>
      %c0_17 = arith.constant 0 : index
      %c0_18 = arith.constant 0 : index
      %21 = vector.load %arg2[%c0_17, %c0_18] : memref<16x1xf32, #tpu.memory_space<vmem>>, vector<16x1xf32>
      %c0_19 = arith.constant 0 : index
      %c0_20 = arith.constant 0 : index
      %22 = vector.load %arg5[%c0_19, %c0_20] : memref<1x32xf32, #tpu.memory_space<vmem>>, vector<1x32xf32>
      %c0_21 = arith.constant 0 : index
      %c0_22 = arith.constant 0 : index
      %c0_23 = arith.constant 0 : index
      %23 = vector.load %arg6[%c0_21, %c0_22, %c0_23] : memref<5x32x32xf32, #tpu.memory_space<vmem>>, vector<1x32x32xf32>
      %24 = vector.shape_cast %23 : vector<1x32x32xf32> to vector<32x32xf32>
      %c0_24 = arith.constant 0 : index
      %c0_25 = arith.constant 0 : index
      %c0_26 = arith.constant 0 : index
      %25 = vector.load %arg7[%c0_24, %c0_25, %c0_26] : memref<6x1x32xf32, #tpu.memory_space<vmem>>, vector<1x1x32xf32>
      %26 = vector.shape_cast %25 : vector<1x1x32xf32> to vector<1x32xf32>
      %c1 = arith.constant 1 : index
      %c0_27 = arith.constant 0 : index
      %c0_28 = arith.constant 0 : index
      %27 = vector.load %arg7[%c1, %c0_27, %c0_28] : memref<6x1x32xf32, #tpu.memory_space<vmem>>, vector<1x1x32xf32>
      %28 = vector.shape_cast %27 : vector<1x1x32xf32> to vector<1x32xf32>
      %cst_29 = arith.constant dense<0.000000e+00> : vector<16x32xf32>
      %29 = tpu.matmul %21, %22, %cst_29 {dimension_numbers = #tpu.dot_dimension_numbers<[1], [0], [0], [1], [0, 0, 1, 1], [], []>} : vector<16x1xf32>, vector<1x32xf32>, vector<16x32xf32> -> vector<16x32xf32>
      %cst_30 = arith.constant dense<0.000000e+00> : vector<16x32xf32>
      %30 = tpu.matmul %20, %29, %cst_30 {dimension_numbers = #tpu.dot_dimension_numbers<[1], [0], [0], [1], [0, 0, 1, 1], [], []>} : vector<16x16xf32>, vector<16x32xf32>, vector<16x32xf32> -> vector<16x32xf32>
      %31 = vector.broadcast %26 : vector<1x32xf32> to vector<16x32xf32>
      %32 = arith.addf %30, %31 : vector<16x32xf32>
      %cst_31 = arith.constant 0.000000e+00 : f32
      %33 = vector.broadcast %cst_31 : f32 to vector<16x32xf32>
      %34 = arith.maximumf %32, %33 : vector<16x32xf32>
      %cst_32 = arith.constant dense<0.000000e+00> : vector<16x32xf32>
      %35 = tpu.matmul %34, %24, %cst_32 {dimension_numbers = #tpu.dot_dimension_numbers<[1], [0], [0], [1], [0, 0, 1, 1], [], []>} : vector<16x32xf32>, vector<32x32xf32>, vector<16x32xf32> -> vector<16x32xf32>
      %cst_33 = arith.constant dense<0.000000e+00> : vector<16x32xf32>
      %36 = tpu.matmul %20, %35, %cst_33 {dimension_numbers = #tpu.dot_dimension_numbers<[1], [0], [0], [1], [0, 0, 1, 1], [], []>} : vector<16x16xf32>, vector<16x32xf32>, vector<16x32xf32> -> vector<16x32xf32>
      %37 = vector.broadcast %28 : vector<1x32xf32> to vector<16x32xf32>
      %38 = arith.addf %36, %37 : vector<16x32xf32>
      %39 = vector.broadcast %21 : vector<16x1xf32> to vector<16x32xf32>
      %40 = arith.addf %38, %39 : vector<16x32xf32>
      %cst_34 = arith.constant 0.000000e+00 : f32
      %41 = vector.broadcast %cst_34 : f32 to vector<16x32xf32>
      %42 = arith.maximumf %40, %41 : vector<16x32xf32>
      %c1_35 = arith.constant 1 : index
      %c0_36 = arith.constant 0 : index
      %c0_37 = arith.constant 0 : index
      %43 = vector.load %arg6[%c1_35, %c0_36, %c0_37] : memref<5x32x32xf32, #tpu.memory_space<vmem>>, vector<1x32x32xf32>
      %44 = vector.shape_cast %43 : vector<1x32x32xf32> to vector<32x32xf32>
      %c2 = arith.constant 2 : index
      %c0_38 = arith.constant 0 : index
      %c0_39 = arith.constant 0 : index
      %45 = vector.load %arg6[%c2, %c0_38, %c0_39] : memref<5x32x32xf32, #tpu.memory_space<vmem>>, vector<1x32x32xf32>
      %46 = vector.shape_cast %45 : vector<1x32x32xf32> to vector<32x32xf32>
      %c2_40 = arith.constant 2 : index
      %c0_41 = arith.constant 0 : index
      %c0_42 = arith.constant 0 : index
      %47 = vector.load %arg7[%c2_40, %c0_41, %c0_42] : memref<6x1x32xf32, #tpu.memory_space<vmem>>, vector<1x1x32xf32>
      %48 = vector.shape_cast %47 : vector<1x1x32xf32> to vector<1x32xf32>
      %c3 = arith.constant 3 : index
      %c0_43 = arith.constant 0 : index
      %c0_44 = arith.constant 0 : index
      %49 = vector.load %arg7[%c3, %c0_43, %c0_44] : memref<6x1x32xf32, #tpu.memory_space<vmem>>, vector<1x1x32xf32>
      %50 = vector.shape_cast %49 : vector<1x1x32xf32> to vector<1x32xf32>
      %cst_45 = arith.constant dense<0.000000e+00> : vector<16x32xf32>
      %51 = tpu.matmul %42, %44, %cst_45 {dimension_numbers = #tpu.dot_dimension_numbers<[1], [0], [0], [1], [0, 0, 1, 1], [], []>} : vector<16x32xf32>, vector<32x32xf32>, vector<16x32xf32> -> vector<16x32xf32>
      %cst_46 = arith.constant dense<0.000000e+00> : vector<16x32xf32>
      %52 = tpu.matmul %20, %51, %cst_46 {dimension_numbers = #tpu.dot_dimension_numbers<[1], [0], [0], [1], [0, 0, 1, 1], [], []>} : vector<16x16xf32>, vector<16x32xf32>, vector<16x32xf32> -> vector<16x32xf32>
      %53 = vector.broadcast %48 : vector<1x32xf32> to vector<16x32xf32>
      %54 = arith.addf %52, %53 : vector<16x32xf32>
      %cst_47 = arith.constant 0.000000e+00 : f32
      %55 = vector.broadcast %cst_47 : f32 to vector<16x32xf32>
      %56 = arith.maximumf %54, %55 : vector<16x32xf32>
      %cst_48 = arith.constant dense<0.000000e+00> : vector<16x32xf32>
      %57 = tpu.matmul %56, %46, %cst_48 {dimension_numbers = #tpu.dot_dimension_numbers<[1], [0], [0], [1], [0, 0, 1, 1], [], []>} : vector<16x32xf32>, vector<32x32xf32>, vector<16x32xf32> -> vector<16x32xf32>
      %cst_49 = arith.constant dense<0.000000e+00> : vector<16x32xf32>
      %58 = tpu.matmul %20, %57, %cst_49 {dimension_numbers = #tpu.dot_dimension_numbers<[1], [0], [0], [1], [0, 0, 1, 1], [], []>} : vector<16x16xf32>, vector<16x32xf32>, vector<16x32xf32> -> vector<16x32xf32>
      %59 = vector.broadcast %50 : vector<1x32xf32> to vector<16x32xf32>
      %60 = arith.addf %58, %59 : vector<16x32xf32>
      %61 = arith.addf %60, %42 : vector<16x32xf32>
      %cst_50 = arith.constant 0.000000e+00 : f32
      %62 = vector.broadcast %cst_50 : f32 to vector<16x32xf32>
      %63 = arith.maximumf %61, %62 : vector<16x32xf32>
      %c3_51 = arith.constant 3 : index
      %c0_52 = arith.constant 0 : index
      %c0_53 = arith.constant 0 : index
      %64 = vector.load %arg6[%c3_51, %c0_52, %c0_53] : memref<5x32x32xf32, #tpu.memory_space<vmem>>, vector<1x32x32xf32>
      %65 = vector.shape_cast %64 : vector<1x32x32xf32> to vector<32x32xf32>
      %c4 = arith.constant 4 : index
      %c0_54 = arith.constant 0 : index
      %c0_55 = arith.constant 0 : index
      %66 = vector.load %arg6[%c4, %c0_54, %c0_55] : memref<5x32x32xf32, #tpu.memory_space<vmem>>, vector<1x32x32xf32>
      %67 = vector.shape_cast %66 : vector<1x32x32xf32> to vector<32x32xf32>
      %c4_56 = arith.constant 4 : index
      %c0_57 = arith.constant 0 : index
      %c0_58 = arith.constant 0 : index
      %68 = vector.load %arg7[%c4_56, %c0_57, %c0_58] : memref<6x1x32xf32, #tpu.memory_space<vmem>>, vector<1x1x32xf32>
      %69 = vector.shape_cast %68 : vector<1x1x32xf32> to vector<1x32xf32>
      %c5 = arith.constant 5 : index
      %c0_59 = arith.constant 0 : index
      %c0_60 = arith.constant 0 : index
      %70 = vector.load %arg7[%c5, %c0_59, %c0_60] : memref<6x1x32xf32, #tpu.memory_space<vmem>>, vector<1x1x32xf32>
      %71 = vector.shape_cast %70 : vector<1x1x32xf32> to vector<1x32xf32>
      %cst_61 = arith.constant dense<0.000000e+00> : vector<16x32xf32>
      %72 = tpu.matmul %63, %65, %cst_61 {dimension_numbers = #tpu.dot_dimension_numbers<[1], [0], [0], [1], [0, 0, 1, 1], [], []>} : vector<16x32xf32>, vector<32x32xf32>, vector<16x32xf32> -> vector<16x32xf32>
      %cst_62 = arith.constant dense<0.000000e+00> : vector<16x32xf32>
      %73 = tpu.matmul %20, %72, %cst_62 {dimension_numbers = #tpu.dot_dimension_numbers<[1], [0], [0], [1], [0, 0, 1, 1], [], []>} : vector<16x16xf32>, vector<16x32xf32>, vector<16x32xf32> -> vector<16x32xf32>
      %74 = vector.broadcast %69 : vector<1x32xf32> to vector<16x32xf32>
      %75 = arith.addf %73, %74 : vector<16x32xf32>
      %cst_63 = arith.constant 0.000000e+00 : f32
      %76 = vector.broadcast %cst_63 : f32 to vector<16x32xf32>
      %77 = arith.maximumf %75, %76 : vector<16x32xf32>
      %cst_64 = arith.constant dense<0.000000e+00> : vector<16x32xf32>
      %78 = tpu.matmul %77, %67, %cst_64 {dimension_numbers = #tpu.dot_dimension_numbers<[1], [0], [0], [1], [0, 0, 1, 1], [], []>} : vector<16x32xf32>, vector<32x32xf32>, vector<16x32xf32> -> vector<16x32xf32>
      %cst_65 = arith.constant dense<0.000000e+00> : vector<16x32xf32>
      %79 = tpu.matmul %20, %78, %cst_65 {dimension_numbers = #tpu.dot_dimension_numbers<[1], [0], [0], [1], [0, 0, 1, 1], [], []>} : vector<16x16xf32>, vector<16x32xf32>, vector<16x32xf32> -> vector<16x32xf32>
      %80 = vector.broadcast %71 : vector<1x32xf32> to vector<16x32xf32>
      %81 = arith.addf %79, %80 : vector<16x32xf32>
      %82 = arith.addf %81, %63 : vector<16x32xf32>
      %cst_66 = arith.constant 0.000000e+00 : f32
      %83 = vector.broadcast %cst_66 : f32 to vector<16x32xf32>
      %84 = arith.maximumf %82, %83 : vector<16x32xf32>
      %c0_67 = arith.constant 0 : index
      %c0_68 = arith.constant 0 : index
      %85 = vector.load %arg3[%c0_67, %c0_68] : memref<2x16xf32, #tpu.memory_space<vmem>>, vector<2x16xf32>
      %cst_69 = arith.constant dense<0.000000e+00> : vector<2x32xf32>
      %86 = tpu.matmul %85, %84, %cst_69 {dimension_numbers = #tpu.dot_dimension_numbers<[1], [0], [0], [1], [0, 0, 1, 1], [], []>} : vector<2x16xf32>, vector<16x32xf32>, vector<2x32xf32> -> vector<2x32xf32>
      %c0_70 = arith.constant 0 : index
      %c0_71 = arith.constant 0 : index
      %87 = vector.load %arg8[%c0_70, %c0_71] : memref<32x32xf32, #tpu.memory_space<vmem>>, vector<32x32xf32>
      %cst_72 = arith.constant dense<0.000000e+00> : vector<2x32xf32>
      %88 = tpu.matmul %86, %87, %cst_72 {dimension_numbers = #tpu.dot_dimension_numbers<[1], [0], [0], [1], [0, 0, 1, 1], [], []>} : vector<2x32xf32>, vector<32x32xf32>, vector<2x32xf32> -> vector<2x32xf32>
      %c0_73 = arith.constant 0 : index
      %c0_74 = arith.constant 0 : index
      %89 = vector.load %arg9[%c0_73, %c0_74] : memref<1x32xf32, #tpu.memory_space<vmem>>, vector<1x32xf32>
      %90 = vector.broadcast %89 : vector<1x32xf32> to vector<2x32xf32>
      %91 = arith.addf %88, %90 : vector<2x32xf32>
      %c0_75 = arith.constant 0 : index
      %c0_76 = arith.constant 0 : index
      %92 = vector.load %arg4[%c0_75, %c0_76] : memref<2x64xf32, #tpu.memory_space<vmem>>, vector<2x64xf32>
      %93 = arith.truncf %92 : vector<2x64xf32> to vector<2x64xbf16>
      %c0_77 = arith.constant 0 : index
      %c0_78 = arith.constant 0 : index
      %94 = vector.load %arg10[%c0_77, %c0_78] : memref<64x1024xbf16, #tpu.memory_space<vmem>>, vector<64x1024xbf16>
      %cst_79 = arith.constant dense<0.000000e+00> : vector<2x1024xf32>
      %95 = tpu.matmul %93, %94, %cst_79 {dimension_numbers = #tpu.dot_dimension_numbers<[1], [0], [0], [1], [0, 0, 1, 1], [], []>} : vector<2x64xbf16>, vector<64x1024xbf16>, vector<2x1024xf32> -> vector<2x1024xf32>
      %96 = arith.truncf %91 : vector<2x32xf32> to vector<2x32xbf16>
      %c0_80 = arith.constant 0 : index
      %c0_81 = arith.constant 0 : index
      %97 = vector.load %arg11[%c0_80, %c0_81] : memref<32x1024xbf16, #tpu.memory_space<vmem>>, vector<32x1024xbf16>
      %cst_82 = arith.constant dense<0.000000e+00> : vector<2x1024xf32>
      %98 = tpu.matmul %96, %97, %cst_82 {dimension_numbers = #tpu.dot_dimension_numbers<[1], [0], [0], [1], [0, 0, 1, 1], [], []>} : vector<2x32xbf16>, vector<32x1024xbf16>, vector<2x1024xf32> -> vector<2x1024xf32>
      %99 = arith.addf %95, %98 : vector<2x1024xf32>
      %c0_83 = arith.constant 0 : index
      %c0_84 = arith.constant 0 : index
      %100 = vector.load %arg12[%c0_83, %c0_84] : memref<1x1024xf32, #tpu.memory_space<vmem>>, vector<1x1024xf32>
      %101 = vector.broadcast %100 : vector<1x1024xf32> to vector<2x1024xf32>
      %102 = arith.addf %99, %101 : vector<2x1024xf32>
      %cst_85 = arith.constant 0.000000e+00 : f32
      %103 = vector.broadcast %cst_85 : f32 to vector<2x1024xf32>
      %104 = arith.maximumf %102, %103 : vector<2x1024xf32>
      %105 = arith.truncf %104 : vector<2x1024xf32> to vector<2x1024xbf16>
      %c0_86 = arith.constant 0 : index
      %c0_87 = arith.constant 0 : index
      %106 = vector.load %arg20[%c0_86, %c0_87] : memref<2x1024xbf16, #tpu.memory_space<vmem>>, vector<2x1024xbf16>
      tpu.vector_store %arg20[%c0_86, %c0_87], %105 {strides = array<i32>} : memref<2x1024xbf16, #tpu.memory_space<vmem>>, vector<2x1024xbf16>,
      %cst_88 = arith.constant 0.000000e+00 : f32
      %107 = vector.broadcast %cst_88 : f32 to vector<2x1024xf32>
      %c0_89 = arith.constant 0 : index
      %c0_90 = arith.constant 0 : index
      %108 = vector.load %arg21[%c0_89, %c0_90] : memref<2x1024xf32, #tpu.memory_space<vmem>>, vector<2x1024xf32>
      tpu.vector_store %arg21[%c0_89, %c0_90], %107 {strides = array<i32>} : memref<2x1024xf32, #tpu.memory_space<vmem>>, vector<2x1024xf32>,
    } else {
    }
    %c0 = arith.constant 0 : index
    %c0_1 = arith.constant 0 : index
    %3 = vector.load %arg20[%c0, %c0_1] : memref<2x1024xbf16, #tpu.memory_space<vmem>>, vector<2x1024xbf16>
    %c0_2 = arith.constant 0 : index
    %c0_3 = arith.constant 0 : index
    %4 = vector.load %arg13[%c0_2, %c0_3] : memref<1024x256xbf16, #tpu.memory_space<vmem>>, vector<1024x256xbf16>
    %cst = arith.constant dense<0.000000e+00> : vector<2x256xf32>
    %5 = tpu.matmul %3, %4, %cst {dimension_numbers = #tpu.dot_dimension_numbers<[1], [0], [0], [1], [0, 0, 1, 1], [], []>} : vector<2x1024xbf16>, vector<1024x256xbf16>, vector<2x256xf32> -> vector<2x256xf32>
    %c0_4 = arith.constant 0 : index
    %c0_5 = arith.constant 0 : index
    %6 = vector.load %arg14[%c0_4, %c0_5] : memref<1x256xf32, #tpu.memory_space<vmem>>, vector<1x256xf32>
    %7 = vector.broadcast %6 : vector<1x256xf32> to vector<2x256xf32>
    %8 = arith.addf %5, %7 : vector<2x256xf32>
    %cst_6 = arith.constant 0.000000e+00 : f32
    %9 = vector.broadcast %cst_6 : f32 to vector<2x256xf32>
    %10 = arith.maximumf %8, %9 : vector<2x256xf32>
    %c0_7 = arith.constant 0 : index
    %c0_8 = arith.constant 0 : index
    %11 = vector.load %arg21[%c0_7, %c0_8] : memref<2x1024xf32, #tpu.memory_space<vmem>>, vector<2x1024xf32>
    %12 = arith.truncf %10 : vector<2x256xf32> to vector<2x256xbf16>
    %c0_9 = arith.constant 0 : index
    %c0_10 = arith.constant 0 : index
    %13 = vector.load %arg15[%c0_9, %c0_10] : memref<256x1024xbf16, #tpu.memory_space<vmem>>, vector<256x1024xbf16>
    %cst_11 = arith.constant dense<0.000000e+00> : vector<2x1024xf32>
    %14 = tpu.matmul %12, %13, %cst_11 {dimension_numbers = #tpu.dot_dimension_numbers<[1], [0], [0], [1], [0, 0, 1, 1], [], []>} : vector<2x256xbf16>, vector<256x1024xbf16>, vector<2x1024xf32> -> vector<2x1024xf32>
    %15 = arith.addf %11, %14 : vector<2x1024xf32>
    %c0_12 = arith.constant 0 : index
    %c0_13 = arith.constant 0 : index
    %16 = vector.load %arg21[%c0_12, %c0_13] : memref<2x1024xf32, #tpu.memory_space<vmem>>, vector<2x1024xf32>
    tpu.vector_store %arg21[%c0_12, %c0_13], %15 {strides = array<i32>} : memref<2x1024xf32, #tpu.memory_space<vmem>>, vector<2x1024xf32>,
    %c3_i32 = arith.constant 3 : i32
    %17 = arith.cmpi eq, %arg0, %c3_i32 : i32
    %18 = arith.extui %17 : i1 to i32
    %c0_i32_14 = arith.constant 0 : i32
    %19 = arith.cmpi ne, %18, %c0_i32_14 : i32
    scf.if %19 {
      %c0_15 = arith.constant 0 : index
      %c0_16 = arith.constant 0 : index
      %20 = vector.load %arg21[%c0_15, %c0_16] : memref<2x1024xf32, #tpu.memory_space<vmem>>, vector<2x1024xf32>
      %c0_17 = arith.constant 0 : index
      %c0_18 = arith.constant 0 : index
      %21 = vector.load %arg16[%c0_17, %c0_18] : memref<1x1024xf32, #tpu.memory_space<vmem>>, vector<1x1024xf32>
      %22 = vector.broadcast %21 : vector<1x1024xf32> to vector<2x1024xf32>
      %23 = arith.addf %20, %22 : vector<2x1024xf32>
      %cst_19 = arith.constant 0.000000e+00 : f32
      %24 = vector.broadcast %cst_19 : f32 to vector<2x1024xf32>
      %25 = arith.maximumf %23, %24 : vector<2x1024xf32>
      %26 = arith.truncf %25 : vector<2x1024xf32> to vector<2x1024xbf16>
      %c0_20 = arith.constant 0 : index
      %c0_21 = arith.constant 0 : index
      %27 = vector.load %arg17[%c0_20, %c0_21] : memref<1024x1xbf16, #tpu.memory_space<vmem>>, vector<1024x1xbf16>
      %cst_22 = arith.constant dense<0.000000e+00> : vector<2x1xf32>
      %28 = tpu.matmul %26, %27, %cst_22 {dimension_numbers = #tpu.dot_dimension_numbers<[1], [0], [0], [1], [0, 0, 1, 1], [], []>} : vector<2x1024xbf16>, vector<1024x1xbf16>, vector<2x1xf32> -> vector<2x1xf32>
      %c0_23 = arith.constant 0 : index
      %c0_24 = arith.constant 0 : index
      %29 = vector.load %arg18[%c0_23, %c0_24] : memref<1x1xf32, #tpu.memory_space<vmem>>, vector<1x1xf32>
      %30 = vector.broadcast %29 : vector<1x1xf32> to vector<2x1xf32>
      %31 = arith.addf %28, %30 : vector<2x1xf32>
      %c0_25 = arith.constant 0 : index
      %c0_26 = arith.constant 0 : index
      %32 = vector.load %arg19[%c0_25, %c0_26] : memref<2x1xf32, #tpu.memory_space<vmem>>, vector<2x1xf32>
      tpu.vector_store %arg19[%c0_25, %c0_26], %31 {strides = array<i32>} : memref<2x1xf32, #tpu.memory_space<vmem>>, vector<2x1xf32>,
    } else {
    }
    return
  }
  func.func @transform_0(%arg0: i32) -> (i32, i32) {
    %c0_i32 = arith.constant 0 : i32
    %c0_i32_0 = arith.constant 0 : i32
    %c0_i32_1 = arith.constant 0 : i32
    return %c0_i32, %c0_i32_0 : i32, i32
  }
  func.func @transform_1(%arg0: i32) -> (i32, i32) {
    %c0_i32 = arith.constant 0 : i32
    %c0_i32_0 = arith.constant 0 : i32
    %c0_i32_1 = arith.constant 0 : i32
    return %c0_i32, %c0_i32_0 : i32, i32
  }
  func.func @transform_2(%arg0: i32) -> (i32, i32) {
    %c0_i32 = arith.constant 0 : i32
    %c0_i32_0 = arith.constant 0 : i32
    %c0_i32_1 = arith.constant 0 : i32
    return %c0_i32, %c0_i32_0 : i32, i32
  }
  func.func @transform_3(%arg0: i32) -> (i32, i32) {
    %c0_i32 = arith.constant 0 : i32
    %c0_i32_0 = arith.constant 0 : i32
    %c0_i32_1 = arith.constant 0 : i32
    return %c0_i32, %c0_i32_0 : i32, i32
  }
  func.func @transform_4(%arg0: i32) -> (i32, i32) {
    %c0_i32 = arith.constant 0 : i32
    %c0_i32_0 = arith.constant 0 : i32
    %c0_i32_1 = arith.constant 0 : i32
    return %c0_i32, %c0_i32_0 : i32, i32
  }
  func.func @transform_5(%arg0: i32) -> (i32, i32, i32) {
    %c0_i32 = arith.constant 0 : i32
    %c0_i32_0 = arith.constant 0 : i32
    %c0_i32_1 = arith.constant 0 : i32
    %c0_i32_2 = arith.constant 0 : i32
    return %c0_i32, %c0_i32_0, %c0_i32_1 : i32, i32, i32
  }
  func.func @transform_6(%arg0: i32) -> (i32, i32, i32) {
    %c0_i32 = arith.constant 0 : i32
    %c0_i32_0 = arith.constant 0 : i32
    %c0_i32_1 = arith.constant 0 : i32
    %c0_i32_2 = arith.constant 0 : i32
    return %c0_i32, %c0_i32_0, %c0_i32_1 : i32, i32, i32
  }
  func.func @transform_7(%arg0: i32) -> (i32, i32) {
    %c0_i32 = arith.constant 0 : i32
    %c0_i32_0 = arith.constant 0 : i32
    %c0_i32_1 = arith.constant 0 : i32
    return %c0_i32, %c0_i32_0 : i32, i32
  }
  func.func @transform_8(%arg0: i32) -> (i32, i32) {
    %c0_i32 = arith.constant 0 : i32
    %c0_i32_0 = arith.constant 0 : i32
    %c0_i32_1 = arith.constant 0 : i32
    return %c0_i32, %c0_i32_0 : i32, i32
  }
  func.func @transform_9(%arg0: i32) -> (i32, i32) {
    %c0_i32 = arith.constant 0 : i32
    %c0_i32_0 = arith.constant 0 : i32
    %c0_i32_1 = arith.constant 0 : i32
    return %c0_i32, %c0_i32_0 : i32, i32
  }
  func.func @transform_10(%arg0: i32) -> (i32, i32) {
    %c0_i32 = arith.constant 0 : i32
    %c0_i32_0 = arith.constant 0 : i32
    %c0_i32_1 = arith.constant 0 : i32
    return %c0_i32, %c0_i32_0 : i32, i32
  }
  func.func @transform_11(%arg0: i32) -> (i32, i32) {
    %c0_i32 = arith.constant 0 : i32
    %c0_i32_0 = arith.constant 0 : i32
    %c0_i32_1 = arith.constant 0 : i32
    return %c0_i32, %c0_i32_0 : i32, i32
  }
  func.func @transform_12(%arg0: i32) -> (i32, i32) {
    %c0_i32 = arith.constant 0 : i32
    %c0_i32_0 = arith.constant 0 : i32
    return %c0_i32, %arg0 : i32, i32
  }
  func.func @transform_13(%arg0: i32) -> (i32, i32) {
    %c0_i32 = arith.constant 0 : i32
    %c0_i32_0 = arith.constant 0 : i32
    return %c0_i32, %arg0 : i32, i32
  }
  func.func @transform_14(%arg0: i32) -> (i32, i32) {
    %c0_i32 = arith.constant 0 : i32
    %c0_i32_0 = arith.constant 0 : i32
    return %arg0, %c0_i32 : i32, i32
  }
  func.func @transform_15(%arg0: i32) -> (i32, i32) {
    %c0_i32 = arith.constant 0 : i32
    %c0_i32_0 = arith.constant 0 : i32
    %c0_i32_1 = arith.constant 0 : i32
    return %c0_i32, %c0_i32_0 : i32, i32
  }
  func.func @transform_16(%arg0: i32) -> (i32, i32) {
    %c0_i32 = arith.constant 0 : i32
    %c0_i32_0 = arith.constant 0 : i32
    %c0_i32_1 = arith.constant 0 : i32
    return %c0_i32, %c0_i32_0 : i32, i32
  }
  func.func @transform_17(%arg0: i32) -> (i32, i32) {
    %c0_i32 = arith.constant 0 : i32
    %c0_i32_0 = arith.constant 0 : i32
    %c0_i32_1 = arith.constant 0 : i32
    return %c0_i32, %c0_i32_0 : i32, i32
  }
  func.func @transform_18(%arg0: i32) -> (i32, i32) {
    %c0_i32 = arith.constant 0 : i32
    %c0_i32_0 = arith.constant 0 : i32
    %c0_i32_1 = arith.constant 0 : i32
    return %c0_i32, %c0_i32_0 : i32, i32
  }
}

</mosaic_0001>

<bundles_post_ra>
// kernel: tpu_custom_call.1
= control target key start
LH: loop header
LB: loop body
LE: loop exit
PB: predicated region body
PF: predicated region fallthrough
CT: control target
= control target key end

     0   :  { %s8472_s0 = inlined_call_operand.hbm [shape: f32[16,16], index: 0, kind: input, shape index: {}]   ;;  %s8473_s1 = inlined_call_operand.vmem [shape: f32[16,1], index: 1, kind: input, shape index: {}]   ;;  %s8474_s2 = inlined_call_operand.hbm [shape: f32[2,16], index: 2, kind: input, shape index: {}]   ;;  %s8475_s3 = inlined_call_operand.hbm [shape: f32[2,64], index: 3, kind: input, shape index: {}]   ;;  %s8476_s4 = inlined_call_operand.hbm [shape: f32[1,32], index: 4, kind: input, shape index: {}]   ;;  %s8477_s5 = inlined_call_operand.hbm [shape: f32[5,32,32], index: 5, kind: input, shape index: {}]   ;;  %s8478_s6 = inlined_call_operand.hbm [shape: f32[6,1,32], index: 6, kind: input, shape index: {}]   ;;  %s8479_s7 = inlined_call_operand.hbm [shape: f32[32,32], index: 7, kind: input, shape index: {}]   ;;  %s8480_s8 = inlined_call_operand.hbm [shape: f32[1,32], index: 8, kind: input, shape index: {}]   ;;  %s8481_s9 = inlined_call_operand.hbm [shape: bf16[64,1024], index: 9, kind: input, shape index: {}]   ;;  %s8482_s10 = inlined_call_operand.hbm [shape: bf16[32,1024], index: 10, kind: input, shape index: {}]   ;;  %s8483_s11 = inlined_call_operand.hbm [shape: f32[1,1024], index: 11, kind: input, shape index: {}]   ;;  %s8484_s12 = inlined_call_operand.hbm [shape: bf16[1024,1024], index: 12, kind: input, shape index: {}]   ;;  %s8485_s13 = inlined_call_operand.hbm [shape: f32[1,1024], index: 13, kind: input, shape index: {}]   ;;  %s8486_s14 = inlined_call_operand.hbm [shape: bf16[1024,1024], index: 14, kind: input, shape index: {}]   ;;  %s8487_s15 = inlined_call_operand.hbm [shape: f32[1,1024], index: 15, kind: input, shape index: {}]   ;;  %s8488_s16 = inlined_call_operand.vmem [shape: bf16[1024,1], index: 16, kind: input, shape index: {}]   ;;  %s8489_s17 = inlined_call_operand.<no memory space> [shape: f32[1,1], index: 17, kind: input, shape index: {}]   ;;  %s8490_s18 = inlined_call_operand.vmem [shape: f32[2,1], index: 18, kind: output, shape index: {}]  }
   0x1   :  { %8509 = sst [smem:[#allocation39_spill]] %s8472_s0  ;;  %v23_v0 = vstv %s8489_s17 }
   0x2   :  { %8510 = sst [smem:[#allocation40_spill]] %s8473_s1  ;;  %24 = vst [vmem:[#allocation4] sm:$0x1] %v23_v0 }
   0x3   :  { %8511 = sst [smem:[#allocation41_spill]] %s8474_s2 }
   0x4   :  { %8512 = sst [smem:[#allocation42_spill]] %s8475_s3 }
   0x5   :  { %8513 = sst [smem:[#allocation43_spill]] %s8476_s4 }
   0x6   :  { %8514 = sst [smem:[#allocation44_spill]] %s8477_s5 }
   0x7   :  { %8515 = sst [smem:[#allocation45_spill]] %s8478_s6 }
   0x8   :  { %8516 = sst [smem:[#allocation46_spill]] %s8479_s7 }
   0x9   :  { %8517 = sst [smem:[#allocation47_spill]] %s8480_s8 }
   0xa   :  { %8518 = sst [smem:[#allocation48_spill]] %s8482_s10 }
   0xb   :  { %8519 = sst [smem:[#allocation49_spill]] %s8487_s15 }
   0xc   :  { %8520 = sst [smem:[#allocation50_spill]] %s8488_s16 }
   0xd   :  { %8521 = sst [smem:[#allocation51_spill]] %s8490_s18 }
   0xe   :  { %25 = vsyncpa [#allocation6], 0 }
   0xf   :  { %26 = vsyncpa [#allocation8], 0 }
  0x10   :  { %27 = vsyncpa [#allocation11], 0 }
  0x11   :  { %28 = vsyncpa [#allocation14], 0 }
  0x12   :  { %29 = vsyncpa [#allocation17], 0 }
  0x13   :  { %30 = vsyncpa [#allocation20], 0 }
  0x14   :  { %31 = vsyncpa [#allocation23], 0 }
  0x15   :  { %33 = vsyncpa [#allocation23 + $0x1], 0 }
  0x16   :  { %34 = vsyncpa [#allocation26], 0 }
  0x17   :  { %36 = vsyncpa [#allocation26 + $0x1], 0  ;;  %s7557_s29 = smov 0   ;;  %s7559_s30 = smov 0  }
  0x18   :  { %s7561_s0 = smov 0   ;;  %s7563_s19 = smov 0  }
  0x19 LB: > { %s7432_s17 = smov [#allocation7]   ;;  %s7578_s20 = sadd.s32 4294967295, %s7430_s19   ;;  %s7430_s19 = sphi %s7563_s19, %s8569_s19   ;;  %s7426_s0 = sphi %s7561_s0, %s8573_s0   ;;  %s7422_s30 = sphi %s7559_s30, %s8572_s30   ;;  %s7418_s29 = sphi %s7557_s29, %s8571_s29  }
  0x1a   : > { %s490_s1 = sshll.u32 %s7432_s17, 4  ;;  %p5792_p0 = scmp.ge.s32.totalorder %s7430_s19, 1  ;;  %s491_s1 = int_to_ptr.vmem [resolvable:$true] %s490_s1 }
  0x1b   : > { %p8492_p1 = scmp.eq.s32.totalorder %s7578_s20, 0  ;;  %p461_p2 = scmp.lt.s32.totalorder %s7430_s19, 5 }
  0x1c   : > { %s7433_s22 = smov [#allocation10]   ;;  %s7434_s23 = smov [#allocation13]  }
  0x1d   : > { %p7584_p4 = pnand %p5792_p0, %p461_p2  ;;  %s512_s2 = sshll.u32 %s7433_s22, 4  ;;  %s513_s2 = int_to_ptr.vmem [resolvable:$true] %s512_s2 }
  0x1e   : > { %s535_s24 = sshll.u32 %s7434_s23, 4  ;;  %s6979_s27 = scalar_lea.vmem %s491_s1, 32  ;;  %s7596_s24 = int_to_ptr.vmem [resolvable:$true] %s535_s24 }
  0x1f   : > { %s8522_s21 = scalar_select %p7584_p4, 1, 0 }
  0x20   : > { %p6582_p5 = pneg %p7584_p4  ;;  %p6980_p8 = scmp.ne.s32.totalorder %s491_s1, %s6979_s27 }
  0x21   : > { %p6987_p11 = scmp.lt.s32.totalorder %s491_s1, %s491_s1  ;;  %p6988_p12 = scmp.lt.s32.totalorder %s6979_s27, %s6979_s27 }
  0x22   : > { %p7592_p6 = pnand %p6582_p5, %p8492_p1 }
  0x23   : > { %p6989_p13 = por %p6988_p12, %p6987_p11 }
  0x24   : > { %s8523_s25 = scalar_select %p7592_p6, 1, 0 }
  0x25   : > { %p7600_p7 = pneg %p7592_p6 }
  0x27   : > { %s8524_s26 = scalar_select %p7600_p7, 1, 0 }
  0x28   : > { %p6982_p9 = pnand %p6980_p8, %p7600_p7 }
  0x2a   : > { %p6983_p10 = pneg %p6982_p9 }
  0x2c   : > { %p6990_p0 = pnand %p6989_p13, %p6983_p10 }
  0x2e   : > { %6993 = shalt.err (!%p6990_p0)
}
  0x2f   : > { %s8525_s22 = sld [smem:[#allocation41_spill]]  ;;  %s7005_s23 = scalar_lea.vmem %s513_s2, 16 }
  0x30   : > { %p7006_p2 = scmp.ne.s32.totalorder %s513_s2, %s7005_s23  ;;  %s7012_s18 = scalar_lea.vmem %s513_s2, 32 }
  0x31   : > { %p7013_p8 = scmp.lt.s32.totalorder %s513_s2, %s513_s2  ;;  %p7014_p9 = scmp.lt.s32.totalorder %s7012_s18, %s7005_s23 }
  0x32   : > { %p7008_p5 = pnand %p7006_p2, %p7600_p7 }
  0x33   : > { %p7015_p1 = por %p7014_p9, %p7013_p8 }
  0x34   : > { %p7009_p3 = pneg %p7008_p5 }
  0x35   : > { %6588 = dma.hbm_to_vmem [thread:$0]  (!%p7592_p6), %s8525_s22, 32, %s491_s1, [#allocation8]  }
  0x36   : > { %p7016_p4 = pnand %p7015_p1, %p7009_p3 }
  0x38   : > { %7019 = shalt.err (!%p7016_p4)
}
  0x39   : > { %s8526_s4 = sld [smem:[#allocation43_spill]]  ;;  %s7031_s1 = scalar_lea.vmem %s7596_s24, 96 }
  0x3a   : > { %p7032_p10 = scmp.ne.s32.totalorder %s7596_s24, %s7031_s1  ;;  %p7039_p13 = scmp.lt.s32.totalorder %s7596_s24, %s7596_s24 }
  0x3b   : > { %p7040_p0 = scmp.lt.s32.totalorder %s7031_s1, %s7031_s1 }
  0x3c   : > { %p7034_p11 = pnand %p7032_p10, %p7600_p7 }
  0x3d   : > { %p7041_p1 = por %p7040_p0, %p7039_p13 }
  0x3e   : > { %p7035_p12 = pneg %p7034_p11 }
  0x3f   : > { %6594 = dma.hbm_to_vmem [thread:$0]  (!%p7592_p6), %s8526_s4, 16, %s513_s2, [#allocation11]  }
  0x40   : > { %p7042_p3 = pnand %p7041_p1, %p7035_p12 }
  0x42   : > { %7045 = shalt.err (!%p7042_p3)
}
  0x43   : > { %s7435_s18 = smov 16   ;;  %s7436_s16 = smov 1  }
  0x44   : > { %s8527_s6 = sld [smem:[#allocation45_spill]]  ;;  %s7437_s2 = smov [#allocation16]  }
  0x45   : > { %s562_s22 = sshll.u32 %s7437_s2, 4  ;;  %s563_s22 = int_to_ptr.vmem [resolvable:$true] %s562_s22 }
  0x46   : > { %s7057_s23 = scalar_lea.vmem %s563_s22, 16  ;;  %s7064_s27 = scalar_lea.vmem %s563_s22, 32 }
  0x47   : > { %p7058_p4 = scmp.ne.s32.totalorder %s563_s22, %s7057_s23  ;;  %p7065_p8 = scmp.lt.s32.totalorder %s563_s22, %s563_s22 }
  0x48   : > { %p7066_p9 = scmp.lt.s32.totalorder %s7064_s27, %s7057_s23 }
  0x49   : > { %p7060_p2 = pnand %p7058_p4, %p7600_p7 }
  0x4a   : > { %6600 = dma.hbm_to_vmem [thread:$0]  (!%p7592_p6), %s8527_s6, 96, %s7596_s24, [#allocation14], %s7435_s18, %s7435_s18, %s7436_s16  }
  0x4b   : > { %p7061_p5 = pneg %p7060_p2  ;;  %p7067_p10 = por %p7066_p9, %p7065_p8 }
  0x4d   : > { %p7068_p11 = pnand %p7067_p10, %p7061_p5 }
  0x4f   : > { %7071 = shalt.err (!%p7068_p11)
}
  0x50   : > { %s8528_s8 = sld [smem:[#allocation47_spill]]  ;;  %s7438_s24 = smov [#allocation19]  }
  0x51   : > { %s585_s18 = sshll.u32 %s7438_s24, 4  ;;  %s7439_s16 = smov [#allocation27]   ;;  %s586_s18 = int_to_ptr.vmem [resolvable:$true] %s585_s18 }
  0x52   : > { %s610_s28 = sshll.u32 %s7439_s16, 4  ;;  %s7083_s17 = scalar_lea.vmem %s586_s18, 2048  ;;  %s611_s28 = int_to_ptr.vmem [resolvable:$true] %s610_s28 }
  0x53   : > { %p7084_p12 = scmp.ne.s32.totalorder %s586_s18, %s7083_s17  ;;  %p7091_p1 = scmp.lt.s32.totalorder %s586_s18, %s586_s18 }
  0x54   : > { %p7092_p3 = scmp.lt.s32.totalorder %s7083_s17, %s7083_s17 }
  0x55   : > { %p7086_p13 = pnand %p7084_p12, %p7600_p7 }
  0x56   : > { %6606 = dma.hbm_to_vmem [thread:$0]  (!%p7592_p6), %s8528_s8, 16, %s563_s22, [#allocation17]  }
  0x57   : > { %p7087_p0 = pneg %p7086_p13  ;;  %p7093_p4 = por %p7092_p3, %p7091_p1 }
  0x59   : > { %p7094_p2 = pnand %p7093_p4, %p7087_p0 }
  0x5b   : > { %7097 = shalt.err (!%p7094_p2)
}
  0x5c   : > { %s8497_s2 = smov 512   ;;  %s8495_s4 = smov 32  }
  0x5d   : > { %s8529_s10 = sld [smem:[#allocation48_spill]]  ;;  %s7109_s27 = scalar_lea.vmem %s611_s28, 128 }
  0x5e   : > { %p7110_p5 = scmp.ne.s32.totalorder %s611_s28, %s7109_s27  ;;  %p7117_p10 = scmp.lt.s32.totalorder %s611_s28, %s611_s28 }
  0x5f   : > { %p7118_p11 = scmp.lt.s32.totalorder %s7109_s27, %s7109_s27 }
  0x60   : > { %p7112_p8 = pnand %p7110_p5, %p7600_p7 }
  0x61   : > { %p7119_p12 = por %p7118_p11, %p7117_p10 }
  0x62   : > { %p7113_p9 = pneg %p7112_p8 }
  0x63   : > { %6612 = dma.hbm_to_vmem [thread:$0]  (!%p7592_p6), %s8529_s10, 2048, %s586_s18, [#allocation20], %s8497_s2, %s8497_s2, %s8495_s4  }
  0x64   : > { %p7120_p13 = pnand %p7119_p12, %p7113_p9 }
  0x66   : > { %7123 = shalt.err (!%p7120_p13)
}
  0x67   : > { %s8530_s15 = sld [smem:[#allocation49_spill]]  ;;  %s7655_s18 = sadd.s32 1, %s7430_s19  }
  0x68   : > { %8531 = sst [smem:[#allocation37_spill]] %s7655_s18  ;;  %s301_s16 = sadd.s32 1, %s7426_s0 }
  0x69   : > { %s298_s17 = ssub.s32 %s7430_s19, %s7655_s18  ;;  %p308_p0 = scmp.ne.s32.totalorder %s7426_s0, %s7422_s30 }
  0x6a   : > { %p299_p1 = scmp.eq.s32.totalorder %s298_s17, 0  ;;  %p309_p3 = scmp.eq.s32.totalorder %s7430_s19, 0 }
  0x6b   : > { %p314_p4 = scmp.ne.s32.totalorder %s7422_s30, %s7418_s29  ;;  %p8533_p5 = scmp.eq.s32.totalorder %s7578_s20, 0 }
  0x6c   : > { %s7666_s22 = scalar_select %p299_p1, %s7426_s0, %s301_s16  }
  0x6d   : > { %6618 = dma.hbm_to_vmem [thread:$0]  (!%p7592_p6), %s8530_s15, 128, %s611_s28, [#allocation26]  }
  0x6e   : > { %8532 = sst [smem:[#allocation38_spill]] %s7666_s22  ;;  %p310_p2 = por %p309_p3, %p308_p0 }
  0x6f   : > { %p7670_p8 = por %p8533_p5, %p314_p4  ;;  %p6641_p9 = scmp.lt.s32.totalorder %s7430_s19, 4 }
  0x70   : > { %s8499_s27 = sand.u32 1, %s7426_s0   ;;  %s6251_s24 = sshll.u32 %s7430_s19, 7 }
  0x71   : > { %s8534_s23 = scalar_select %p7670_p8, 1, 0 }
  0x72   : > { %s7679_s1 = sshll.u32 %s8499_s27, 10  ;;  %s7685_s29 = scalar_lea.hbm %s8484_s12, %s6251_s24 }
  0x73   : > { %s631_s16 = scalar_lea.vmem [#allocation22], %s7679_s1  ;;  %p7690_p10 = pnand %p6641_p9, %p310_p2 }
  0x74   : > { %s638_s2 = sshll.u32 %s631_s16, 4  ;;  %s7442_s27 = smov [#allocation5]   ;;  %s7688_s2 = int_to_ptr.vmem [resolvable:$true] %s638_s2 }
  0x75   : > { %s7694_s6 = sshll.u32 %s7442_s27, 4  ;;  %s8536_s8 = sand.u32 1, %s7430_s19   ;;  %s474_s6 = int_to_ptr.vmem [resolvable:$true] %s7694_s6 }
  0x76   : > { %s7698_s10 = scalar_lea.sflag [#allocation23], %s8536_s8  ;;  %s7124_s4 = scalar_lea.hbm %s7685_s29, 16384 }
  0x77   : > { %p7125_p11 = scmp.ne.s32.totalorder %s7685_s29, %s7124_s4  ;;  %p7704_p12 = pneg %p7690_p10 }
  0x78   : > { %s7129_s15 = scalar_lea.hbm %s8484_s12, 65536  ;;  %p7130_p1 = scmp.lt.s32.totalorder %s7685_s29, %s8484_s12 }
  0x79   : > { %p7127_p13 = pnand %p7704_p12, %p7125_p11  ;;  %p7131_p3 = scmp.lt.s32.totalorder %s7129_s15, %s7124_s4 }
  0x7b   : > { %p7128_p0 = pneg %p7127_p13  ;;  %p7132_p4 = por %p7131_p3, %p7130_p1 }
  0x7d   : > { %p7133_p2 = pnand %p7132_p4, %p7128_p0 }
  0x7f   : > { %7136 = shalt.err (!%p7133_p2)
}
  0x80   : > { %s7137_s8 = scalar_lea.vmem %s7688_s2, 16384  ;;  %s7443_s18 = smov [#allocation22]  }
  0x81   : > { %p7138_p5 = scmp.ne.s32.totalorder %s7688_s2, %s7137_s8  ;;  %s7142_s17 = sshll.u32 %s7443_s18, 4  ;;  %s7143_s17 = int_to_ptr.vmem [resolvable:$false] %s7142_s17 }
  0x82   : > { %s7144_s16 = scalar_lea.vmem %s7143_s17, 32768  ;;  %p7145_p13 = scmp.lt.s32.totalorder %s7688_s2, %s7143_s17 }
  0x83   : > { %p7140_p9 = pnand %p7138_p5, %p7704_p12  ;;  %p7146_p8 = scmp.lt.s32.totalorder %s7144_s16, %s7137_s8 }
  0x85   : > { %p7141_p11 = pneg %p7140_p9  ;;  %p7147_p6 = por %p7146_p8, %p7145_p13 }
  0x87   : > { %p7148_p7 = pnand %p7147_p6, %p7141_p11 }
  0x89   : > { %7151 = shalt.err (!%p7148_p7)
}
  0x8a   : > { %s8507_s15 = smov 128   ;;  %s7445_s22 = smov 8  }
  0x8b   : > { %s8538_s4 = smov 512   ;;  %s7446_s18 = smov [#allocation9]  }
  0x8c   : > { %6622 = dma.hbm_to_vmem [thread:$0]  (!%p7690_p10), %s7685_s29, 16384, %s7688_s2, %s7698_s10, %s8538_s4, %s8507_s15, %s7445_s22  }
  0x8d   : > { %s501_s27 = sshll.u32 %s7446_s18, 4  ;;  %s7163_s8 = scalar_lea.vmem %s474_s6, 256  ;;  %s502_s27 = int_to_ptr.vmem [resolvable:$true] %s501_s27 }
  0x8e   : > { %p7164_p8 = scmp.ne.s32.totalorder %s474_s6, %s7163_s8  ;;  %p8539_p6 = scmp.ne.s32.totalorder %s8524_s26, 0 }
  0x8f   : > { %p7171_p1 = scmp.lt.s32.totalorder %s474_s6, %s474_s6  ;;  %p7172_p3 = scmp.lt.s32.totalorder %s7163_s8, %s7163_s8 }
  0x90   : > { %p7166_p7 = pnand %p7164_p8, %p8539_p6 }
  0x91   : > { %p7173_p4 = por %p7172_p3, %p7171_p1 }
  0x92   : > { %p7167_p0 = pneg %p7166_p7 }
  0x94   : > { %p7174_p2 = pnand %p7173_p4, %p7167_p0 }
  0x96   : > { %7177 = shalt.err (!%p7174_p2)
}
  0x97   : > { %p8540_p5 = scmp.ne.s32.totalorder %s8523_s25, 0  ;;  %s8541_s29 = sld [smem:[#allocation39_spill]] }
  0x98   : > { %s7189_s16 = scalar_lea.vmem %s502_s27, 32  ;;  %p7197_p8 = scmp.lt.s32.totalorder %s502_s27, %s502_s27 }
  0x99   : > { %p7190_p9 = scmp.ne.s32.totalorder %s502_s27, %s7189_s16  ;;  %p7198_p7 = scmp.lt.s32.totalorder %s7189_s16, %s7189_s16 }
  0x9b   : > { %p7192_p11 = pnand %p7190_p9, %p8539_p6  ;;  %p7199_p0 = por %p7198_p7, %p7197_p8 }
  0x9d   : > { %6585 = dma.hbm_to_vmem [thread:$0]  (!%p8540_p5), %s8541_s29, 256, %s474_s6, [#allocation6], %s8507_s15, %s8507_s15, %s7445_s22  }
  0x9e   : > { %p7193_p13 = pneg %p7192_p11 }
  0xa0   : > { %p7200_p1 = pnand %p7199_p0, %p7193_p13 }
  0xa2   : > { %7203 = shalt.err (!%p7200_p1)
}
  0xa3   : > { %s8542_s3 = sld [smem:[#allocation42_spill]]  ;;  %s7447_s17 = smov [#allocation12]  }
  0xa4   : > { %s522_s6 = sshll.u32 %s7447_s17, 4  ;;  %s7448_s2 = smov [#allocation15]   ;;  %s523_s6 = int_to_ptr.vmem [resolvable:$true] %s522_s6 }
  0xa5   : > { %s548_s29 = sshll.u32 %s7448_s2, 4  ;;  %s7215_s15 = scalar_lea.vmem %s523_s6, 2560  ;;  %s549_s29 = int_to_ptr.vmem [resolvable:$true] %s548_s29 }
  0xa6   : > { %p7216_p3 = scmp.ne.s32.totalorder %s523_s6, %s7215_s15  ;;  %p7223_p9 = scmp.lt.s32.totalorder %s523_s6, %s523_s6 }
  0xa7   : > { %p7224_p11 = scmp.lt.s32.totalorder %s7215_s15, %s7215_s15 }
  0xa8   : > { %p7218_p4 = pnand %p7216_p3, %p8539_p6 }
  0xa9   : > { %6591 = dma.hbm_to_vmem [thread:$0]  (!%p8540_p5), %s8542_s3, 32, %s502_s27, [#allocation8]  }
  0xaa   : > { %p7219_p2 = pneg %p7218_p4  ;;  %p7225_p13 = por %p7224_p11, %p7223_p9 }
  0xac   : > { %p7226_p8 = pnand %p7225_p13, %p7219_p2 }
  0xae   : > { %7229 = shalt.err (!%p7226_p8)
}
  0xaf   : > { %s8543_s16 = smov 128   ;;  %s8544_s5 = sld [smem:[#allocation44_spill]] }
  0xb0   : > { %s7241_s8 = scalar_lea.vmem %s549_s29, 512  ;;  %p7249_p3 = scmp.lt.s32.totalorder %s549_s29, %s549_s29 }
  0xb1   : > { %p7242_p7 = scmp.ne.s32.totalorder %s549_s29, %s7241_s8  ;;  %p7250_p4 = scmp.lt.s32.totalorder %s7241_s8, %s7241_s8 }
  0xb3   : > { %p7244_p0 = pnand %p7242_p7, %p8539_p6  ;;  %p7251_p2 = por %p7250_p4, %p7249_p3 }
  0xb5   : > { %6597 = dma.hbm_to_vmem [thread:$0]  (!%p8540_p5), %s8544_s5, 2560, %s523_s6, [#allocation11], %s8543_s16, %s8543_s16, %s7445_s22  }
  0xb6   : > { %p7245_p1 = pneg %p7244_p0 }
  0xb8   : > { %p7252_p9 = pnand %p7251_p2, %p7245_p1 }
  0xba   : > { %7255 = shalt.err (!%p7252_p9)
}
  0xbb   : > { %s8545_s7 = sld [smem:[#allocation46_spill]]  ;;  %s7449_s6 = smov [#allocation18]  }
  0xbc   : > { %s572_s2 = sshll.u32 %s7449_s6, 4  ;;  %s7450_s27 = smov [#allocation21]   ;;  %s573_s2 = int_to_ptr.vmem [resolvable:$true] %s572_s2 }
  0xbd   : > { %s599_s18 = sshll.u32 %s7450_s27, 4  ;;  %s7267_s3 = scalar_lea.vmem %s573_s2, 4096  ;;  %s600_s18 = int_to_ptr.vmem [resolvable:$true] %s599_s18 }
  0xbe   : > { %p7268_p11 = scmp.ne.s32.totalorder %s573_s2, %s7267_s3  ;;  %p7275_p7 = scmp.lt.s32.totalorder %s573_s2, %s573_s2 }
  0xbf   : > { %p7276_p0 = scmp.lt.s32.totalorder %s7267_s3, %s7267_s3 }
  0xc0   : > { %p7270_p13 = pnand %p7268_p11, %p8539_p6 }
  0xc1   : > { %6603 = dma.hbm_to_vmem [thread:$0]  (!%p8540_p5), %s8545_s7, 512, %s549_s29, [#allocation14], %s8543_s16, %s8543_s16, %s7445_s22  }
  0xc2   : > { %p7271_p8 = pneg %p7270_p13  ;;  %p7277_p1 = por %p7276_p0, %p7275_p7 }
  0xc4   : > { %p7278_p3 = pnand %p7277_p1, %p7271_p8 }
  0xc6   : > { %7281 = shalt.err (!%p7278_p3)
}
  0xc7   : > { %s8546_s8 = smov 32   ;;  %s8547_s16 = sand.u32 1, %s7426_s0  }
  0xc8   : > { %6609 = dma.hbm_to_vmem [thread:$0]  (!%p8540_p5), %s8481_s9, 4096, %s573_s2, [#allocation17], %s8538_s4, %s8538_s4, %s8546_s8  }
  0xc9   : > { %s5809_s15 = sshll.u32 %s8547_s16, 1  ;;  %s7293_s17 = scalar_lea.vmem %s600_s18, 128 }
  0xca   : > { %p7294_p4 = scmp.ne.s32.totalorder %s600_s18, %s7293_s17  ;;  %p7301_p11 = scmp.lt.s32.totalorder %s600_s18, %s600_s18 }
  0xcb   : > { %p7302_p13 = scmp.lt.s32.totalorder %s7293_s17, %s7293_s17 }
  0xcc   : > { %p7296_p2 = pnand %p7294_p4, %p8539_p6 }
  0xcd   : > { %p7303_p8 = por %p7302_p13, %p7301_p11 }
  0xce   : > { %p7297_p9 = pneg %p7296_p2 }
  0xd0   : > { %p7304_p7 = pnand %p7303_p8, %p7297_p9 }
  0xd2   : > { %7307 = shalt.err (!%p7304_p7)
}
  0xd3   : > { %6615 = dma.hbm_to_vmem [thread:$0]  (!%p8540_p5), %s8483_s11, 128, %s600_s18, [#allocation20]  }
  0xd4   : > { %s6252_s2 = sshll.u32 %s7430_s19, 5  ;;  %s652_s29 = scalar_lea.vmem [#allocation24], %s5809_s15 }
  0xd5   : > { %s658_s26 = scalar_lea.hbm %s8485_s13, %s6252_s2  ;;  %s660_s16 = sshll.u32 %s652_s29, 4  ;;  %s661_s16 = int_to_ptr.vmem [resolvable:$true] %s660_s16 }
  0xd6   : > { %s7308_s17 = scalar_lea.hbm %s658_s26, 32  ;;  %s7313_s3 = scalar_lea.hbm %s8485_s13, 128 }
  0xd7   : > { %p7309_p6 = scmp.ne.s32.totalorder %s658_s26, %s7308_s17  ;;  %p7314_p5 = scmp.lt.s32.totalorder %s658_s26, %s8485_s13 }
  0xd8   : > { %p7315_p3 = scmp.lt.s32.totalorder %s7313_s3, %s7308_s17 }
  0xd9   : > { %p7311_p0 = pnand %p7309_p6, %p7704_p12 }
  0xda   : > { %p7316_p4 = por %p7315_p3, %p7314_p5 }
  0xdb   : > { %p7312_p1 = pneg %p7311_p0 }
  0xdd   : > { %p7317_p2 = pnand %p7316_p4, %p7312_p1 }
  0xdf   : > { %7320 = shalt.err (!%p7317_p2)
}
  0xe0   : > { %s7321_s18 = scalar_lea.vmem %s661_s16, 32  ;;  %s7451_s15 = smov [#allocation24]  }
  0xe1   : > { %p7322_p9 = scmp.ne.s32.totalorder %s661_s16, %s7321_s18  ;;  %s7326_s2 = sshll.u32 %s7451_s15, 4  ;;  %s7327_s2 = int_to_ptr.vmem [resolvable:$false] %s7326_s2 }
  0xe2   : > { %s7328_s27 = scalar_lea.vmem %s7327_s2, 64  ;;  %p7329_p8 = scmp.lt.s32.totalorder %s661_s16, %s7327_s2 }
  0xe3   : > { %p7324_p11 = pnand %p7322_p9, %p7704_p12  ;;  %p7330_p7 = scmp.lt.s32.totalorder %s7328_s27, %s7321_s18 }
  0xe5   : > { %p7325_p13 = pneg %p7324_p11  ;;  %p7331_p6 = por %p7330_p7, %p7329_p8 }
  0xe7   : > { %p7332_p0 = pnand %p7331_p6, %p7325_p13 }
  0xe9   : > { %7335 = shalt.err (!%p7332_p0)
}
  0xea   : > { %6625 = dma.hbm_to_vmem [thread:$0]  (!%p7690_p10), %s658_s26, 32, %s661_s16, %s7698_s10  }
  0xeb   : > { %s6254_s5 = sshll.u32 %s7430_s19, 14  ;;  %s671_s17 = scalar_lea.vmem [#allocation25], %s7679_s1 }
  0xec   : > { %s7808_s29 = scalar_lea.hbm %s8486_s14, %s6254_s5  ;;  %s679_s25 = sshll.u32 %s671_s17, 4  ;;  %s7811_s25 = int_to_ptr.vmem [resolvable:$true] %s679_s25 }
  0xed   : > { %s8548_s3 = sand.u32 1, %s7430_s19   ;;  %s7336_s18 = scalar_lea.hbm %s7808_s29, 16384 }
  0xee   : > { %s668_s6 = scalar_lea.sflag [#allocation26], %s8548_s3  ;;  %p7337_p1 = scmp.ne.s32.totalorder %s7808_s29, %s7336_s18 }
  0xef   : > { %s7341_s16 = scalar_lea.hbm %s8486_s14, 65536  ;;  %p7342_p4 = scmp.lt.s32.totalorder %s7808_s29, %s8486_s14 }
  0xf0   : > { %p7339_p5 = pnand %p7337_p1, %p7704_p12  ;;  %p7343_p2 = scmp.lt.s32.totalorder %s7341_s16, %s7336_s18 }
  0xf2   : > { %p7340_p3 = pneg %p7339_p5  ;;  %p7344_p9 = por %p7343_p2, %p7342_p4 }
  0xf4   : > { %p7345_p11 = pnand %p7344_p9, %p7340_p3 }
  0xf6   : > { %7348 = shalt.err (!%p7345_p11)
}
  0xf7   : > { %s7349_s19 = scalar_lea.vmem %s7811_s25, 16384  ;;  %s7452_s1 = smov [#allocation25]  }
  0xf8   : > { %p7350_p13 = scmp.ne.s32.totalorder %s7811_s25, %s7349_s19  ;;  %s7354_s27 = sshll.u32 %s7452_s1, 4  ;;  %s7355_s27 = int_to_ptr.vmem [resolvable:$false] %s7354_s27 }
  0xf9   : > { %s7356_s5 = scalar_lea.vmem %s7355_s27, 32768  ;;  %p7357_p6 = scmp.lt.s32.totalorder %s7811_s25, %s7355_s27 }
  0xfa   : > { %p7352_p8 = pnand %p7350_p13, %p7704_p12  ;;  %p7358_p0 = scmp.lt.s32.totalorder %s7356_s5, %s7349_s19 }
  0xfc   : > { %p7353_p7 = pneg %p7352_p8  ;;  %p7359_p1 = por %p7358_p0, %p7357_p6 }
  0xfe   : > { %p7360_p5 = pnand %p7359_p1, %p7353_p7 }
 0x100   : > { %7363 = shalt.err (!%p7360_p5)
}
 0x101   : > { %6628 = dma.hbm_to_vmem [thread:$0]  (!%p7690_p10), %s7808_s29, 16384, %s7811_s25, %s668_s6, %s8538_s4, %s8538_s4, %s8546_s8  }
 0x102   : > { %p8549_p12 = scmp.ne.s32.totalorder %s8522_s21, 0 }
 0x103   : > { %p8550_p3 = scmp.eq.s32.totalorder (!%p8549_p12), %s7578_s20, 0 }
 0x104   : > { %691 = sbr.rel (%p8549_p12) target bundleno = 4201 (0x1069), region = 92 }
 0x109   : > { %7381 = dma.done.wait (%p8550_p3), [#allocation6], 256   ;;  %p8551_p4 = pmov %p8550_p3 }
 0x10a   : > { %p8552_p2 = pmov %p8550_p3 }
 0x10b   : > { %7383 = vsyncadd (%p8551_p4), [#allocation6], 4294967040 }
 0x10c   : > { %7385 = dma.done.wait (%p8552_p2), [#allocation8], 64   ;;  %p8553_p9 = pmov %p8552_p2 }
 0x10d   : > { %p8554_p11 = pmov %p8552_p2 }
 0x10e   : > { %7387 = vsyncadd (%p8553_p9), [#allocation8], 4294967232 }
 0x10f   : > { %7389 = dma.done.wait (%p8554_p11), [#allocation11], 2576   ;;  %p8555_p10 = pmov %p8552_p2 }
 0x110   : > { %p8556_p13 = pmov %p8552_p2 }
 0x111   : > { %7391 = vsyncadd (%p8555_p10), [#allocation11], 4294964720 }
 0x112   : > { %7393 = dma.done.wait (%p8556_p13), [#allocation14], 608   ;;  %p8557_p8 = pmov %p8552_p2 }
 0x113   : > { %p8558_p7 = pmov %p8552_p2 }
 0x114   : > { %7395 = vsyncadd (%p8557_p8), [#allocation14], 4294966688 }
 0x115   : > { %7397 = dma.done.wait (%p8558_p7), [#allocation17], 4112   ;;  %p8559_p6 = pmov %p8552_p2 }
 0x116   : > { %p8560_p0 = pmov %p8552_p2 }
 0x117   : > { %7399 = vsyncadd (%p8559_p6), [#allocation17], 4294963184 }
 0x118   : > { %7401 = dma.done.wait (%p8560_p0), [#allocation20], 2176   ;;  %p8561_p1 = pmov %p8560_p0 }
 0x119   : > { %s737_s21 = sand.u32 1, %s7578_s20   ;;  %s739_s28 = sand.u32 1, %s7422_s30  }
 0x11a   : > { %7403 = vsyncadd (%p8561_p1), [#allocation20], 4294965120  ;;  %s5828_s24 = sshll.u32 %s739_s28, 10  ;;  %s738_s4 = scalar_lea.sflag [#allocation23], %s737_s21 }
 0x11b   : > { %s7866_s8 = scalar_lea.vmem [#allocation22], %s5828_s24  ;;  %p8562_p5 = scmp.ne.s32.totalorder %s8534_s23, 0 }
 0x11d   : > { %7405 = dma.done.wait (%p8562_p5), %s738_s4, 16416  }
 0x11e   : > { %7407 = vsyncadd (%p8562_p5), %s738_s4, 4294950880  ;;  %s7872_s7 = sshll.u32 %s739_s28, 1  ;;  %s756_s29 = scalar_lea.sflag [#allocation26], %s737_s21 }
 0x11f   : > { %s750_s22 = scalar_lea.vmem [#allocation24], %s7872_s7  ;;  %s7875_s17 = scalar_lea.vmem [#allocation25], %s5828_s24 }
 0x120   : > { %7409 = dma.done.wait (%p8562_p5), %s756_s29, 16384  }
 0x121   : > { %7411 = vsyncadd (%p8562_p5), %s756_s29, 4294950912  ;;  %p8563_p12 = pmov %p8560_p0 }
 0x122   : > { %p8564_p3 = pmov %p8560_p0 }
 0x123   : > { %7413 = dma.done.wait (%p8563_p12), [#allocation26], 128  }
 0x124   : > { %7415 = vsyncadd (%p8564_p3), [#allocation26], 4294967168  ;;  %p8565_p4 = scmp.ne.s32.totalorder %s7578_s20, 0 }
 0x125   : > { %s8566_s6 = sld [smem:[#allocation40_spill]] (!%p8565_p4) }
 0x126   : > { %828 = sbr.rel (%p8565_p4) target bundleno = 3332 (0xd04), region = 156 }
 0x12b   : > { %v833_v1 = vld [vmem:[#allocation10] sm:$0x1]  ;;  %vm848_vm0 = vcmask 1040384   ;;  %v831_v2 = vld [vmem:[%s8566_s6] sm:$0xff]  ;;  %vm841_vm1 = vcmask 7168   ;;  %vm933_vm2 = vcmask 130048  }
 0x12c   : > { %v832_v3 = vld [vmem:[%s8566_s6 + $0x8] sm:$0xff]  ;;  %6408 = vmatprep.subr.msk.mxu1 %vm848_vm0, %v833_v1  ;;  %6410 = vmatprep.mubr.msk.f32.mxu1 %vm841_vm1, %v831_v2  ;;  %v7893_v4 = vld [vmem:[#allocation5] sm:$0xff]  ;;  %vm1017_vm3 = vcmask 261120   ;;  %v7453_v19 = vmov 0   ;;  %v5841_v27 = vld [vmem:[#allocation13 + $0x1] ss:$0 sm:$0xff] }
 0x12d   : > { %6409 = vmatpush3.msk.msra.mxu1 %vm848_vm0, %v833_v1  ;;  %v7897_v7 = vld [vmem:[#allocation5 + $0x8] sm:$0xff]  ;;  %v835_v10 = vld [vmem:[#allocation12 + $0x8] sm:$0xff]  ;;  %v834_v11 = vld [vmem:[#allocation12] sm:$0xff]  ;;  %6710 = vset.pattern.permute.xlu0 %v7453_v19  ;;  %vm7455_vm4 = vmmov 0   ;;  %vm2496_vm5 = vcmask 523264  }
 0x12e   : > { %6411 = vmatmul.mubr.msk.f32.vlgmr.msra.gmra.mxu1 %vm841_vm1, %v832_v3  ;;  %v837_v8 = vld [vmem:[#allocation12 + $0x18] sm:$0xff]  ;;  %v836_v9 = vld [vmem:[#allocation12 + $0x10] sm:$0xff]  ;;  %v5836_v12 = vld [vmem:[#allocation13] ss:$0 sm:$0xff]  ;;  %1181 = vperm.xlu0 %6710, %v831_v2  }
 0x12f   : > { %6417 = vmatprep.mubr.msk.f32.mxu1 %vm933_vm2, %v7893_v4  ;;  %6420 = vmatprep.subr.mxu0 %v837_v8  ;;  %v1196_v22 = vld [vmem:[#allocation12 + $0x38] sm:$0xff]  ;;  %v1195_v23 = vld [vmem:[#allocation12 + $0x30] sm:$0xff]  ;;  %v1194_v24 = vld [vmem:[#allocation12 + $0x28] sm:$0xff] }
 0x130   : > { %6421 = vmatpush3.msra.mxu0 %v837_v8  ;;  %v1193_v25 = vld [vmem:[#allocation12 + $0x20] sm:$0xff]  ;;  %v1201_v39 = vld [vmem:[#allocation12 + $0x58] sm:$0xff]  ;;  %v1200_v40 = vld [vmem:[#allocation12 + $0x50] sm:$0xff] }
 0x131   : > { %6422 = vmatprep.subr.mxu0 %v836_v9  ;;  %v1199_v41 = vld [vmem:[#allocation12 + $0x48] sm:$0xff]  ;;  %v1198_v42 = vld [vmem:[#allocation12 + $0x40] sm:$0xff]  ;;  %v1540_v52 = vld [vmem:[#allocation12 + $0x78] sm:$0xff] }
 0x132   : > { %6423 = vmatpush3.msra.mxu0 %v836_v9  ;;  %1185 = vperm.xlu0 %6710, %v832_v3   ;;  %v5846_v43 = vld [vmem:[#allocation13 + $0x2] ss:$0 sm:$0xff]  ;;  %v1539_v53 = vld [vmem:[#allocation12 + $0x70] sm:$0xff]  ;;  %v1538_v54 = vld [vmem:[#allocation12 + $0x68] sm:$0xff] }
 0x133   : > { %6424 = vmatprep.subr.mxu0 %v835_v10  ;;  %v1537_v55 = vld [vmem:[#allocation12 + $0x60] sm:$0xff]  ;;  %v1545_v3 = vld [vmem:[#allocation12 + $0x98] sm:$0xff] }
 0x134   : > { %6425 = vmatpush3.msra.mxu0 %v835_v10  ;;  %v5851_v56 = vld [vmem:[#allocation13 + $0x3] ss:$0 sm:$0xff] }
 0x135   : > { %6426 = vmatprep.subr.mxu0 %v834_v11  ;;  %v1542_v8 = vld [vmem:[#allocation12 + $0x80] sm:$0xff] }
 0x136   : > { %6427 = vmatpush3.msra.mxu0 %v834_v11 }
 0x1a9   : > { %v1182_v26 = vpop.permute.xlu0 %1181 }
 0x1ad   : > { %v1186_v30 = vpop.permute.xlu0 %1185 }
 0x1ee   : > { %v6412_v5 = vpop.f32.mrf.mxu1 }
 0x1ef   : > { %6413 = vmatprep.subr.mxu1 %v6412_v5 }
 0x1f0   : > { %v918_v6 = vpop.f32.mrf.mxu1  ;;  %6414 = vmatpush3.msra.mxu1 %v6412_v5  ;;  %v1544_v5 = vld [vmem:[#allocation12 + $0x90] sm:$0xff] }
 0x1f1   : > { %6415 = vmatprep.subr.mxu1 %v918_v6 }
 0x1f2   : > { %6416 = vmatpush3.msra.mxu1 %v918_v6  ;;  %v1543_v6 = vld [vmem:[#allocation12 + $0x88] sm:$0xff] }
 0x1f3   : > { %6418 = vmatmul.mubr.msk.f32.vlgmr.msra.gmra.mxu1 %vm933_vm2, %v7897_v7 }
 0x1f4   : > { %6435 = vmatprep.mubr.msk.f32.mxu1 %vm933_vm2, %v7893_v4 }
 0x2b3   : > { %v6419_v13 = vpop.f32.mrf.mxu1 }
 0x2b4   : > { %v1012_v14 = vadd.f32 %v6419_v13, %v5836_v12 }
 0x2b5   : > { %v1006_v15 = vpop.f32.mrf.mxu1 }
 0x2b6   : > { %v1007_v16 = vadd.f32 %v5836_v12, %v1006_v15  ;;  %v1016_v18 = vmax.f32 %v1012_v14, 0.0 }
 0x2b8   : > { %v1015_v17 = vmax.f32 %v1007_v16, 0.0 }
 0x2ba   : > { %6428 = vmatprep.mubr.msk.f32.mxu0 %vm1017_vm3, %v1015_v17  ;;  %v7454_v17 = vmov 0.0  }
 0x2bb   : > { %6429 = vmatmul.mubr.msk.f32.vlgmr.msra.gmra.mxu0 %vm1017_vm3, %v1016_v18  ;;  %2789 = vst [vmem:[#allocation3] sm:$0xff] %v7454_v17  ;;  %2790 = vst [vmem:[#allocation3 + $0x8] sm:$0xff] %v7454_v17  ;;  %v1957_v18 = vld [vmem:[#allocation15 + $0x18] sm:$0xff] }
 0x2bc   : > { %6453 = vmatprep.mubr.msk.f32.mxu0 %vm933_vm2, %v7893_v4 }
 0x37b   : > { %v6430_v20 = vpop.f32.mrf.mxu0 }
 0x37c   : > { %6431 = vmatprep.subr.mxu1 %v6430_v20 }
 0x37d   : > { %v1090_v21 = vpop.f32.mrf.mxu0  ;;  %6432 = vmatpush3.msra.mxu1 %v6430_v20  ;;  %v1956_v20 = vld [vmem:[#allocation15 + $0x10] sm:$0xff] }
 0x37e   : > { %6433 = vmatprep.subr.mxu1 %v1090_v21 }
 0x37f   : > { %6434 = vmatpush3.msra.mxu1 %v1090_v21  ;;  %v1955_v21 = vld [vmem:[#allocation15 + $0x8] sm:$0xff] }
 0x380   : > { %6436 = vmatmul.mubr.msk.f32.vlgmr.msra.gmra.mxu1 %vm933_vm2, %v7897_v7  ;;  %6438 = vmatprep.subr.mxu1 %v1196_v22 }
 0x381   : > { %6439 = vmatpush3.msra.mxu1 %v1196_v22  ;;  %v5861_v22 = vld [vmem:[#allocation13 + $0x5] ss:$0 sm:$0xff] }
 0x382   : > { %6440 = vmatprep.subr.mxu1 %v1195_v23 }
 0x383   : > { %6441 = vmatpush3.msra.mxu1 %v1195_v23 }
 0x384   : > { %6442 = vmatprep.subr.mxu1 %v1194_v24 }
 0x385   : > { %6443 = vmatpush3.msra.mxu1 %v1194_v24 }
 0x386   : > { %6444 = vmatprep.subr.mxu1 %v1193_v25 }
 0x387   : > { %6445 = vmatpush3.msra.mxu1 %v1193_v25 }
 0x440   : > { %v6437_v28 = vpop.f32.mrf.mxu1 }
 0x441   : > { %v1177_v29 = vadd.f32 %v6437_v28, %v5841_v27 }
 0x442   : > { %v1171_v31 = vpop.f32.mrf.mxu1 }
 0x443   : > { %v1172_v32 = vadd.f32 %v5841_v27, %v1171_v31  ;;  %v1189_v33 = vadd.f32 %v1186_v30, %v1177_v29  ;;  %v1880_v30 = vld [vmem:[#allocation7] sm:$0x3]  ;;  %v1954_v31 = vld [vmem:[#allocation15] sm:$0xff] }
 0x445   : > { %v1188_v34 = vadd.f32 %v1182_v26, %v1172_v32  ;;  %v1191_v36 = vmax.f32 %v1189_v33, 0.0  ;;  %v2081_v32 = vld [vmem:[#allocation19 + $0x40] sm:$0xff] }
 0x446   : > { %v2085_v33 = vld [vmem:[#allocation19 + $0x60] sm:$0xff] }
 0x447   : > { %v1190_v35 = vmax.f32 %v1188_v34, 0.0  ;;  %v2082_v34 = vld [vmem:[#allocation19 + $0x48] sm:$0xff] }
 0x449   : > { %6446 = vmatprep.mubr.msk.f32.mxu1 %vm1017_vm3, %v1190_v35 }
 0x44a   : > { %6447 = vmatmul.mubr.msk.f32.vlgmr.msra.gmra.mxu1 %vm1017_vm3, %v1191_v36 }
 0x44b   : > { %6471 = vmatprep.mubr.msk.f32.mxu1 %vm933_vm2, %v7893_v4 }
 0x50a   : > { %v6448_v37 = vpop.f32.mrf.mxu1 }
 0x50b   : > { %6449 = vmatprep.subr.mxu0 %v6448_v37 }
 0x50c   : > { %v1278_v38 = vpop.f32.mrf.mxu1  ;;  %6450 = vmatpush3.msra.mxu0 %v6448_v37  ;;  %v2086_v37 = vld [vmem:[#allocation19 + $0x68] sm:$0xff] }
 0x50d   : > { %6451 = vmatprep.subr.mxu0 %v1278_v38 }
 0x50e   : > { %6452 = vmatpush3.msra.mxu0 %v1278_v38  ;;  %v5877_v38 = vcombine.low %v2082_v34, %v2086_v37 }
 0x50f   : > { %6454 = vmatmul.mubr.msk.f32.vlgmr.msra.gmra.mxu0 %vm933_vm2, %v7897_v7  ;;  %6456 = vmatprep.subr.mxu0 %v1201_v39 }
 0x510   : > { %6457 = vmatpush3.msra.mxu0 %v1201_v39  ;;  %v5878_v39 = vcombine.high %v2082_v34, %v2086_v37 }
 0x511   : > { %6458 = vmatprep.subr.mxu0 %v1200_v40 }
 0x512   : > { %6459 = vmatpush3.msra.mxu0 %v1200_v40 }
 0x513   : > { %6460 = vmatprep.subr.mxu0 %v1199_v41 }
 0x514   : > { %6461 = vmatpush3.msra.mxu0 %v1199_v41 }
 0x515   : > { %6462 = vmatprep.subr.mxu0 %v1198_v42 }
 0x516   : > { %6463 = vmatpush3.msra.mxu0 %v1198_v42  ;;  %v2073_v42 = vld [vmem:[#allocation19] sm:$0xff] }
 0x5cf   : > { %v6455_v44 = vpop.f32.mrf.mxu0 }
 0x5d0   : > { %v1365_v45 = vadd.f32 %v6455_v44, %v5846_v43  ;;  %v2074_v44 = vld [vmem:[#allocation19 + $0x8] sm:$0xff] }
 0x5d1   : > { %v1359_v46 = vpop.f32.mrf.mxu0 }
 0x5d2   : > { %v1360_v47 = vadd.f32 %v5846_v43, %v1359_v46  ;;  %v1369_v49 = vmax.f32 %v1365_v45, 0.0  ;;  %v2077_v43 = vld [vmem:[#allocation19 + $0x20] sm:$0xff]  ;;  %v2078_v46 = vld [vmem:[#allocation19 + $0x28] sm:$0xff] }
 0x5d3   : > { %v5868_v45 = vcombine.high %v2073_v42, %v2077_v43 }
 0x5d4   : > { %v1368_v48 = vmax.f32 %v1360_v47, 0.0  ;;  %v5867_v47 = vcombine.low %v2073_v42, %v2077_v43 }
 0x5d6   : > { %6464 = vmatprep.mubr.msk.f32.mxu0 %vm1017_vm3, %v1368_v48  ;;  %v5869_v48 = vcombine.low %v2074_v44, %v2078_v46 }
 0x5d7   : > { %6465 = vmatmul.mubr.msk.f32.vlgmr.msra.gmra.mxu0 %vm1017_vm3, %v1369_v49  ;;  %v5870_v49 = vcombine.high %v2074_v44, %v2078_v46  ;;  %v2038_v44 = vld [vmem:[#allocation9] sm:$0x3] }
 0x5d8   : > { %6489 = vmatprep.mubr.msk.f32.mxu0 %vm933_vm2, %v7893_v4 }
 0x697   : > { %v6466_v50 = vpop.f32.mrf.mxu0 }
 0x698   : > { %6467 = vmatprep.subr.mxu1 %v6466_v50 }
 0x699   : > { %v1442_v51 = vpop.f32.mrf.mxu0  ;;  %6468 = vmatpush3.msra.mxu1 %v6466_v50  ;;  %v2083_v50 = vld [vmem:[#allocation19 + $0x50] sm:$0xff] }
 0x69a   : > { %6469 = vmatprep.subr.mxu1 %v1442_v51 }
 0x69b   : > { %6470 = vmatpush3.msra.mxu1 %v1442_v51  ;;  %v2087_v51 = vld [vmem:[#allocation19 + $0x70] sm:$0xff] }
 0x69c   : > { %6472 = vmatmul.mubr.msk.f32.vlgmr.msra.gmra.mxu1 %vm933_vm2, %v7897_v7  ;;  %6474 = vmatprep.subr.mxu1 %v1540_v52 }
 0x69d   : > { %6475 = vmatpush3.msra.mxu1 %v1540_v52  ;;  %v2084_v52 = vld [vmem:[#allocation19 + $0x58] sm:$0xff] }
 0x69e   : > { %6476 = vmatprep.subr.mxu1 %v1539_v53 }
 0x69f   : > { %6477 = vmatpush3.msra.mxu1 %v1539_v53  ;;  %v5880_v53 = vcombine.high %v2083_v50, %v2087_v51 }
 0x6a0   : > { %6478 = vmatprep.subr.mxu1 %v1538_v54 }
 0x6a1   : > { %6479 = vmatpush3.msra.mxu1 %v1538_v54  ;;  %v2088_v54 = vld [vmem:[#allocation19 + $0x78] sm:$0xff] }
 0x6a2   : > { %6480 = vmatprep.subr.mxu1 %v1537_v55 }
 0x6a3   : > { %6481 = vmatpush3.msra.mxu1 %v1537_v55  ;;  %v5879_v55 = vcombine.low %v2083_v50, %v2087_v51  ;;  %v2063_v50 = vld [vmem:[#allocation18 + $0xb8] sm:$0xff]  ;;  %v2039_v51 = vpack.c.bf16 %v2038_v44, %v2038_v44 }
 0x75c   : > { %v6473_v57 = vpop.f32.mrf.mxu1 }
 0x75d   : > { %v1529_v58 = vadd.f32 %v6473_v57, %v5851_v56  ;;  %v5882_v57 = vcombine.high %v2084_v52, %v2088_v54 }
 0x75e   : > { %v1523_v59 = vpop.f32.mrf.mxu1 }
 0x75f   : > { %v1524_v60 = vadd.f32 %v5851_v56, %v1523_v59  ;;  %v7922_v61 = vadd.f32 %v1529_v58, %v1191_v36  ;;  %v5876_v36 = vcombine.high %v2081_v32, %v2085_v33  ;;  %v5881_v56 = vcombine.low %v2084_v52, %v2088_v54  ;;  %v5865_v58 = vld [vmem:[#allocation16] ss:$0 sm:$0xff]  ;;  %v2075_v59 = vld [vmem:[#allocation19 + $0x10] sm:$0xff] }
 0x761   : > { %v7924_v62 = vadd.f32 %v1524_v60, %v1190_v35  ;;  %v1535_v0 = vmax.f32 %v7922_v61, 0.0  ;;  %v5875_v35 = vcombine.low %v2081_v32, %v2085_v33  ;;  %v2079_v61 = vld [vmem:[#allocation19 + $0x30] sm:$0xff]  ;;  %v2041_v32 = vld [vmem:[#allocation18 + $0x8] sm:$0xff] }
 0x762   : > { %v2045_v33 = vld [vmem:[#allocation18 + $0x28] sm:$0xff] }
 0x763   : > { %v1534_v63 = vmax.f32 %v7924_v62, 0.0  ;;  %v2076_v62 = vld [vmem:[#allocation19 + $0x18] sm:$0xff]  ;;  %v5890_v37 = vcombine.high %v2041_v32, %v2045_v33  ;;  %v5889_v43 = vcombine.low %v2041_v32, %v2045_v33 }
 0x765   : > { %6482 = vmatprep.mubr.msk.f32.mxu1 %vm1017_vm3, %v1534_v63 }
 0x766   : > { %6483 = vmatmul.mubr.msk.f32.vlgmr.msra.gmra.mxu1 %vm1017_vm3, %v1535_v0 }
 0x767   : > { %6507 = vmatprep.mubr.msk.f32.mxu1 %vm933_vm2, %v7893_v4  ;;  %v5856_v4 = vld [vmem:[#allocation13 + $0x4] ss:$0 sm:$0xff] }
 0x826   : > { %v6484_v1 = vpop.f32.mrf.mxu1 }
 0x827   : > { %6485 = vmatprep.subr.mxu0 %v6484_v1 }
 0x828   : > { %v1622_v2 = vpop.f32.mrf.mxu1  ;;  %6486 = vmatpush3.msra.mxu0 %v6484_v1 }
 0x829   : > { %6487 = vmatprep.subr.mxu0 %v1622_v2 }
 0x82a   : > { %6488 = vmatpush3.msra.mxu0 %v1622_v2 }
 0x82b   : > { %6490 = vmatmul.mubr.msk.f32.vlgmr.msra.gmra.mxu0 %vm933_vm2, %v7897_v7  ;;  %6492 = vmatprep.subr.mxu0 %v1545_v3 }
 0x82c   : > { %6493 = vmatpush3.msra.mxu0 %v1545_v3  ;;  %v5872_v3 = vcombine.high %v2075_v59, %v2079_v61 }
 0x82d   : > { %6494 = vmatprep.subr.mxu0 %v1544_v5 }
 0x82e   : > { %6495 = vmatpush3.msra.mxu0 %v1544_v5 }
 0x82f   : > { %6496 = vmatprep.subr.mxu0 %v1543_v6 }
 0x830   : > { %6497 = vmatpush3.msra.mxu0 %v1543_v6  ;;  %v2064_v6 = vld [vmem:[#allocation18 + $0xc0] sm:$0xff] }
 0x831   : > { %6498 = vmatprep.subr.mxu0 %v1542_v8 }
 0x832   : > { %6499 = vmatpush3.msra.mxu0 %v1542_v8  ;;  %v2068_v8 = vld [vmem:[#allocation18 + $0xe0] sm:$0xff] }
 0x833   : > { %6517 = vmatprep.subr.mxu0 %v7454_v17 }
 0x8eb   : > { %v6491_v9 = vpop.f32.mrf.mxu0 }
 0x8ec   : > { %v1709_v10 = vadd.f32 %v6491_v9, %v5856_v4  ;;  %v2069_v9 = vld [vmem:[#allocation18 + $0xe8] sm:$0xff] }
 0x8ed   : > { %v1703_v11 = vpop.f32.mrf.mxu0 }
 0x8ee   : > { %v1704_v12 = vadd.f32 %v5856_v4, %v1703_v11  ;;  %v1713_v14 = vmax.f32 %v1709_v10, 0.0  ;;  %v2065_v4 = vld [vmem:[#allocation18 + $0xc8] sm:$0xff]  ;;  %v5871_v10 = vcombine.low %v2075_v59, %v2079_v61  ;;  %v2055_v59 = vld [vmem:[#allocation18 + $0x78] sm:$0xff] }
 0x8f0   : > { %v1712_v13 = vmax.f32 %v1704_v12, 0.0  ;;  %v5912_v12 = vcombine.high %v2064_v6, %v2068_v8 }
 0x8f2   : > { %6500 = vmatprep.mubr.msk.f32.mxu0 %vm1017_vm3, %v1712_v13  ;;  %v5914_v13 = vcombine.high %v2065_v4, %v2069_v9 }
 0x8f3   : > { %6501 = vmatmul.mubr.msk.f32.vlgmr.msra.gmra.mxu0 %vm1017_vm3, %v1713_v14  ;;  %v2056_v14 = vld [vmem:[#allocation18 + $0x80] sm:$0xff] }
 0x8f4   : > { %6525 = vmatprep.mubr.msk.f32.mxu0 %vm7455_vm4, %v7454_v17  ;;  %6518 = vmatpush3.msra.mxu0 %v1957_v18  ;;  %v5911_v18 = vcombine.low %v2064_v6, %v2068_v8 }
 0x8f5   : > { %6519 = vmatprep.subr.mxu0 %v7454_v17 }
 0x8f6   : > { %6520 = vmatpush3.msra.mxu0 %v1956_v20  ;;  %v5913_v20 = vcombine.low %v2065_v4, %v2069_v9 }
 0x8f7   : > { %6521 = vmatprep.subr.mxu0 %v7454_v17 }
 0x8f8   : > { %6522 = vmatpush3.msra.mxu0 %v1955_v21 }
 0x8f9   : > { %6523 = vmatprep.subr.mxu0 %v7454_v17 }
 0x8fa   : > { %6524 = vmatpush3.msra.mxu0 %v1954_v31  ;;  %v2044_v31 = vld [vmem:[#allocation18 + $0x20] sm:$0xff] }
 0x8fb   : > { %2225 = vmatprep.subr.bf16.mxu0 %v5878_v39  ;;  %v2070_v39 = vld [vmem:[#allocation18 + $0xf0] sm:$0xff] }
 0x9b3   : > { %v6502_v15 = vpop.f32.mrf.mxu0 }
 0x9b4   : > { %6503 = vmatprep.subr.mxu1 %v6502_v15 }
 0x9b5   : > { %v1786_v16 = vpop.f32.mrf.mxu0  ;;  %6504 = vmatpush3.msra.mxu1 %v6502_v15  ;;  %v2060_v15 = vld [vmem:[#allocation18 + $0xa0] sm:$0xff] }
 0x9b6   : > { %6505 = vmatprep.subr.mxu1 %v1786_v16  ;;  %v5904_v21 = vcombine.high %v2056_v14, %v2060_v15 }
 0x9b7   : > { %6506 = vmatpush3.msra.mxu1 %v1786_v16  ;;  %v2057_v16 = vld [vmem:[#allocation18 + $0x88] sm:$0xff] }
 0x9b8   : > { %6508 = vmatmul.mubr.msk.f32.vlgmr.msra.gmra.mxu1 %vm933_vm2, %v7897_v7  ;;  %6510 = vmatprep.subr.mxu1 %v7454_v17 }
 0x9b9   : > { %6514 = vmatprep.mubr.msk.f32.mxu1 %vm7455_vm4, %v7454_v17 }
 0xa78   : > { %v6509_v23 = vpop.f32.mrf.mxu1 }
 0xa79   : > { %v1873_v7 = vadd.f32 %v6509_v23, %v5861_v22  ;;  %v2048_v23 = vld [vmem:[#allocation18 + $0x40] sm:$0xff] }
 0xa7a   : > { %v1867_v24 = vpop.f32.mrf.mxu1 }
 0xa7b   : > { %v1877_v25 = vadd.f32 %v1873_v7, %v1535_v0  ;;  %v1868_v26 = vadd.f32 %v5861_v22, %v1867_v24  ;;  %v2052_v7 = vld [vmem:[#allocation18 + $0x60] sm:$0xff]  ;;  %v2049_v24 = vld [vmem:[#allocation18 + $0x48] sm:$0xff] }
 0xa7c   : > { %v5895_v34 = vcombine.low %v2048_v23, %v2052_v7 }
 0xa7d   : > { %v1879_v27 = vmax.f32 %v1877_v25, 0.0  ;;  %v1876_v28 = vadd.f32 %v1868_v26, %v1534_v63  ;;  %v2080_v63 = vld [vmem:[#allocation19 + $0x38] sm:$0xff]  ;;  %v2053_v25 = vld [vmem:[#allocation18 + $0x68] sm:$0xff]  ;;  %v5903_v26 = vcombine.low %v2056_v14, %v2060_v15 }
 0xa7e   : > { %v5874_v5 = vcombine.high %v2076_v62, %v2080_v63  ;;  %v5873_v11 = vcombine.low %v2076_v62, %v2080_v63 }
 0xa7f   : > { %v1878_v29 = vmax.f32 %v1876_v28, 0.0  ;;  %6511 = vmatpush3.msra.mxu1 %v1879_v27  ;;  %v5896_v28 = vcombine.high %v2048_v23, %v2052_v7 }
 0xa80   : > { %6512 = vmatprep.subr.mxu1 %v7454_v17  ;;  %v2061_v17 = vld [vmem:[#allocation18 + $0xa8] sm:$0xff] }
 0xa81   : > { %6513 = vmatpush3.msra.mxu1 %v1878_v29  ;;  %v5906_v22 = vcombine.high %v2057_v16, %v2061_v17  ;;  %v5905_v27 = vcombine.low %v2057_v16, %v2061_v17  ;;  %v5898_v29 = vcombine.high %v2049_v24, %v2053_v25 }
 0xa82   : > { %6515 = vmatmul.mubr.msk.f32.vlgmr.msra.gmra.mxu1 %vm933_vm2, %v1880_v30  ;;  %2184 = vmatprep.subr.bf16.mxu1 %v5876_v36  ;;  %v2040_v30 = vld [vmem:[#allocation18] sm:$0xff] }
 0xa83   : > { %2204 = vmatprep.mubr.bf16.mxu1 %v7453_v19  ;;  %2185 = vmatpush1.bf16.msra.mxu1 %v5875_v35  ;;  %v5897_v35 = vcombine.low %v2049_v24, %v2053_v25  ;;  %v5888_v36 = vcombine.high %v2040_v30, %v2044_v31  ;;  %v5887_v42 = vcombine.low %v2040_v30, %v2044_v31 }
 0xa84   : > { %2186 = vmatprep.subr.bf16.mxu1 %v5868_v45 }
 0xa87   : > { %2187 = vmatpush1.bf16.msra.mxu1 %v5867_v47  ;;  %v2058_v47 = vld [vmem:[#allocation18 + $0x90] sm:$0xff] }
 0xa88   : > { %2266 = vmatprep.subr.bf16.mxu1 %v5880_v53 }
 0xb42   : > { %v1950_v40 = vpop.f32.mrf.mxu1 }
 0xb43   : > { %6526 = vmatmul.mubr.msk.f32.vlgmr.msra.gmra.mxu0 %vm1017_vm3, %v1950_v40  ;;  %v2067_v40 = vld [vmem:[#allocation18 + $0xd8] sm:$0xff] }
 0xb44   : > { %v6516_v41 = vpop.f32.mrf.mxu1  ;;  %2226 = vmatpush1.bf16.msra.mxu0 %v5877_v38  ;;  %2245 = vmatprep.mubr.bf16.mxu0 %v7453_v19  ;;  %v2066_v38 = vld [vmem:[#allocation18 + $0xd0] sm:$0xff] }
 0xb45   : > { %2227 = vmatprep.subr.bf16.mxu0 %v5870_v49  ;;  %v2071_v41 = vld [vmem:[#allocation18 + $0xf8] sm:$0xff]  ;;  %v5916_v45 = vcombine.high %v2066_v38, %v2070_v39  ;;  %v5915_v52 = vcombine.low %v2066_v38, %v2070_v39  ;;  %v2664_v38 = vld [vmem:[#allocation21] sm:$0xff] }
 0xb46   : > { %v5918_v46 = vcombine.high %v2067_v40, %v2071_v41  ;;  %v2059_v49 = vld [vmem:[#allocation18 + $0x98] sm:$0xff]  ;;  %v5917_v53 = vcombine.low %v2067_v40, %v2071_v41 }
 0xb47   : > { %v5909_v61 = vcombine.low %v2059_v49, %v2063_v50 }
 0xb48   : > { %2228 = vmatpush1.bf16.msra.mxu0 %v5869_v48  ;;  %v2062_v48 = vld [vmem:[#allocation18 + $0xb0] sm:$0xff] }
 0xb49   : > { %2307 = vmatprep.subr.bf16.mxu0 %v5882_v57  ;;  %v5908_v54 = vcombine.high %v2058_v47, %v2062_v48  ;;  %v2054_v57 = vld [vmem:[#allocation18 + $0x70] sm:$0xff] }
 0xc03   : > { %v2034_v60 = vpop.f32.mrf.mxu0 }
 0xc04   : > { %v2035_v0 = vadd.f32 %v5865_v58, %v2034_v60  ;;  %v2051_v58 = vld [vmem:[#allocation18 + $0x58] sm:$0xff]  ;;  %v5907_v60 = vcombine.low %v2058_v47, %v2062_v48 }
 0xc05   : > { %v6527_v1 = vpop.f32.mrf.mxu0  ;;  %v5902_v63 = vcombine.high %v2051_v58, %v2055_v59  ;;  %v5901_v6 = vcombine.low %v2051_v58, %v2055_v59 }
 0xc06   : > { %v2072_v2 = vpack.c.bf16 %v2035_v0, %v2035_v0  ;;  %v2042_v0 = vld [vmem:[#allocation18 + $0x10] sm:$0xff] }
 0xc07   : > { %v2046_v1 = vld [vmem:[#allocation18 + $0x30] sm:$0xff] }
 0xc08   : > { %5883 = vmatmul.mubr.msk.bf16.vlgmr.msra.gmra.mxu1 %vm1017_vm3, %v2072_v2  ;;  %5884 = vmatmul.mubr.msk.bf16.vlgmr.msra.gmra.mxu0 %vm1017_vm3, %v2072_v2  ;;  %v5892_v8 = vcombine.high %v2042_v0, %v2046_v1  ;;  %v5891_v9 = vcombine.low %v2042_v0, %v2046_v1 }
 0xc09   : > { %2267 = vmatpush1.bf16.msra.mxu1 %v5879_v55  ;;  %2308 = vmatpush1.bf16.msra.mxu0 %v5881_v56  ;;  %v5910_v55 = vcombine.high %v2059_v49, %v2063_v50  ;;  %v2050_v56 = vld [vmem:[#allocation18 + $0x50] sm:$0xff]  ;;  %v7456_v50 = vmov 1966171168  }
 0xc0a   : > { %2268 = vmatprep.subr.bf16.mxu1 %v5872_v3  ;;  %2309 = vmatprep.subr.bf16.mxu0 %v5874_v5  ;;  %v5900_v62 = vcombine.high %v2050_v56, %v2054_v57  ;;  %v2047_v3 = vld [vmem:[#allocation18 + $0x38] sm:$0xff]  ;;  %v5899_v5 = vcombine.low %v2050_v56, %v2054_v57 }
 0xc0b   : > { %2286 = vmatprep.mubr.bf16.mxu1 %v7453_v19  ;;  %2327 = vmatprep.mubr.bf16.mxu0 %v7453_v19 }
 0xc0d   : > { %2269 = vmatpush1.bf16.msra.mxu1 %v5871_v10  ;;  %2310 = vmatpush1.bf16.msra.mxu0 %v5873_v11 }
 0xc0e   : > { %2508 = vmatprep.subr.bf16.mxu1 %v5912_v12  ;;  %2549 = vmatprep.subr.bf16.mxu0 %v5914_v13 }
 0xc10   : > { %5885 = vmatmul.mubr.msk.bf16.vlgmr.msra.gmra.mxu1 %vm1017_vm3, %v2072_v2  ;;  %5886 = vmatmul.mubr.msk.bf16.vlgmr.msra.gmra.mxu0 %vm1017_vm3, %v2072_v2  ;;  %v2043_v2 = vld [vmem:[#allocation18 + $0x18] sm:$0xff] }
 0xc11   : > { %2509 = vmatpush1.bf16.msra.mxu1 %v5911_v18  ;;  %2550 = vmatpush1.bf16.msra.mxu0 %v5913_v20  ;;  %v5894_v4 = vcombine.high %v2043_v2, %v2047_v3  ;;  %v5893_v10 = vcombine.low %v2043_v2, %v2047_v3 }
 0xc12   : > { %2510 = vmatprep.subr.bf16.mxu1 %v5904_v21  ;;  %2551 = vmatprep.subr.bf16.mxu0 %v5906_v22 }
 0xc13   : > { %2532 = vmatprep.mubr.bf16.mxu1 %v7453_v19  ;;  %2573 = vmatprep.mubr.bf16.mxu0 %v7453_v19 }
 0xc15   : > { %2511 = vmatpush1.bf16.msra.mxu1 %v5903_v26  ;;  %2552 = vmatpush1.bf16.msra.mxu0 %v5905_v27  ;;  %v2666_v26 = vlaneseq }
 0xc16   : > { %2512 = vmatprep.subr.bf16.mxu1 %v5896_v28  ;;  %2553 = vmatprep.subr.bf16.mxu0 %v5898_v29 }
 0xc17   : > { %v2667_v28 = vshrl.u32 %v2666_v26, 7 }
 0xc19   : > { %2513 = vmatpush1.bf16.msra.mxu1 %v5895_v34  ;;  %2554 = vmatpush1.bf16.msra.mxu0 %v5897_v35  ;;  %v2672_v31 = vsub.s32 1, %v2667_v28  ;;  %v2680_v33 = vsub.s32 3, %v2667_v28  ;;  %v2668_v34 = vsub.s32 0, %v2667_v28  ;;  %v2676_v35 = vsub.s32 2, %v2667_v28 }
 0xc1a   : > { %2514 = vmatprep.subr.bf16.mxu1 %v5888_v36  ;;  %2555 = vmatprep.subr.bf16.mxu0 %v5890_v37  ;;  %v2688_v57 = vsub.s32 5, %v2667_v28  ;;  %v2696_v58 = vsub.s32 7, %v2667_v28 }
 0xc1b   : > { %v2673_v40 = vrot.slane %v2664_v38, %v2672_v31  ;;  %v2677_v48 = vrot.slane %v2664_v38, %v2676_v35 }
 0xc1d   : > { %2515 = vmatpush1.bf16.msra.mxu1 %v5887_v42  ;;  %2556 = vmatpush1.bf16.msra.mxu0 %v5889_v43  ;;  %v2681_v42 = vrot.slane %v2664_v38, %v2680_v33 }
 0xc1e   : > { %2590 = vmatprep.subr.bf16.mxu1 %v5916_v45  ;;  %2631 = vmatprep.subr.bf16.mxu0 %v5918_v46  ;;  %v2669_v46 = vrot.slane %v2664_v38, %v2668_v34 }
 0xc20   : > { %5919 = vmatmul.mubr.msk.bf16.vlgmr.msra.gmra.mxu1 %vm2496_vm5, %v2039_v51  ;;  %5920 = vmatmul.mubr.msk.bf16.vlgmr.msra.gmra.mxu0 %vm2496_vm5, %v2039_v51 }
 0xc21   : > { %2591 = vmatpush1.bf16.msra.mxu1 %v5915_v52  ;;  %2632 = vmatpush1.bf16.msra.mxu0 %v5917_v53  ;;  %v2684_v53 = vsub.s32 4, %v2667_v28 }
 0xc22   : > { %2592 = vmatprep.subr.bf16.mxu1 %v5908_v54  ;;  %2633 = vmatprep.subr.bf16.mxu0 %v5910_v55  ;;  %v2692_v54 = vsub.s32 6, %v2667_v28 }
 0xc23   : > { %2614 = vmatprep.mubr.bf16.mxu1 %v7453_v19  ;;  %2655 = vmatprep.mubr.bf16.mxu0 %v7453_v19 }
 0xc25   : > { %2593 = vmatpush1.bf16.msra.mxu1 %v5907_v60  ;;  %2634 = vmatpush1.bf16.msra.mxu0 %v5909_v61 }
 0xc26   : > { %2594 = vmatprep.subr.bf16.mxu1 %v5900_v62  ;;  %2635 = vmatprep.subr.bf16.mxu0 %v5902_v63  ;;  %v2685_v62 = vrot.slane %v2664_v38, %v2684_v53  ;;  %v2693_v63 = vrot.slane %v2664_v38, %v2692_v54 }
 0xc29   : > { %2595 = vmatpush1.bf16.msra.mxu1 %v5899_v5  ;;  %2636 = vmatpush1.bf16.msra.mxu0 %v5901_v6 }
 0xc2a   : > { %2596 = vmatprep.subr.bf16.mxu1 %v5892_v8  ;;  %2637 = vmatprep.subr.bf16.mxu0 %v5894_v4  ;;  %v2689_v8 = vrot.slane %v2664_v38, %v2688_v57  ;;  %v2697_v4 = vrot.slane %v2664_v38, %v2696_v58 }
 0xc2d   : > { %2597 = vmatpush1.bf16.msra.mxu1 %v5891_v9  ;;  %2638 = vmatpush1.bf16.msra.mxu0 %v5893_v10 }
 0xc30   : > { %5921 = vmatmul.mubr.msk.bf16.vlgmr.msra.gmra.mxu1 %vm2496_vm5, %v2039_v51  ;;  %5922 = vmatmul.mubr.msk.bf16.vlgmr.msra.gmra.mxu0 %vm2496_vm5, %v2039_v51  ;;  %v2743_v51 = vunpack.c.l.s4 %v7456_v50 }
 0xc32   : > { %v2744_v60 = vunpack.c.0.s8 %v2743_v51 }
 0xc34   : > { %v2747_v10 = vsub.s32 %v2744_v60, %v2667_v28 }
 0xcc8   : > { %v2206_v19 = vpop.f32.mrf.mxu1  ;;  %v2247_v11 = vpop.f32.mrf.mxu0 }
 0xcca   : > { %v2208_v12 = vpop.f32.mrf.mxu1  ;;  %v2249_v13 = vpop.f32.mrf.mxu0 }
 0xccc   : > { %v2210_v14 = vpop.f32.mrf.mxu1  ;;  %v2251_v15 = vpop.f32.mrf.mxu0 }
 0xcce   : > { %v2211_v16 = vpop.f32.mrf.mxu1  ;;  %v2252_v17 = vpop.f32.mrf.mxu0 }
 0xcd0   : > { %v2288_v18 = vpop.f32.mrf.mxu1  ;;  %v2329_v20 = vpop.f32.mrf.mxu0 }
 0xcd2   : > { %v2290_v21 = vpop.f32.mrf.mxu1  ;;  %v2331_v22 = vpop.f32.mrf.mxu0 }
 0xcd4   : > { %v2292_v23 = vpop.f32.mrf.mxu1  ;;  %v2333_v7 = vpop.f32.mrf.mxu0 }
 0xcd6   : > { %v2293_v24 = vpop.f32.mrf.mxu1  ;;  %v2334_v25 = vpop.f32.mrf.mxu0 }
 0xce0   : > { %v2534_v27 = vpop.f32.mrf.mxu1  ;;  %v2575_v29 = vpop.f32.mrf.mxu0 }
 0xce1   : > { %v2535_v45 = vadd.f32 %v2534_v27, %v2206_v19  ;;  %v2576_v47 = vadd.f32 %v2575_v29, %v2247_v11 }
 0xce2   : > { %v2536_v30 = vpop.f32.mrf.mxu1  ;;  %v2577_v32 = vpop.f32.mrf.mxu0 }
 0xce3   : > { %v2537_v39 = vadd.f32 %v2536_v30, %v2208_v12  ;;  %v2578_v41 = vadd.f32 %v2577_v32, %v2249_v13  ;;  %v2706_v55 = vadd.f32 %v2669_v46, %v2535_v45  ;;  %v2708_v56 = vadd.f32 %v2677_v48, %v2576_v47 }
 0xce4   : > { %v2538_v36 = vpop.f32.mrf.mxu1  ;;  %v2579_v37 = vpop.f32.mrf.mxu0 }
 0xce5   : > { %v2707_v49 = vadd.f32 %v2673_v40, %v2537_v39  ;;  %v2709_v52 = vadd.f32 %v2681_v42, %v2578_v41  ;;  %v2714_v0 = vmax.f32 %v2706_v55, 0.0  ;;  %v2716_v1 = vmax.f32 %v2708_v56, 0.0 }
 0xce6   : > { %v2539_v43 = vpop.f32.mrf.mxu1  ;;  %v2580_v44 = vpop.f32.mrf.mxu0 }
 0xce7   : > { %v2715_v59 = vmax.f32 %v2707_v49, 0.0  ;;  %v2717_v61 = vmax.f32 %v2709_v52, 0.0 }
 0xce9   : > { %v5923_v9 = vpack.c.bf16 %v2715_v59, %v2714_v0  ;;  %v5924_v19 = vpack.c.bf16 %v2717_v61, %v2716_v1 }
 0xceb   : > { %v2748_v25 = vrot.slane %v5923_v9, %v2747_v10  ;;  %v2755_v26 = vrot.slane %v5924_v19, %v2747_v10 }
 0xced   : > { %v2770_v33 = vcombine.low %v2748_v25, %v2755_v26 }
 0xcf0   : > { %v2616_v2 = vpop.f32.mrf.mxu1  ;;  %v2657_v3 = vpop.f32.mrf.mxu0 }
 0xcf1   : > { %v2617_v5 = vadd.f32 %v2616_v2, %v2288_v18  ;;  %v2658_v6 = vadd.f32 %v2657_v3, %v2329_v20 }
 0xcf2   : > { %v2618_v11 = vpop.f32.mrf.mxu1  ;;  %v2659_v12 = vpop.f32.mrf.mxu0 }
 0xcf3   : > { %v2710_v13 = vadd.f32 %v2685_v62, %v2617_v5  ;;  %v2712_v14 = vadd.f32 %v2693_v63, %v2658_v6  ;;  %v2619_v15 = vadd.f32 %v2618_v11, %v2290_v21  ;;  %v2660_v16 = vadd.f32 %v2659_v12, %v2331_v22 }
 0xcf4   : > { %v2620_v17 = vpop.f32.mrf.mxu1  ;;  %v2661_v23 = vpop.f32.mrf.mxu0  ;;  %v2778_v21 = vrot.slane %v2770_v33, %v2747_v10 }
 0xcf5   : > { %v2711_v7 = vadd.f32 %v2689_v8, %v2619_v15  ;;  %v2713_v24 = vadd.f32 %v2697_v4, %v2660_v16  ;;  %v2718_v20 = vmax.f32 %v2710_v13, 0.0  ;;  %v2720_v29 = vmax.f32 %v2712_v14, 0.0 }
 0xcf6   : > { %v2621_v27 = vpop.f32.mrf.mxu1  ;;  %v2662_v18 = vpop.f32.mrf.mxu0 }
 0xcf7   : > { %v2719_v30 = vmax.f32 %v2711_v7, 0.0  ;;  %v2721_v31 = vmax.f32 %v2713_v24, 0.0 }
 0xcf9   : > { %v5925_v28 = vpack.c.bf16 %v2719_v30, %v2718_v20  ;;  %v5926_v32 = vpack.c.bf16 %v2721_v31, %v2720_v29 }
 0xcfb   : > { %v2762_v34 = vrot.slane %v5925_v28, %v2747_v10  ;;  %v2769_v35 = vrot.slane %v5926_v32, %v2747_v10 }
 0xcfd   : > { %v2771_v36 = vcombine.low %v2762_v34, %v2769_v35 }
 0xcff   : > { %v2785_v22 = vrot.slane %v2771_v36, %v2747_v10 }
 0xd01   : > { %v2786_v37 = vcombine.low %v2778_v21, %v2785_v22 }
 0xd03   : > { %2788 = vst [vmem:[#allocation2] sm:$0xff] %v2786_v37 }
 0xd04 PF: > { %v6711_v38 = vld [vmem:[%s7866_s8 + $0x74] ss:$8 sps:$4 sm:$0xff]   ;;  %v6715_v40 = vld [vmem:[%s7866_s8 + $0x70] ss:$8 sps:$4 sm:$0xff]   ;;  %v6717_v42 = vld [vmem:[%s7866_s8 + $0x64] ss:$8 sps:$4 sm:$0xff]   ;;  %v2922_v19 = vlaneseq }
 0xd05   : > { %v6713_v39 = vld [vmem:[%s7866_s8 + $0x174] ss:$8 sps:$4 sm:$0xff]   ;;  %3630 = vmatprep.subr.bf16.mxu0 %v6711_v38  ;;  %v6716_v41 = vld [vmem:[%s7866_s8 + $0x170] ss:$8 sps:$4 sm:$0xff]   ;;  %v6719_v43 = vld [vmem:[%s7866_s8 + $0x164] ss:$8 sps:$4 sm:$0xff]  }
 0xd06   : > { %3671 = vmatprep.subr.bf16.mxu1 %v6713_v39  ;;  %3631 = vmatpush1.bf16.msra.mxu0 %v6715_v40  ;;  %v6721_v44 = vld [vmem:[%s7866_s8 + $0x60] ss:$8 sps:$4 sm:$0xff]   ;;  %v6723_v46 = vld [vmem:[%s7866_s8 + $0x54] ss:$8 sps:$4 sm:$0xff]   ;;  %v6727_v48 = vld [vmem:[%s7866_s8 + $0x50] ss:$8 sps:$4 sm:$0xff]  }
 0xd07   : > { %3672 = vmatpush1.bf16.msra.mxu1 %v6716_v41  ;;  %3632 = vmatprep.subr.bf16.mxu0 %v6717_v42  ;;  %v6722_v45 = vld [vmem:[%s7866_s8 + $0x160] ss:$8 sps:$4 sm:$0xff]   ;;  %v6725_v47 = vld [vmem:[%s7866_s8 + $0x154] ss:$8 sps:$4 sm:$0xff]   ;;  %v6728_v49 = vld [vmem:[%s7866_s8 + $0x150] ss:$8 sps:$4 sm:$0xff]  }
 0xd08   : > { %3673 = vmatprep.subr.bf16.mxu1 %v6719_v43  ;;  %v6729_v50 = vld [vmem:[%s7866_s8 + $0x44] ss:$8 sps:$4 sm:$0xff]   ;;  %v6733_v52 = vld [vmem:[%s7866_s8 + $0x40] ss:$8 sps:$4 sm:$0xff]   ;;  %v6735_v54 = vld [vmem:[%s7866_s8 + $0x34] ss:$8 sps:$4 sm:$0xff]  }
 0xd09   : > { %v6731_v51 = vld [vmem:[%s7866_s8 + $0x144] ss:$8 sps:$4 sm:$0xff]   ;;  %v6734_v53 = vld [vmem:[%s7866_s8 + $0x140] ss:$8 sps:$4 sm:$0xff]   ;;  %v6737_v55 = vld [vmem:[%s7866_s8 + $0x134] ss:$8 sps:$4 sm:$0xff]  }
 0xd0a   : > { %3633 = vmatpush1.bf16.msra.mxu0 %v6721_v44  ;;  %v6739_v56 = vld [vmem:[%s7866_s8 + $0x30] ss:$8 sps:$4 sm:$0xff]   ;;  %v6741_v58 = vld [vmem:[%s7866_s8 + $0x24] ss:$8 sps:$4 sm:$0xff]   ;;  %v6745_v60 = vld [vmem:[%s7866_s8 + $0x20] ss:$8 sps:$4 sm:$0xff]  }
 0xd0b   : > { %3674 = vmatpush1.bf16.msra.mxu1 %v6722_v45  ;;  %3634 = vmatprep.subr.bf16.mxu0 %v6723_v46  ;;  %v6740_v57 = vld [vmem:[%s7866_s8 + $0x130] ss:$8 sps:$4 sm:$0xff]   ;;  %v6743_v59 = vld [vmem:[%s7866_s8 + $0x124] ss:$8 sps:$4 sm:$0xff]   ;;  %v6746_v61 = vld [vmem:[%s7866_s8 + $0x120] ss:$8 sps:$4 sm:$0xff]  }
 0xd0c   : > { %3675 = vmatprep.subr.bf16.mxu1 %v6725_v47  ;;  %v6747_v62 = vld [vmem:[%s7866_s8 + $0x14] ss:$8 sps:$4 sm:$0xff]   ;;  %v6751_v0 = vld [vmem:[%s7866_s8 + $0x10] ss:$8 sps:$4 sm:$0xff]   ;;  %v6753_v2 = vld [vmem:[%s7866_s8 + $0x4] ss:$8 sps:$4 sm:$0xff]  }
 0xd0d   : > { %v6749_v63 = vld [vmem:[%s7866_s8 + $0x114] ss:$8 sps:$4 sm:$0xff]   ;;  %v6752_v1 = vld [vmem:[%s7866_s8 + $0x110] ss:$8 sps:$4 sm:$0xff]   ;;  %v6755_v3 = vld [vmem:[%s7866_s8 + $0x104] ss:$8 sps:$4 sm:$0xff]  }
 0xd0e   : > { %3635 = vmatpush1.bf16.msra.mxu0 %v6727_v48  ;;  %v6757_v5 = vld [vmem:[%s7866_s8] ss:$8 sps:$4 sm:$0xff]   ;;  %v6759_v8 = vld [vmem:[%s7866_s8 + $0xf4] ss:$8 sps:$4 sm:$0xff]   ;;  %v6763_v9 = vld [vmem:[%s7866_s8 + $0xf0] ss:$8 sps:$4 sm:$0xff]  }
 0xd0f   : > { %3676 = vmatpush1.bf16.msra.mxu1 %v6728_v49  ;;  %3636 = vmatprep.subr.bf16.mxu0 %v6729_v50  ;;  %v6758_v6 = vld [vmem:[%s7866_s8 + $0x100] ss:$8 sps:$4 sm:$0xff]   ;;  %v6761_v4 = vld [vmem:[%s7866_s8 + $0x1f4] ss:$8 sps:$4 sm:$0xff]   ;;  %v6764_v10 = vld [vmem:[%s7866_s8 + $0x1f0] ss:$8 sps:$4 sm:$0xff]  }
 0xd10   : > { %3677 = vmatprep.subr.bf16.mxu1 %v6731_v51  ;;  %v7457_v11 = vmov 1966171168   ;;  %v6765_v13 = vld [vmem:[%s7866_s8 + $0xe4] ss:$8 sps:$4 sm:$0xff]   ;;  %v6769_v15 = vld [vmem:[%s7866_s8 + $0xe0] ss:$8 sps:$4 sm:$0xff]  }
 0xd11   : > { %v2935_v12 = vunpack.c.l.s4 %v7457_v11  ;;  %v6767_v14 = vld [vmem:[%s7866_s8 + $0x1e4] ss:$8 sps:$4 sm:$0xff]   ;;  %v7999_v16 = vshrl.u32 %v2922_v19, 7  ;;  %v6770_v23 = vld [vmem:[%s7866_s8 + $0x1e0] ss:$8 sps:$4 sm:$0xff]   ;;  %p6183_p2 = scmp.ne.s32.totalorder %s7578_s20, 3 }
 0xd12   : > { %3637 = vmatpush1.bf16.msra.mxu0 %v6733_v52  ;;  %v6771_v7 = vld [vmem:[%s7866_s8 + $0xd4] ss:$8 sps:$4 sm:$0xff]   ;;  %v6775_v25 = vld [vmem:[%s7866_s8 + $0xd0] ss:$8 sps:$4 sm:$0xff]   ;;  %v6777_v18 = vld [vmem:[%s7866_s8 + $0xc4] ss:$8 sps:$4 sm:$0xff]  }
 0xd13   : > { %3678 = vmatpush1.bf16.msra.mxu1 %v6734_v53  ;;  %3638 = vmatprep.subr.bf16.mxu0 %v6735_v54  ;;  %v2936_v17 = vunpack.c.0.s8 %v2935_v12  ;;  %v6773_v24 = vld [vmem:[%s7866_s8 + $0x1d4] ss:$8 sps:$4 sm:$0xff]   ;;  %v6776_v26 = vld [vmem:[%s7866_s8 + $0x1d0] ss:$8 sps:$4 sm:$0xff]   ;;  %v6779_v20 = vld [vmem:[%s7866_s8 + $0x1c4] ss:$8 sps:$4 sm:$0xff]  }
 0xd14   : > { %3679 = vmatprep.subr.bf16.mxu1 %v6737_v55  ;;  %v2791_v29 = vld [vmem:[#allocation2] sm:$0xff]  ;;  %v6783_v33 = vld [vmem:[%s7866_s8 + $0xb4] ss:$8 sps:$4 sm:$0xff]   ;;  %v6787_v21 = vld [vmem:[%s7866_s8 + $0xb0] ss:$8 sps:$4 sm:$0xff]   ;;  %s8567_s16 = sld [smem:[#allocation50_spill]] (!%p6183_p2) }
 0xd15   : > { %v2939_v27 = vsub.s32 %v2936_v17, %v7999_v16  ;;  %v6781_v30 = vld [vmem:[%s7866_s8 + $0xc0] ss:$8 sps:$4 sm:$0xff]   ;;  %v2933_v31 = vcombine.high %v2791_v29, %v2791_v29  ;;  %v6785_v34 = vld [vmem:[%s7866_s8 + $0x1b4] ss:$8 sps:$4 sm:$0xff]   ;;  %v6788_v38 = vld [vmem:[%s7866_s8 + $0x1b0] ss:$8 sps:$4 sm:$0xff]  }
 0xd16   : > { %3639 = vmatpush1.bf16.msra.mxu0 %v6739_v56  ;;  %v6782_v32 = vld [vmem:[%s7866_s8 + $0x1c0] ss:$8 sps:$4 sm:$0xff]   ;;  %v6789_v39 = vld [vmem:[%s7866_s8 + $0xa4] ss:$8 sps:$4 sm:$0xff]   ;;  %v6795_v44 = vld [vmem:[%s7866_s8 + $0x94] ss:$8 sps:$4 sm:$0xff]  }
 0xd17   : > { %3680 = vmatpush1.bf16.msra.mxu1 %v6740_v57  ;;  %3640 = vmatprep.subr.bf16.mxu0 %v6741_v58  ;;  %v2940_v28 = vrot.slane %v2791_v29, %v2939_v27  ;;  %v2947_v36 = vrot.slane %v2933_v31, %v2939_v27  ;;  %v6791_v40 = vld [vmem:[%s7866_s8 + $0x1a4] ss:$8 sps:$4 sm:$0xff]   ;;  %v6793_v42 = vld [vmem:[%s7866_s8 + $0xa0] ss:$8 sps:$4 sm:$0xff]   ;;  %v6797_v45 = vld [vmem:[%s7866_s8 + $0x194] ss:$8 sps:$4 sm:$0xff]  }
 0xd18   : > { %3681 = vmatprep.subr.bf16.mxu1 %v6743_v59  ;;  %v6794_v43 = vld [vmem:[%s7866_s8 + $0x1a0] ss:$8 sps:$4 sm:$0xff]   ;;  %v6799_v46 = vld [vmem:[%s7866_s8 + $0x90] ss:$8 sps:$4 sm:$0xff]   ;;  %v6801_v48 = vld [vmem:[%s7866_s8 + $0x84] ss:$8 sps:$4 sm:$0xff]  }
 0xd19   : > { %v2948_v35 = vcombine.high %v2940_v28, %v2940_v28  ;;  %v8014_v37 = vrot.slane %v2947_v36, %v2939_v27  ;;  %v6800_v47 = vld [vmem:[%s7866_s8 + $0x190] ss:$8 sps:$4 sm:$0xff]   ;;  %v6803_v49 = vld [vmem:[%s7866_s8 + $0x184] ss:$8 sps:$4 sm:$0xff]   ;;  %v2949_v50 = vcombine.high %v2947_v36, %v2947_v36  ;;  %v6805_v51 = vld [vmem:[%s7866_s8 + $0x80] ss:$8 sps:$4 sm:$0xff]   ;;  %v2956_v52 = vrot.slane %v2940_v28, %v2939_v27 }
 0xd1a   : > { %3641 = vmatpush1.bf16.msra.mxu0 %v6745_v60  ;;  %v6806_v53 = vld [vmem:[%s7866_s8 + $0x180] ss:$8 sps:$4 sm:$0xff]   ;;  %v6810_v54 = vld [vmem:[%s7866_s8 + $0x274] ss:$8 sps:$4 sm:$0xff]   ;;  %v6808_v58 = vld [vmem:[%s7866_s8 + $0x270] ss:$8 sps:$4 sm:$0xff]  }
 0xd1b   : > { %3682 = vmatpush1.bf16.msra.mxu1 %v6746_v61  ;;  %3642 = vmatprep.subr.bf16.mxu0 %v6747_v62  ;;  %v2970_v22 = vrot.slane %v2948_v35, %v2939_v27  ;;  %v6813_v55 = vld [vmem:[%s7866_s8 + $0x374] ss:$8 sps:$4 sm:$0xff]   ;;  %v2977_v56 = vrot.slane %v2949_v50, %v2939_v27  ;;  %v2978_v57 = vcombine.high %v2956_v52, %v2956_v52  ;;  %v6811_v59 = vld [vmem:[%s7866_s8 + $0x370] ss:$8 sps:$4 sm:$0xff]   ;;  %v6816_v60 = vld [vmem:[%s7866_s8 + $0x264] ss:$8 sps:$4 sm:$0xff]  }
 0xd1c   : > { %3683 = vmatprep.subr.bf16.mxu1 %v6749_v63  ;;  %v6819_v61 = vld [vmem:[%s7866_s8 + $0x364] ss:$8 sps:$4 sm:$0xff]   ;;  %v6814_v63 = vld [vmem:[%s7866_s8 + $0x260] ss:$8 sps:$4 sm:$0xff]   ;;  %v6837_v19 = vld [vmem:[%s7866_s8 + $0x334] ss:$8 sps:$4 sm:$0xff]  }
 0xd1d   : > { %v2980_v41 = vcombine.high %v2970_v22, %v2970_v22  ;;  %3662 = vmatprep.mubr.bf16.mxu0 %v2970_v22  ;;  %v2981_v62 = vcombine.high %v2977_v56, %v2977_v56  ;;  %v6832_v11 = vld [vmem:[%s7866_s8 + $0x230] ss:$8 sps:$4 sm:$0xff]   ;;  %v6841_v17 = vld [vmem:[%s7866_s8 + $0x320] ss:$8 sps:$4 sm:$0xff]   ;;  %v6855_v27 = vld [vmem:[%s7866_s8 + $0x304] ss:$8 sps:$4 sm:$0xff]  }
 0xd1e   : > { %3643 = vmatpush1.bf16.msra.mxu0 %v6751_v0  ;;  %v6817_v0 = vld [vmem:[%s7866_s8 + $0x360] ss:$8 sps:$4 sm:$0xff]   ;;  %v6835_v12 = vld [vmem:[%s7866_s8 + $0x330] ss:$8 sps:$4 sm:$0xff]   ;;  %v6858_v29 = vld [vmem:[%s7866_s8 + $0x2f4] ss:$8 sps:$4 sm:$0xff]  }
 0xd1f   : > { %3684 = vmatpush1.bf16.msra.mxu1 %v6752_v1  ;;  %3644 = vmatprep.subr.bf16.mxu0 %v6753_v2  ;;  %v6822_v1 = vld [vmem:[%s7866_s8 + $0x254] ss:$8 sps:$4 sm:$0xff]   ;;  %v6856_v31 = vld [vmem:[%s7866_s8 + $0x2f0] ss:$8 sps:$4 sm:$0xff]   ;;  %v6865_v35 = vld [vmem:[%s7866_s8 + $0x3e0] ss:$8 sps:$4 sm:$0xff]  }
 0xd20   : > { %3685 = vmatprep.subr.bf16.mxu1 %v6755_v3  ;;  %3703 = vmatprep.mubr.bf16.mxu1 %v2980_v41  ;;  %v6825_v2 = vld [vmem:[%s7866_s8 + $0x354] ss:$8 sps:$4 sm:$0xff]   ;;  %v6820_v3 = vld [vmem:[%s7866_s8 + $0x250] ss:$8 sps:$4 sm:$0xff]   ;;  %v6874_v41 = vld [vmem:[%s7866_s8 + $0x2c0] ss:$8 sps:$4 sm:$0xff]  }
 0xd21   : > { %v6859_v28 = vld [vmem:[%s7866_s8 + $0x3f0] ss:$8 sps:$4 sm:$0xff]   ;;  %v6870_v36 = vld [vmem:[%s7866_s8 + $0x2d4] ss:$8 sps:$4 sm:$0xff]   ;;  %v6889_v50 = vld [vmem:[%s7866_s8 + $0x3a0] ss:$8 sps:$4 sm:$0xff]  }
 0xd22   : > { %3645 = vmatpush1.bf16.msra.mxu0 %v6757_v5  ;;  %v6823_v5 = vld [vmem:[%s7866_s8 + $0x350] ss:$8 sps:$4 sm:$0xff]   ;;  %s8568_s18 = sld [smem:[#allocation51_spill]] (!%p6183_p2) }
 0xd23   : > { %3686 = vmatpush1.bf16.msra.mxu1 %v6758_v6  ;;  %3646 = vmatprep.subr.bf16.mxu0 %v6759_v8  ;;  %v6828_v6 = vld [vmem:[%s7866_s8 + $0x244] ss:$8 sps:$4 sm:$0xff]   ;;  %v6868_v22 = vld [vmem:[%s7866_s8 + $0x2d0] ss:$8 sps:$4 sm:$0xff]  }
 0xd24   : > { %3687 = vmatprep.subr.bf16.mxu1 %v6761_v4  ;;  %v6831_v8 = vld [vmem:[%s7866_s8 + $0x344] ss:$8 sps:$4 sm:$0xff]   ;;  %v6826_v4 = vld [vmem:[%s7866_s8 + $0x240] ss:$8 sps:$4 sm:$0xff]  }
 0xd26   : > { %3647 = vmatpush2.bf16.msra.mxu0 %v6763_v9  ;;  %v6829_v9 = vld [vmem:[%s7866_s8 + $0x340] ss:$8 sps:$4 sm:$0xff]  }
 0xd27   : > { %3688 = vmatpush2.bf16.msra.mxu1 %v6764_v10  ;;  %3648 = vmatprep.subr.bf16.mxu0 %v6765_v13  ;;  %v6834_v10 = vld [vmem:[%s7866_s8 + $0x234] ss:$8 sps:$4 sm:$0xff]   ;;  %v6840_v13 = vld [vmem:[%s7866_s8 + $0x224] ss:$8 sps:$4 sm:$0xff]  }
 0xd28   : > { %3689 = vmatprep.subr.bf16.mxu1 %v6767_v14  ;;  %v6843_v14 = vld [vmem:[%s7866_s8 + $0x324] ss:$8 sps:$4 sm:$0xff]  }
 0xd2a   : > { %3649 = vmatpush2.bf16.msra.mxu0 %v6769_v15  ;;  %v6838_v15 = vld [vmem:[%s7866_s8 + $0x220] ss:$8 sps:$4 sm:$0xff]  }
 0xd2b   : > { %3690 = vmatpush2.bf16.msra.mxu1 %v6770_v23  ;;  %3650 = vmatprep.subr.bf16.mxu0 %v6771_v7  ;;  %v6846_v23 = vld [vmem:[%s7866_s8 + $0x214] ss:$8 sps:$4 sm:$0xff]  }
 0xd2c   : > { %3691 = vmatprep.subr.bf16.mxu1 %v6773_v24  ;;  %v6849_v7 = vld [vmem:[%s7866_s8 + $0x314] ss:$8 sps:$4 sm:$0xff]   ;;  %v6844_v24 = vld [vmem:[%s7866_s8 + $0x210] ss:$8 sps:$4 sm:$0xff]  }
 0xd2e   : > { %3651 = vmatpush2.bf16.msra.mxu0 %v6775_v25  ;;  %v6847_v25 = vld [vmem:[%s7866_s8 + $0x310] ss:$8 sps:$4 sm:$0xff]  }
 0xd2f   : > { %3692 = vmatpush2.bf16.msra.mxu1 %v6776_v26  ;;  %3652 = vmatprep.subr.bf16.mxu0 %v6777_v18  ;;  %v6852_v26 = vld [vmem:[%s7866_s8 + $0x204] ss:$8 sps:$4 sm:$0xff]   ;;  %v6850_v18 = vld [vmem:[%s7866_s8 + $0x200] ss:$8 sps:$4 sm:$0xff]  }
 0xd30   : > { %3693 = vmatprep.subr.bf16.mxu1 %v6779_v20  ;;  %v6853_v20 = vld [vmem:[%s7866_s8 + $0x300] ss:$8 sps:$4 sm:$0xff]  }
 0xd32   : > { %3653 = vmatpush2.bf16.msra.mxu0 %v6781_v30  ;;  %v6861_v30 = vld [vmem:[%s7866_s8 + $0x3f4] ss:$8 sps:$4 sm:$0xff]  }
 0xd33   : > { %3694 = vmatpush2.bf16.msra.mxu1 %v6782_v32  ;;  %3654 = vmatprep.subr.bf16.mxu0 %v6783_v33  ;;  %v6864_v32 = vld [vmem:[%s7866_s8 + $0x2e4] ss:$8 sps:$4 sm:$0xff]  }
 0xd34   : > { %3695 = vmatprep.subr.bf16.mxu1 %v6785_v34  ;;  %v6867_v33 = vld [vmem:[%s7866_s8 + $0x3e4] ss:$8 sps:$4 sm:$0xff]   ;;  %v6862_v34 = vld [vmem:[%s7866_s8 + $0x2e0] ss:$8 sps:$4 sm:$0xff]  }
 0xd36   : > { %3655 = vmatpush2.bf16.msra.mxu0 %v6787_v21  ;;  %v6873_v21 = vld [vmem:[%s7866_s8 + $0x3d4] ss:$8 sps:$4 sm:$0xff]  }
 0xd37   : > { %3696 = vmatpush2.bf16.msra.mxu1 %v6788_v38  ;;  %3656 = vmatprep.subr.bf16.mxu0 %v6789_v39  ;;  %v6871_v38 = vld [vmem:[%s7866_s8 + $0x3d0] ss:$8 sps:$4 sm:$0xff]   ;;  %v6876_v39 = vld [vmem:[%s7866_s8 + $0x2c4] ss:$8 sps:$4 sm:$0xff]  }
 0xd38   : > { %3697 = vmatprep.subr.bf16.mxu1 %v6791_v40  ;;  %v6879_v40 = vld [vmem:[%s7866_s8 + $0x3c4] ss:$8 sps:$4 sm:$0xff]  }
 0xd3a   : > { %3657 = vmatpush2.bf16.msra.mxu0 %v6793_v42  ;;  %v6877_v42 = vld [vmem:[%s7866_s8 + $0x3c0] ss:$8 sps:$4 sm:$0xff]  }
 0xd3b   : > { %3698 = vmatpush2.bf16.msra.mxu1 %v6794_v43  ;;  %3658 = vmatprep.subr.bf16.mxu0 %v6795_v44  ;;  %v6882_v43 = vld [vmem:[%s7866_s8 + $0x2b4] ss:$8 sps:$4 sm:$0xff]  }
 0xd3c   : > { %3699 = vmatprep.subr.bf16.mxu1 %v6797_v45  ;;  %v6885_v44 = vld [vmem:[%s7866_s8 + $0x3b4] ss:$8 sps:$4 sm:$0xff]   ;;  %v6880_v45 = vld [vmem:[%s7866_s8 + $0x2b0] ss:$8 sps:$4 sm:$0xff]  }
 0xd3e   : > { %3659 = vmatpush2.bf16.msra.mxu0 %v6799_v46  ;;  %v6883_v46 = vld [vmem:[%s7866_s8 + $0x3b0] ss:$8 sps:$4 sm:$0xff]  }
 0xd3f   : > { %3700 = vmatpush2.bf16.msra.mxu1 %v6800_v47  ;;  %3660 = vmatprep.subr.bf16.mxu0 %v6801_v48  ;;  %v6888_v47 = vld [vmem:[%s7866_s8 + $0x2a4] ss:$8 sps:$4 sm:$0xff]  }
 0xd40   : > { %3701 = vmatprep.subr.bf16.mxu1 %v6803_v49  ;;  %v6891_v48 = vld [vmem:[%s7866_s8 + $0x3a4] ss:$8 sps:$4 sm:$0xff]   ;;  %v6886_v49 = vld [vmem:[%s7866_s8 + $0x2a0] ss:$8 sps:$4 sm:$0xff]  }
 0xd42   : > { %3661 = vmatpush2.bf16.msra.mxu0 %v6805_v51  ;;  %v6894_v51 = vld [vmem:[%s7866_s8 + $0x294] ss:$8 sps:$4 sm:$0xff]  }
 0xd43   : > { %3702 = vmatpush2.bf16.msra.mxu1 %v6806_v53  ;;  %3712 = vmatprep.subr.bf16.mxu0 %v6810_v54  ;;  %v6892_v53 = vld [vmem:[%s7866_s8 + $0x290] ss:$8 sps:$4 sm:$0xff]  }
 0xd44   : > { %3753 = vmatprep.subr.bf16.mxu1 %v6813_v55  ;;  %v6895_v54 = vld [vmem:[%s7866_s8 + $0x390] ss:$8 sps:$4 sm:$0xff]   ;;  %v6900_v55 = vld [vmem:[%s7866_s8 + $0x284] ss:$8 sps:$4 sm:$0xff]  }
 0xd45   : > { %3663 = vmatmul.mubr.bf16.vlgmr.msra.gmra.mxu0 %v2956_v52  ;;  %v6897_v52 = vld [vmem:[%s7866_s8 + $0x394] ss:$8 sps:$4 sm:$0xff]  }
 0xd46   : > { %3704 = vmatmul.mubr.bf16.vlgmr.msra.gmra.mxu1 %v2978_v57  ;;  %3713 = vmatpush1.bf16.msra.mxu0 %v6808_v58  ;;  %v6898_v57 = vld [vmem:[%s7866_s8 + $0x280] ss:$8 sps:$4 sm:$0xff]  }
 0xd47   : > { %3754 = vmatpush1.bf16.msra.mxu1 %v6811_v59  ;;  %3714 = vmatprep.subr.bf16.mxu0 %v6816_v60  ;;  %v6901_v58 = vld [vmem:[%s7866_s8 + $0x380] ss:$8 sps:$4 sm:$0xff]   ;;  %v2979_v59 = vcombine.high %v8014_v37, %v8014_v37 }
 0xd48   : > { %3755 = vmatprep.subr.bf16.mxu1 %v6819_v61  ;;  %3744 = vmatprep.mubr.bf16.mxu0 %v2977_v56  ;;  %v6903_v56 = vld [vmem:[%s7866_s8 + $0x384] ss:$8 sps:$4 sm:$0xff]  }
 0xd49   : > { %3785 = vmatprep.mubr.bf16.mxu1 %v2981_v62  ;;  %v3856_v60 = vld [vmem:[%s7875_s17 + $0x1c0] sm:$0xff]  ;;  %v3857_v62 = vld [vmem:[%s7875_s17 + $0x1c8] sm:$0xff] }
 0xd4a   : > { %3715 = vmatpush1.bf16.msra.mxu0 %v6814_v63  ;;  %v3860_v61 = vld [vmem:[%s7875_s17 + $0x1e0] sm:$0xff] }
 0xd4b   : > { %3756 = vmatpush1.bf16.msra.mxu1 %v6817_v0  ;;  %3716 = vmatprep.subr.bf16.mxu0 %v6822_v1  ;;  %v6111_v63 = vcombine.low %v3856_v60, %v3860_v61  ;;  %v6112_v0 = vcombine.high %v3856_v60, %v3860_v61  ;;  %v3861_v1 = vld [vmem:[%s7875_s17 + $0x1e8] sm:$0xff]  ;;  %v3924_v60 = vld [vmem:[%s7875_s17 + $0x3e0] sm:$0xff] }
 0xd4c   : > { %3757 = vmatprep.subr.bf16.mxu1 %v6825_v2  ;;  %v3848_v2 = vld [vmem:[%s7875_s17 + $0x180] sm:$0xff]  ;;  %v3921_v61 = vld [vmem:[%s7875_s17 + $0x3c8] sm:$0xff] }
 0xd4e   : > { %3717 = vmatpush1.bf16.msra.mxu0 %v6820_v3  ;;  %v3852_v3 = vld [vmem:[%s7875_s17 + $0x1a0] sm:$0xff] }
 0xd4f   : > { %3758 = vmatpush1.bf16.msra.mxu1 %v6823_v5  ;;  %3718 = vmatprep.subr.bf16.mxu0 %v6828_v6  ;;  %v6113_v5 = vcombine.low %v3857_v62, %v3861_v1  ;;  %v6114_v6 = vcombine.high %v3857_v62, %v3861_v1  ;;  %v3925_v62 = vld [vmem:[%s7875_s17 + $0x3e8] sm:$0xff] }
 0xd50   : > { %3759 = vmatprep.subr.bf16.mxu1 %v6831_v8  ;;  %v6104_v8 = vcombine.high %v3848_v2, %v3852_v3 }
 0xd52   : > { %3719 = vmatpush1.bf16.msra.mxu0 %v6826_v4  ;;  %v3849_v4 = vld [vmem:[%s7875_s17 + $0x188] sm:$0xff] }
 0xd53   : > { %3760 = vmatpush1.bf16.msra.mxu1 %v6829_v9  ;;  %3720 = vmatprep.subr.bf16.mxu0 %v6834_v10  ;;  %v3853_v9 = vld [vmem:[%s7875_s17 + $0x1a8] sm:$0xff]  ;;  %v3840_v10 = vld [vmem:[%s7875_s17 + $0x140] sm:$0xff] }
 0xd54   : > { %3761 = vmatprep.subr.bf16.mxu1 %v6837_v19  ;;  %v3844_v19 = vld [vmem:[%s7875_s17 + $0x160] sm:$0xff] }
 0xd56   : > { %3721 = vmatpush1.bf16.msra.mxu0 %v6832_v11  ;;  %v3841_v11 = vld [vmem:[%s7875_s17 + $0x148] sm:$0xff] }
 0xd57   : > { %3762 = vmatpush1.bf16.msra.mxu1 %v6835_v12  ;;  %3722 = vmatprep.subr.bf16.mxu0 %v6840_v13  ;;  %v3845_v12 = vld [vmem:[%s7875_s17 + $0x168] sm:$0xff]  ;;  %v6103_v13 = vcombine.low %v3848_v2, %v3852_v3  ;;  %v6178_v2 = vcombine.high %v3921_v61, %v3925_v62  ;;  %v3912_v3 = vld [vmem:[%s7875_s17 + $0x380] sm:$0xff] }
 0xd58   : > { %3763 = vmatprep.subr.bf16.mxu1 %v6843_v14  ;;  %v6105_v14 = vcombine.low %v3849_v4, %v3853_v9 }
 0xd5a   : > { %3723 = vmatpush1.bf16.msra.mxu0 %v6838_v15  ;;  %v6096_v15 = vcombine.high %v3840_v10, %v3844_v19 }
 0xd5b   : > { %3764 = vmatpush1.bf16.msra.mxu1 %v6841_v17  ;;  %3724 = vmatprep.subr.bf16.mxu0 %v6846_v23  ;;  %v6098_v17 = vcombine.high %v3841_v11, %v3845_v12  ;;  %v3832_v23 = vld [vmem:[%s7875_s17 + $0x100] sm:$0xff] }
 0xd5c   : > { %3765 = vmatprep.subr.bf16.mxu1 %v6849_v7  ;;  %v3836_v7 = vld [vmem:[%s7875_s17 + $0x120] sm:$0xff] }
 0xd5e   : > { %3725 = vmatpush1.bf16.msra.mxu0 %v6844_v24  ;;  %v3833_v24 = vld [vmem:[%s7875_s17 + $0x108] sm:$0xff] }
 0xd5f   : > { %3766 = vmatpush1.bf16.msra.mxu1 %v6847_v25  ;;  %3726 = vmatprep.subr.bf16.mxu0 %v6852_v26  ;;  %v3837_v25 = vld [vmem:[%s7875_s17 + $0x128] sm:$0xff]  ;;  %v6095_v26 = vcombine.low %v3840_v10, %v3844_v19  ;;  %v3904_v19 = vld [vmem:[%s7875_s17 + $0x340] sm:$0xff] }
 0xd60   : > { %3767 = vmatprep.subr.bf16.mxu1 %v6855_v27  ;;  %v6097_v27 = vcombine.low %v3841_v11, %v3845_v12  ;;  %v3908_v11 = vld [vmem:[%s7875_s17 + $0x360] sm:$0xff]  ;;  %v3905_v12 = vld [vmem:[%s7875_s17 + $0x348] sm:$0xff] }
 0xd62   : > { %3727 = vmatpush1.bf16.msra.mxu0 %v6850_v18  ;;  %v6088_v18 = vcombine.high %v3832_v23, %v3836_v7 }
 0xd63   : > { %3768 = vmatpush1.bf16.msra.mxu1 %v6853_v20  ;;  %3728 = vmatprep.subr.bf16.mxu0 %v6858_v29  ;;  %v6090_v20 = vcombine.high %v3833_v24, %v3837_v25  ;;  %v3824_v29 = vld [vmem:[%s7875_s17 + $0xc0] sm:$0xff] }
 0xd64   : > { %3769 = vmatprep.subr.bf16.mxu1 %v6861_v30  ;;  %v3828_v30 = vld [vmem:[%s7875_s17 + $0xe0] sm:$0xff] }
 0xd66   : > { %3729 = vmatpush2.bf16.msra.mxu0 %v6856_v31  ;;  %v3825_v31 = vld [vmem:[%s7875_s17 + $0xc8] sm:$0xff] }
 0xd67   : > { %3770 = vmatpush2.bf16.msra.mxu1 %v6859_v28  ;;  %3730 = vmatprep.subr.bf16.mxu0 %v6864_v32  ;;  %v3829_v28 = vld [vmem:[%s7875_s17 + $0xe8] sm:$0xff]  ;;  %v6087_v32 = vcombine.low %v3832_v23, %v3836_v7  ;;  %v3896_v7 = vld [vmem:[%s7875_s17 + $0x300] sm:$0xff] }
 0xd68   : > { %3771 = vmatprep.subr.bf16.mxu1 %v6867_v33  ;;  %v6089_v33 = vcombine.low %v3833_v24, %v3837_v25  ;;  %v3900_v24 = vld [vmem:[%s7875_s17 + $0x320] sm:$0xff]  ;;  %v3897_v25 = vld [vmem:[%s7875_s17 + $0x308] sm:$0xff] }
 0xd6a   : > { %3731 = vmatpush2.bf16.msra.mxu0 %v6862_v34  ;;  %v6080_v34 = vcombine.high %v3824_v29, %v3828_v30 }
 0xd6b   : > { %3772 = vmatpush2.bf16.msra.mxu1 %v6865_v35  ;;  %3732 = vmatprep.subr.bf16.mxu0 %v6870_v36  ;;  %v6082_v35 = vcombine.high %v3825_v31, %v3829_v28  ;;  %v3816_v36 = vld [vmem:[%s7875_s17 + $0x80] sm:$0xff] }
 0xd6c   : > { %3773 = vmatprep.subr.bf16.mxu1 %v6873_v21  ;;  %v3820_v21 = vld [vmem:[%s7875_s17 + $0xa0] sm:$0xff] }
 0xd6e   : > { %3733 = vmatpush2.bf16.msra.mxu0 %v6868_v22  ;;  %v3817_v22 = vld [vmem:[%s7875_s17 + $0x88] sm:$0xff] }
 0xd6f   : > { %3774 = vmatpush2.bf16.msra.mxu1 %v6871_v38  ;;  %3734 = vmatprep.subr.bf16.mxu0 %v6876_v39  ;;  %v3821_v38 = vld [vmem:[%s7875_s17 + $0xa8] sm:$0xff]  ;;  %v6079_v39 = vcombine.low %v3824_v29, %v3828_v30  ;;  %v3888_v30 = vld [vmem:[%s7875_s17 + $0x2c0] sm:$0xff] }
 0xd70   : > { %3775 = vmatprep.subr.bf16.mxu1 %v6879_v40  ;;  %v6081_v40 = vcombine.low %v3825_v31, %v3829_v28  ;;  %v3892_v31 = vld [vmem:[%s7875_s17 + $0x2e0] sm:$0xff]  ;;  %v3889_v28 = vld [vmem:[%s7875_s17 + $0x2c8] sm:$0xff] }
 0xd72   : > { %3735 = vmatpush2.bf16.msra.mxu0 %v6874_v41  ;;  %v6072_v41 = vcombine.high %v3816_v36, %v3820_v21 }
 0xd73   : > { %3776 = vmatpush2.bf16.msra.mxu1 %v6877_v42  ;;  %3736 = vmatprep.subr.bf16.mxu0 %v6882_v43  ;;  %v6074_v42 = vcombine.high %v3817_v22, %v3821_v38  ;;  %v3808_v43 = vld [vmem:[%s7875_s17 + $0x40] sm:$0xff] }
 0xd74   : > { %3777 = vmatprep.subr.bf16.mxu1 %v6885_v44  ;;  %v3812_v44 = vld [vmem:[%s7875_s17 + $0x60] sm:$0xff] }
 0xd76   : > { %3737 = vmatpush2.bf16.msra.mxu0 %v6880_v45  ;;  %v3809_v45 = vld [vmem:[%s7875_s17 + $0x48] sm:$0xff] }
 0xd77   : > { %3778 = vmatpush2.bf16.msra.mxu1 %v6883_v46  ;;  %3738 = vmatprep.subr.bf16.mxu0 %v6888_v47  ;;  %v3813_v46 = vld [vmem:[%s7875_s17 + $0x68] sm:$0xff]  ;;  %v6071_v47 = vcombine.low %v3816_v36, %v3820_v21  ;;  %v3880_v21 = vld [vmem:[%s7875_s17 + $0x280] sm:$0xff] }
 0xd78   : > { %3779 = vmatprep.subr.bf16.mxu1 %v6891_v48  ;;  %v6073_v48 = vcombine.low %v3817_v22, %v3821_v38  ;;  %v3884_v22 = vld [vmem:[%s7875_s17 + $0x2a0] sm:$0xff]  ;;  %v3881_v38 = vld [vmem:[%s7875_s17 + $0x288] sm:$0xff] }
 0xd7a   : > { %3739 = vmatpush2.bf16.msra.mxu0 %v6886_v49  ;;  %v6064_v49 = vcombine.high %v3808_v43, %v3812_v44 }
 0xd7b   : > { %3780 = vmatpush2.bf16.msra.mxu1 %v6889_v50  ;;  %3740 = vmatprep.subr.bf16.mxu0 %v6894_v51  ;;  %v6066_v50 = vcombine.high %v3809_v45, %v3813_v46  ;;  %v3800_v51 = vld [vmem:[%s7875_s17] sm:$0xff] }
 0xd7c   : > { %3781 = vmatprep.subr.bf16.mxu1 %v6897_v52  ;;  %v3804_v52 = vld [vmem:[%s7875_s17 + $0x20] sm:$0xff] }
 0xd7e   : > { %3741 = vmatpush2.bf16.msra.mxu0 %v6892_v53  ;;  %v3801_v53 = vld [vmem:[%s7875_s17 + $0x8] sm:$0xff] }
 0xd7f   : > { %3782 = vmatpush2.bf16.msra.mxu1 %v6895_v54  ;;  %3742 = vmatprep.subr.bf16.mxu0 %v6900_v55  ;;  %v3805_v54 = vld [vmem:[%s7875_s17 + $0x28] sm:$0xff]  ;;  %v6063_v55 = vcombine.low %v3808_v43, %v3812_v44  ;;  %v6135_v44 = vcombine.low %v3880_v21, %v3884_v22 }
 0xd80   : > { %3783 = vmatprep.subr.bf16.mxu1 %v6903_v56  ;;  %v6065_v56 = vcombine.low %v3809_v45, %v3813_v46  ;;  %v3872_v46 = vld [vmem:[%s7875_s17 + $0x240] sm:$0xff] }
 0xd82   : > { %3743 = vmatpush2.bf16.msra.mxu0 %v6898_v57  ;;  %v6056_v57 = vcombine.high %v3800_v51, %v3804_v52 }
 0xd83   : > { %3784 = vmatpush2.bf16.msra.mxu1 %v6901_v58  ;;  %4568 = vmatprep.subr.bf16.mxu0 %v6112_v0  ;;  %v6058_v58 = vcombine.high %v3801_v53, %v3805_v54  ;;  %v6057_v0 = vcombine.low %v3801_v53, %v3805_v54  ;;  %v3864_v54 = vld [vmem:[%s7875_s17 + $0x200] sm:$0xff] }
 0xd84   : > { %4609 = vmatprep.subr.bf16.mxu1 %v6114_v6  ;;  %v3913_v6 = vld [vmem:[%s7875_s17 + $0x388] sm:$0xff] }
 0xd85   : > { %3745 = vmatmul.mubr.bf16.vlgmr.msra.gmra.mxu0 %v8014_v37  ;;  %v6106_v37 = vcombine.high %v3849_v4, %v3853_v9  ;;  %v6177_v9 = vcombine.low %v3921_v61, %v3925_v62  ;;  %v3858_v62 = vld [vmem:[%s7875_s17 + $0x1d0] sm:$0xff] }
 0xd86   : > { %3786 = vmatmul.mubr.bf16.vlgmr.msra.gmra.mxu1 %v2979_v59  ;;  %4569 = vmatpush1.bf16.msra.mxu0 %v6111_v63  ;;  %v3920_v59 = vld [vmem:[%s7875_s17 + $0x3c0] sm:$0xff]  ;;  %v6055_v63 = vcombine.low %v3800_v51, %v3804_v52 }
 0xd87   : > { %4610 = vmatpush1.bf16.msra.mxu1 %v6113_v5  ;;  %4570 = vmatprep.subr.bf16.mxu0 %v6104_v8  ;;  %v6176_v1 = vcombine.high %v3920_v59, %v3924_v60  ;;  %v3916_v5 = vld [vmem:[%s7875_s17 + $0x3a0] sm:$0xff]  ;;  %v3917_v8 = vld [vmem:[%s7875_s17 + $0x3a8] sm:$0xff]  ;;  %v6175_v4 = vcombine.low %v3920_v59, %v3924_v60 }
 0xd88   : > { %4611 = vmatprep.subr.bf16.mxu1 %v6106_v37  ;;  %v6168_v10 = vcombine.high %v3912_v3, %v3916_v5  ;;  %v6170_v37 = vcombine.high %v3913_v6, %v3917_v8 }
 0xd8a   : > { %4571 = vmatpush1.bf16.msra.mxu0 %v6103_v13  ;;  %v3909_v13 = vld [vmem:[%s7875_s17 + $0x368] sm:$0xff] }
 0xd8b   : > { %4612 = vmatpush1.bf16.msra.mxu1 %v6105_v14  ;;  %4572 = vmatprep.subr.bf16.mxu0 %v6096_v15  ;;  %v6167_v14 = vcombine.low %v3912_v3, %v3916_v5  ;;  %v6169_v15 = vcombine.low %v3913_v6, %v3917_v8  ;;  %v6162_v23 = vcombine.high %v3905_v12, %v3909_v13 }
 0xd8c   : > { %4613 = vmatprep.subr.bf16.mxu1 %v6098_v17  ;;  %v6160_v17 = vcombine.high %v3904_v19, %v3908_v11 }
 0xd8e   : > { %4573 = vmatpush1.bf16.msra.mxu0 %v6095_v26  ;;  %v3901_v26 = vld [vmem:[%s7875_s17 + $0x328] sm:$0xff] }
 0xd8f   : > { %4614 = vmatpush1.bf16.msra.mxu1 %v6097_v27  ;;  %4574 = vmatprep.subr.bf16.mxu0 %v6088_v18  ;;  %v6159_v27 = vcombine.low %v3904_v19, %v3908_v11  ;;  %v6161_v18 = vcombine.low %v3905_v12, %v3909_v13  ;;  %v6154_v29 = vcombine.high %v3897_v25, %v3901_v26  ;;  %v2924_v13 = vsub.s32 0, %v7999_v16 }
 0xd90   : > { %4615 = vmatprep.subr.bf16.mxu1 %v6090_v20  ;;  %v6152_v20 = vcombine.high %v3896_v7, %v3900_v24 }
 0xd92   : > { %4575 = vmatpush1.bf16.msra.mxu0 %v6087_v32  ;;  %v3893_v32 = vld [vmem:[%s7875_s17 + $0x2e8] sm:$0xff] }
 0xd93   : > { %4616 = vmatpush1.bf16.msra.mxu1 %v6089_v33  ;;  %4576 = vmatprep.subr.bf16.mxu0 %v6080_v34  ;;  %v6151_v33 = vcombine.low %v3896_v7, %v3900_v24  ;;  %v6153_v34 = vcombine.low %v3897_v25, %v3901_v26  ;;  %v6146_v36 = vcombine.high %v3889_v28, %v3893_v32 }
 0xd94   : > { %4617 = vmatprep.subr.bf16.mxu1 %v6082_v35  ;;  %v6144_v35 = vcombine.high %v3888_v30, %v3892_v31 }
 0xd96   : > { %4577 = vmatpush1.bf16.msra.mxu0 %v6079_v39  ;;  %v3885_v39 = vld [vmem:[%s7875_s17 + $0x2a8] sm:$0xff] }
 0xd97   : > { %4618 = vmatpush1.bf16.msra.mxu1 %v6081_v40  ;;  %4578 = vmatprep.subr.bf16.mxu0 %v6072_v41  ;;  %v6143_v40 = vcombine.low %v3888_v30, %v3892_v31  ;;  %v6145_v41 = vcombine.low %v3889_v28, %v3893_v32  ;;  %v6138_v43 = vcombine.high %v3881_v38, %v3885_v39 }
 0xd98   : > { %4619 = vmatprep.subr.bf16.mxu1 %v6074_v42  ;;  %v6136_v42 = vcombine.high %v3880_v21, %v3884_v22  ;;  %v6137_v45 = vcombine.low %v3881_v38, %v3885_v39  ;;  %v3850_v38 = vld [vmem:[%s7875_s17 + $0x190] sm:$0xff] }
 0xd99   : > { %v3854_v39 = vld [vmem:[%s7875_s17 + $0x1b0] sm:$0xff] }
 0xd9a   : > { %4579 = vmatpush1.bf16.msra.mxu0 %v6071_v47  ;;  %v3876_v47 = vld [vmem:[%s7875_s17 + $0x260] sm:$0xff] }
 0xd9b   : > { %4620 = vmatpush1.bf16.msra.mxu1 %v6073_v48  ;;  %4580 = vmatprep.subr.bf16.mxu0 %v6064_v49  ;;  %v3873_v48 = vld [vmem:[%s7875_s17 + $0x248] sm:$0xff]  ;;  %v6128_v49 = vcombine.high %v3872_v46, %v3876_v47  ;;  %v6127_v51 = vcombine.low %v3872_v46, %v3876_v47  ;;  %v3846_v47 = vld [vmem:[%s7875_s17 + $0x170] sm:$0xff] }
 0xd9c   : > { %4621 = vmatprep.subr.bf16.mxu1 %v6066_v50  ;;  %v3877_v50 = vld [vmem:[%s7875_s17 + $0x268] sm:$0xff] }
 0xd9d   : > { %v6129_v52 = vcombine.low %v3873_v48, %v3877_v50  ;;  %v6130_v53 = vcombine.high %v3873_v48, %v3877_v50  ;;  %v3843_v48 = vld [vmem:[%s7875_s17 + $0x158] sm:$0xff]  ;;  %v6107_v50 = vcombine.low %v3850_v38, %v3854_v39 }
 0xd9e   : > { %4581 = vmatpush1.bf16.msra.mxu0 %v6063_v55  ;;  %v3868_v55 = vld [vmem:[%s7875_s17 + $0x220] sm:$0xff] }
 0xd9f   : > { %4622 = vmatpush1.bf16.msra.mxu1 %v6065_v56  ;;  %4582 = vmatprep.subr.bf16.mxu0 %v6056_v57  ;;  %v3865_v56 = vld [vmem:[%s7875_s17 + $0x208] sm:$0xff]  ;;  %v6120_v57 = vcombine.high %v3864_v54, %v3868_v55  ;;  %v6119_v59 = vcombine.low %v3864_v54, %v3868_v55  ;;  %v3834_v54 = vld [vmem:[%s7875_s17 + $0x110] sm:$0xff] }
 0xda0   : > { %4623 = vmatprep.subr.bf16.mxu1 %v6058_v58  ;;  %v3869_v58 = vld [vmem:[%s7875_s17 + $0x228] sm:$0xff]  ;;  %v3838_v55 = vld [vmem:[%s7875_s17 + $0x130] sm:$0xff] }
 0xda1   : > { %v6121_v60 = vcombine.low %v3865_v56, %v3869_v58  ;;  %v6122_v61 = vcombine.high %v3865_v56, %v3869_v58  ;;  %v3835_v56 = vld [vmem:[%s7875_s17 + $0x118] sm:$0xff] }
 0xda2   : > { %4583 = vmatpush1.bf16.msra.mxu0 %v6055_v63  ;;  %v3862_v63 = vld [vmem:[%s7875_s17 + $0x1f0] sm:$0xff] }
 0xda3   : > { %4624 = vmatpush1.bf16.msra.mxu1 %v6057_v0  ;;  %4584 = vmatprep.subr.bf16.mxu0 %v6176_v1  ;;  %v3859_v0 = vld [vmem:[%s7875_s17 + $0x1d8] sm:$0xff]  ;;  %v6116_v1 = vcombine.high %v3858_v62, %v3862_v63  ;;  %v6115_v3 = vcombine.low %v3858_v62, %v3862_v63  ;;  %v3826_v62 = vld [vmem:[%s7875_s17 + $0xd0] sm:$0xff] }
 0xda4   : > { %4625 = vmatprep.subr.bf16.mxu1 %v6178_v2  ;;  %v3863_v2 = vld [vmem:[%s7875_s17 + $0x1f8] sm:$0xff]  ;;  %v3830_v63 = vld [vmem:[%s7875_s17 + $0xf0] sm:$0xff] }
 0xda5   : > { %v6117_v5 = vcombine.low %v3859_v0, %v3863_v2  ;;  %v6118_v6 = vcombine.high %v3859_v0, %v3863_v2  ;;  %v3827_v0 = vld [vmem:[%s7875_s17 + $0xd8] sm:$0xff]  ;;  %v6091_v2 = vcombine.low %v3834_v54, %v3838_v55 }
 0xda6   : > { %4585 = vmatpush2.bf16.msra.mxu0 %v6175_v4 }
 0xda7   : > { %4626 = vmatpush2.bf16.msra.mxu1 %v6177_v9  ;;  %4586 = vmatprep.subr.bf16.mxu0 %v6168_v10 }
 0xda8   : > { %4627 = vmatprep.subr.bf16.mxu1 %v6170_v37 }
 0xdaa   : > { %4587 = vmatpush2.bf16.msra.mxu0 %v6167_v14  ;;  %v2920_v14 = vld [vmem:[%s750_s22] sm:$0x3] }
 0xdab   : > { %4628 = vmatpush2.bf16.msra.mxu1 %v6169_v15  ;;  %4588 = vmatprep.subr.bf16.mxu0 %v6160_v17  ;;  %v2928_v15 = vsub.s32 1, %v7999_v16  ;;  %v2925_v17 = vrot.slane %v2920_v14, %v2924_v13 }
 0xdac   : > { %4629 = vmatprep.subr.bf16.mxu1 %v6162_v23 }
 0xdad   : > { %v2929_v23 = vrot.slane %v2920_v14, %v2928_v15  ;;  %v3810_v14 = vld [vmem:[%s7875_s17 + $0x50] sm:$0xff] }
 0xdae   : > { %4589 = vmatpush2.bf16.msra.mxu0 %v6159_v27 }
 0xdaf   : > { %4630 = vmatpush2.bf16.msra.mxu1 %v6161_v18  ;;  %4590 = vmatprep.subr.bf16.mxu0 %v6152_v20 }
 0xdb0   : > { %4631 = vmatprep.subr.bf16.mxu1 %v6154_v29 }
 0xdb2   : > { %4591 = vmatpush2.bf16.msra.mxu0 %v6151_v33 }
 0xdb3   : > { %4632 = vmatpush2.bf16.msra.mxu1 %v6153_v34  ;;  %4592 = vmatprep.subr.bf16.mxu0 %v6144_v35 }
 0xdb4   : > { %4633 = vmatprep.subr.bf16.mxu1 %v6146_v36 }
 0xdb6   : > { %4593 = vmatpush2.bf16.msra.mxu0 %v6143_v40  ;;  %v3851_v40 = vld [vmem:[%s7875_s17 + $0x198] sm:$0xff] }
 0xdb7   : > { %4634 = vmatpush2.bf16.msra.mxu1 %v6145_v41  ;;  %4594 = vmatprep.subr.bf16.mxu0 %v6136_v42  ;;  %v3855_v41 = vld [vmem:[%s7875_s17 + $0x1b8] sm:$0xff] }
 0xdb8   : > { %4635 = vmatprep.subr.bf16.mxu1 %v6138_v43  ;;  %v6110_v46 = vcombine.high %v3851_v40, %v3855_v41 }
 0xdba   : > { %4595 = vmatpush2.bf16.msra.mxu0 %v6135_v44  ;;  %v3842_v44 = vld [vmem:[%s7875_s17 + $0x150] sm:$0xff] }
 0xdbb   : > { %4636 = vmatpush2.bf16.msra.mxu1 %v6137_v45  ;;  %4596 = vmatprep.subr.bf16.mxu0 %v6128_v49  ;;  %v6108_v45 = vcombine.high %v3850_v38, %v3854_v39  ;;  %v3847_v49 = vld [vmem:[%s7875_s17 + $0x178] sm:$0xff]  ;;  %v6099_v58 = vcombine.low %v3842_v44, %v3846_v47 }
 0xdbc   : > { %4637 = vmatprep.subr.bf16.mxu1 %v6130_v53  ;;  %v6102_v53 = vcombine.high %v3843_v48, %v3847_v49 }
 0xdbe   : > { %4597 = vmatpush2.bf16.msra.mxu0 %v6127_v51  ;;  %v6109_v51 = vcombine.low %v3851_v40, %v3855_v41  ;;  %v3914_v41 = vld [vmem:[%s7875_s17 + $0x390] sm:$0xff] }
 0xdbf   : > { %4638 = vmatpush2.bf16.msra.mxu1 %v6129_v52  ;;  %4598 = vmatprep.subr.bf16.mxu0 %v6120_v57  ;;  %v6100_v52 = vcombine.high %v3842_v44, %v3846_v47  ;;  %v3839_v57 = vld [vmem:[%s7875_s17 + $0x138] sm:$0xff] }
 0xdc0   : > { %4639 = vmatprep.subr.bf16.mxu1 %v6122_v61  ;;  %v6094_v61 = vcombine.high %v3835_v56, %v3839_v57  ;;  %v3915_v44 = vld [vmem:[%s7875_s17 + $0x398] sm:$0xff] }
 0xdc2   : > { %4599 = vmatpush2.bf16.msra.mxu0 %v6119_v59  ;;  %v6101_v59 = vcombine.low %v3843_v48, %v3847_v49 }
 0xdc3   : > { %4640 = vmatpush2.bf16.msra.mxu1 %v6121_v60  ;;  %4650 = vmatprep.subr.bf16.mxu0 %v6116_v1  ;;  %v6092_v60 = vcombine.high %v3834_v54, %v3838_v55  ;;  %v3831_v1 = vld [vmem:[%s7875_s17 + $0xf8] sm:$0xff] }
 0xdc4   : > { %4691 = vmatprep.subr.bf16.mxu1 %v6118_v6  ;;  %v6086_v6 = vcombine.high %v3827_v0, %v3831_v1 }
 0xe05   : > { %v3664_v8 = vpop.f32.mrf.mxu0 }
 0xe06   : > { %v3705_v4 = vpop.f32.mrf.mxu1  ;;  %v3665_v7 = vadd.f32 %v3664_v8, %v2925_v17  ;;  %v3818_v8 = vld [vmem:[%s7875_s17 + $0x90] sm:$0xff] }
 0xe07   : > { %v3666_v9 = vpop.f32.mrf.mxu0  ;;  %v3814_v17 = vld [vmem:[%s7875_s17 + $0x70] sm:$0xff] }
 0xe08   : > { %v3707_v10 = vpop.f32.mrf.mxu1  ;;  %v3667_v24 = vadd.f32 %v3666_v9, %v2929_v23  ;;  %v3706_v25 = vadd.f32 %v3705_v4, %v3665_v7  ;;  %v3822_v4 = vld [vmem:[%s7875_s17 + $0xb0] sm:$0xff]  ;;  %v3819_v9 = vld [vmem:[%s7875_s17 + $0x98] sm:$0xff] }
 0xe09   : > { %v3668_v37 = vpop.f32.mrf.mxu0  ;;  %v3811_v23 = vld [vmem:[%s7875_s17 + $0x58] sm:$0xff] }
 0xe0a   : > { %v3709_v19 = vpop.f32.mrf.mxu1  ;;  %v3708_v18 = vadd.f32 %v3707_v10, %v3667_v24  ;;  %v3823_v10 = vld [vmem:[%s7875_s17 + $0xb8] sm:$0xff]  ;;  %v6083_v37 = vcombine.low %v3826_v62, %v3830_v63  ;;  %v6075_v24 = vcombine.low %v3818_v8, %v3822_v4 }
 0xe0b   : > { %v3669_v11 = vpop.f32.mrf.mxu0  ;;  %v6085_v19 = vcombine.low %v3827_v0, %v3831_v1  ;;  %v3815_v7 = vld [vmem:[%s7875_s17 + $0x78] sm:$0xff] }
 0xe0c   : > { %v3710_v12 = vpop.f32.mrf.mxu1  ;;  %v6076_v11 = vcombine.high %v3818_v8, %v3822_v4 }
 0xe0d   : > { %v6078_v12 = vcombine.high %v3819_v9, %v3823_v10 }
 0xe45   : > { %v3746_v26 = vpop.f32.mrf.mxu0 }
 0xe46   : > { %v3787_v27 = vpop.f32.mrf.mxu1  ;;  %v3747_v20 = vadd.f32 %v3746_v26, %v3706_v25  ;;  %v6077_v25 = vcombine.low %v3819_v9, %v3823_v10  ;;  %v6068_v26 = vcombine.high %v3810_v14, %v3814_v17 }
 0xe47   : > { %v3748_v29 = vpop.f32.mrf.mxu0 }
 0xe48   : > { %v3789_v30 = vpop.f32.mrf.mxu1  ;;  %v3788_v31 = vadd.f32 %v3787_v27, %v3747_v20  ;;  %v3749_v28 = vadd.f32 %v3748_v29, %v3708_v18  ;;  %v6070_v27 = vcombine.high %v3811_v23, %v3815_v7  ;;  %v3802_v18 = vld [vmem:[%s7875_s17 + $0x10] sm:$0xff]  ;;  %v3803_v29 = vld [vmem:[%s7875_s17 + $0x18] sm:$0xff] }
 0xe49   : > { %v3750_v32 = vpop.f32.mrf.mxu0  ;;  %v3806_v20 = vld [vmem:[%s7875_s17 + $0x30] sm:$0xff] }
 0xe4a   : > { %v3791_v33 = vpop.f32.mrf.mxu1  ;;  %v3790_v34 = vadd.f32 %v3789_v30, %v3749_v28  ;;  %v3794_v35 = vmax.f32 %v3788_v31, 0.0  ;;  %v3807_v30 = vld [vmem:[%s7875_s17 + $0x38] sm:$0xff]  ;;  %v6067_v31 = vcombine.low %v3810_v14, %v3814_v17  ;;  %v6069_v28 = vcombine.low %v3811_v23, %v3815_v7 }
 0xe4b   : > { %v3751_v36 = vpop.f32.mrf.mxu0  ;;  %v6060_v32 = vcombine.high %v3802_v18, %v3806_v20  ;;  %v6062_v33 = vcombine.high %v3803_v29, %v3807_v30  ;;  %v6061_v38 = vcombine.low %v3803_v29, %v3807_v30 }
 0xe4c   : > { %v3792_v21 = vpop.f32.mrf.mxu1  ;;  %v3795_v22 = vmax.f32 %v3790_v34, 0.0  ;;  %v8176_v43 = vpack.c.bf16 %v3794_v35, %v3794_v35  ;;  %v3922_v34 = vld [vmem:[%s7875_s17 + $0x3d0] sm:$0xff]  ;;  %v3923_v36 = vld [vmem:[%s7875_s17 + $0x3d8] sm:$0xff] }
 0xe4d   : > { %v3926_v35 = vld [vmem:[%s7875_s17 + $0x3f0] sm:$0xff]  ;;  %v3927_v21 = vld [vmem:[%s7875_s17 + $0x3f8] sm:$0xff] }
 0xe4e   : > { %v3799_v42 = vpack.c.bf16 %v3795_v22, %v3795_v22  ;;  %v6059_v22 = vcombine.low %v3802_v18, %v3806_v20  ;;  %v6180_v39 = vcombine.high %v3922_v34, %v3926_v35  ;;  %v6182_v40 = vcombine.high %v3923_v36, %v3927_v21 }
 0xe4f   : > { %v6181_v47 = vcombine.low %v3923_v36, %v3927_v21 }
 0xe50   : > { %4600 = vmatprep.mubr.bf16.mxu0 %v3799_v42  ;;  %4641 = vmatprep.mubr.bf16.mxu1 %v3799_v42 }
 0xe51   : > { %4601 = vmatmul.mubr.bf16.vlgmr.msra.gmra.mxu0 %v8176_v43  ;;  %4642 = vmatmul.mubr.bf16.vlgmr.msra.gmra.mxu1 %v8176_v43 }
 0xe52   : > { %4651 = vmatpush1.bf16.msra.mxu0 %v6115_v3  ;;  %4692 = vmatpush1.bf16.msra.mxu1 %v6117_v5  ;;  %v6093_v3 = vcombine.low %v3835_v56, %v3839_v57  ;;  %v6084_v5 = vcombine.high %v3826_v62, %v3830_v63 }
 0xe53   : > { %4682 = vmatprep.mubr.bf16.mxu0 %v3799_v42  ;;  %4723 = vmatprep.mubr.bf16.mxu1 %v3799_v42  ;;  %v3918_v42 = vld [vmem:[%s7875_s17 + $0x3b0] sm:$0xff] }
 0xe54   : > { %4652 = vmatprep.subr.bf16.mxu0 %v6108_v45  ;;  %4693 = vmatprep.subr.bf16.mxu1 %v6110_v46  ;;  %v3919_v45 = vld [vmem:[%s7875_s17 + $0x3b8] sm:$0xff]  ;;  %v6179_v46 = vcombine.low %v3922_v34, %v3926_v35  ;;  %v6172_v48 = vcombine.high %v3914_v41, %v3918_v42  ;;  %v6171_v54 = vcombine.low %v3914_v41, %v3918_v42 }
 0xe55   : > { %v6174_v49 = vcombine.high %v3915_v44, %v3919_v45  ;;  %v6173_v55 = vcombine.low %v3915_v44, %v3919_v45 }
 0xe56   : > { %4653 = vmatpush1.bf16.msra.mxu0 %v6107_v50  ;;  %4694 = vmatpush1.bf16.msra.mxu1 %v6109_v51  ;;  %v3906_v50 = vld [vmem:[%s7875_s17 + $0x350] sm:$0xff] }
 0xe57   : > { %4654 = vmatprep.subr.bf16.mxu0 %v6100_v52  ;;  %4695 = vmatprep.subr.bf16.mxu1 %v6102_v53  ;;  %v3910_v51 = vld [vmem:[%s7875_s17 + $0x370] sm:$0xff]  ;;  %v3907_v52 = vld [vmem:[%s7875_s17 + $0x358] sm:$0xff] }
 0xe58   : > { %v3911_v53 = vld [vmem:[%s7875_s17 + $0x378] sm:$0xff]  ;;  %v6164_v56 = vcombine.high %v3906_v50, %v3910_v51  ;;  %v6163_v62 = vcombine.low %v3906_v50, %v3910_v51 }
 0xe59   : > { %v6166_v57 = vcombine.high %v3907_v52, %v3911_v53  ;;  %v6165_v63 = vcombine.low %v3907_v52, %v3911_v53 }
 0xe5a   : > { %4655 = vmatpush1.bf16.msra.mxu0 %v6099_v58  ;;  %4696 = vmatpush1.bf16.msra.mxu1 %v6101_v59  ;;  %v3898_v58 = vld [vmem:[%s7875_s17 + $0x310] sm:$0xff] }
 0xe5b   : > { %4656 = vmatprep.subr.bf16.mxu0 %v6092_v60  ;;  %4697 = vmatprep.subr.bf16.mxu1 %v6094_v61  ;;  %v3902_v59 = vld [vmem:[%s7875_s17 + $0x330] sm:$0xff]  ;;  %v3899_v60 = vld [vmem:[%s7875_s17 + $0x318] sm:$0xff] }
 0xe5c   : > { %v3903_v61 = vld [vmem:[%s7875_s17 + $0x338] sm:$0xff]  ;;  %v6156_v0 = vcombine.high %v3898_v58, %v3902_v59  ;;  %v6155_v8 = vcombine.low %v3898_v58, %v3902_v59 }
 0xe5d   : > { %v6158_v1 = vcombine.high %v3899_v60, %v3903_v61  ;;  %v6157_v4 = vcombine.low %v3899_v60, %v3903_v61 }
 0xe5e   : > { %4657 = vmatpush1.bf16.msra.mxu0 %v6091_v2  ;;  %4698 = vmatpush1.bf16.msra.mxu1 %v6093_v3  ;;  %v3890_v2 = vld [vmem:[%s7875_s17 + $0x2d0] sm:$0xff] }
 0xe5f   : > { %4658 = vmatprep.subr.bf16.mxu0 %v6084_v5  ;;  %4699 = vmatprep.subr.bf16.mxu1 %v6086_v6  ;;  %v3894_v3 = vld [vmem:[%s7875_s17 + $0x2f0] sm:$0xff]  ;;  %v3891_v5 = vld [vmem:[%s7875_s17 + $0x2d8] sm:$0xff] }
 0xe60   : > { %v3895_v6 = vld [vmem:[%s7875_s17 + $0x2f8] sm:$0xff]  ;;  %v6148_v9 = vcombine.high %v3890_v2, %v3894_v3  ;;  %v6147_v14 = vcombine.low %v3890_v2, %v3894_v3 }
 0xe61   : > { %v6150_v10 = vcombine.high %v3891_v5, %v3895_v6  ;;  %v6149_v17 = vcombine.low %v3891_v5, %v3895_v6  ;;  %v3797_v5 = vld [vmem:[#allocation3 + $0x8] sm:$0xff] }
 0xe62   : > { %4659 = vmatpush1.bf16.msra.mxu0 %v6083_v37  ;;  %4700 = vmatpush1.bf16.msra.mxu1 %v6085_v19  ;;  %v3882_v37 = vld [vmem:[%s7875_s17 + $0x290] sm:$0xff] }
 0xe63   : > { %4660 = vmatprep.subr.bf16.mxu0 %v6076_v11  ;;  %4701 = vmatprep.subr.bf16.mxu1 %v6078_v12  ;;  %v3886_v19 = vld [vmem:[%s7875_s17 + $0x2b0] sm:$0xff]  ;;  %v3883_v11 = vld [vmem:[%s7875_s17 + $0x298] sm:$0xff] }
 0xe64   : > { %v3887_v12 = vld [vmem:[%s7875_s17 + $0x2b8] sm:$0xff]  ;;  %v6140_v23 = vcombine.high %v3882_v37, %v3886_v19  ;;  %v6139_v18 = vcombine.low %v3882_v37, %v3886_v19 }
 0xe65   : > { %v6142_v7 = vcombine.high %v3883_v11, %v3887_v12  ;;  %v6141_v20 = vcombine.low %v3883_v11, %v3887_v12 }
 0xe66   : > { %4661 = vmatpush1.bf16.msra.mxu0 %v6075_v24  ;;  %4702 = vmatpush1.bf16.msra.mxu1 %v6077_v25  ;;  %v3874_v24 = vld [vmem:[%s7875_s17 + $0x250] sm:$0xff] }
 0xe67   : > { %4662 = vmatprep.subr.bf16.mxu0 %v6068_v26  ;;  %4703 = vmatprep.subr.bf16.mxu1 %v6070_v27  ;;  %v3878_v25 = vld [vmem:[%s7875_s17 + $0x270] sm:$0xff]  ;;  %v3875_v26 = vld [vmem:[%s7875_s17 + $0x258] sm:$0xff] }
 0xe68   : > { %v3879_v27 = vld [vmem:[%s7875_s17 + $0x278] sm:$0xff]  ;;  %v6132_v29 = vcombine.high %v3874_v24, %v3878_v25  ;;  %v6131_v34 = vcombine.low %v3874_v24, %v3878_v25 }
 0xe69   : > { %v6134_v30 = vcombine.high %v3875_v26, %v3879_v27  ;;  %v6133_v35 = vcombine.low %v3875_v26, %v3879_v27 }
 0xe6a   : > { %4663 = vmatpush1.bf16.msra.mxu0 %v6067_v31  ;;  %4704 = vmatpush1.bf16.msra.mxu1 %v6069_v28  ;;  %v3866_v31 = vld [vmem:[%s7875_s17 + $0x210] sm:$0xff] }
 0xe6b   : > { %4664 = vmatprep.subr.bf16.mxu0 %v6060_v32  ;;  %4705 = vmatprep.subr.bf16.mxu1 %v6062_v33  ;;  %v3870_v28 = vld [vmem:[%s7875_s17 + $0x230] sm:$0xff]  ;;  %v3867_v32 = vld [vmem:[%s7875_s17 + $0x218] sm:$0xff] }
 0xe6c   : > { %v3871_v33 = vld [vmem:[%s7875_s17 + $0x238] sm:$0xff]  ;;  %v6124_v36 = vcombine.high %v3866_v31, %v3870_v28 }
 0xe6d   : > { %v6126_v21 = vcombine.high %v3867_v32, %v3871_v33 }
 0xe6e   : > { %4665 = vmatpush1.bf16.msra.mxu0 %v6059_v22  ;;  %4706 = vmatpush1.bf16.msra.mxu1 %v6061_v38  ;;  %v6123_v22 = vcombine.low %v3866_v31, %v3870_v28  ;;  %v6125_v38 = vcombine.low %v3867_v32, %v3871_v33 }
 0xe6f   : > { %4666 = vmatprep.subr.bf16.mxu0 %v6180_v39  ;;  %4707 = vmatprep.subr.bf16.mxu1 %v6182_v40  ;;  %v7458_v39 = vmov 1983009808  }
 0xe70   : > { %v4743_v40 = vunpack.c.l.s4 %v7458_v39 }
 0xe72   : > { %4667 = vmatpush2.bf16.msra.mxu0 %v6179_v46  ;;  %4708 = vmatpush2.bf16.msra.mxu1 %v6181_v47  ;;  %v4744_v41 = vunpack.c.0.s8 %v4743_v40 }
 0xe73   : > { %4668 = vmatprep.subr.bf16.mxu0 %v6172_v48  ;;  %4709 = vmatprep.subr.bf16.mxu1 %v6174_v49 }
 0xe74   : > { %v8239_v45 = vsub.s32 %v4744_v41, %v7999_v16 }
 0xe76   : > { %4669 = vmatpush2.bf16.msra.mxu0 %v6171_v54  ;;  %4710 = vmatpush2.bf16.msra.mxu1 %v6173_v55  ;;  %v3796_v54 = vld [vmem:[#allocation3] sm:$0xff] }
 0xe77   : > { %4670 = vmatprep.subr.bf16.mxu0 %v6164_v56  ;;  %4711 = vmatprep.subr.bf16.mxu1 %v6166_v57 }
 0xe7a   : > { %4671 = vmatpush2.bf16.msra.mxu0 %v6163_v62  ;;  %4712 = vmatpush2.bf16.msra.mxu1 %v6165_v63 }
 0xe7b   : > { %4672 = vmatprep.subr.bf16.mxu0 %v6156_v0  ;;  %4713 = vmatprep.subr.bf16.mxu1 %v6158_v1 }
 0xe7e   : > { %4673 = vmatpush2.bf16.msra.mxu0 %v6155_v8  ;;  %4714 = vmatpush2.bf16.msra.mxu1 %v6157_v4 }
 0xe7f   : > { %4674 = vmatprep.subr.bf16.mxu0 %v6148_v9  ;;  %4715 = vmatprep.subr.bf16.mxu1 %v6150_v10 }
 0xe82   : > { %4675 = vmatpush2.bf16.msra.mxu0 %v6147_v14  ;;  %4716 = vmatpush2.bf16.msra.mxu1 %v6149_v17 }
 0xe83   : > { %4676 = vmatprep.subr.bf16.mxu0 %v6140_v23  ;;  %4717 = vmatprep.subr.bf16.mxu1 %v6142_v7 }
 0xe86   : > { %4677 = vmatpush2.bf16.msra.mxu0 %v6139_v18  ;;  %4718 = vmatpush2.bf16.msra.mxu1 %v6141_v20 }
 0xe87   : > { %4678 = vmatprep.subr.bf16.mxu0 %v6132_v29  ;;  %4719 = vmatprep.subr.bf16.mxu1 %v6134_v30 }
 0xe8a   : > { %4679 = vmatpush2.bf16.msra.mxu0 %v6131_v34  ;;  %4720 = vmatpush2.bf16.msra.mxu1 %v6133_v35 }
 0xe8b   : > { %4680 = vmatprep.subr.bf16.mxu0 %v6124_v36  ;;  %4721 = vmatprep.subr.bf16.mxu1 %v6126_v21 }
 0xe8e   : > { %4681 = vmatpush2.bf16.msra.mxu0 %v6123_v22  ;;  %4722 = vmatpush2.bf16.msra.mxu1 %v6125_v38 }
 0xe91   : > { %4683 = vmatmul.mubr.bf16.vlgmr.msra.gmra.mxu0 %v8176_v43  ;;  %4724 = vmatmul.mubr.bf16.vlgmr.msra.gmra.mxu1 %v8176_v43 }
 0xf11   : > { %v4602_v42 = vpop.f32.mrf.mxu0  ;;  %v4643_v44 = vpop.f32.mrf.mxu1 }
 0xf13   : > { %v4604_v46 = vpop.f32.mrf.mxu0  ;;  %v4645_v47 = vpop.f32.mrf.mxu1 }
 0xf14   : > { %v4740_v48 = vcombine.low %v4602_v42, %v4604_v46  ;;  %v4741_v49 = vcombine.low %v4643_v44, %v4645_v47 }
 0xf15   : > { %v4606_v50 = vpop.f32.mrf.mxu0  ;;  %v4647_v51 = vpop.f32.mrf.mxu1 }
 0xf16   : > { %v4748_v52 = vrot.slane %v4740_v48, %v8239_v45  ;;  %v4755_v53 = vrot.slane %v4741_v49, %v8239_v45 }
 0xf17   : > { %v4607_v43 = vpop.f32.mrf.mxu0  ;;  %v4648_v55 = vpop.f32.mrf.mxu1 }
 0xf18   : > { %v4756_v56 = vcombine.low %v4748_v52, %v4755_v53 }
 0xf1a   : > { %v4776_v57 = vadd.f32 %v4756_v56, %v3796_v54 }
 0xf1c   : > { %4778 = vst [vmem:[#allocation3] sm:$0xff] %v4776_v57 }
 0xf51   : > { %v4684_v58 = vpop.f32.mrf.mxu0  ;;  %v4725_v59 = vpop.f32.mrf.mxu1 }
 0xf53   : > { %v4686_v60 = vpop.f32.mrf.mxu0  ;;  %v4727_v61 = vpop.f32.mrf.mxu1 }
 0xf54   : > { %v4757_v62 = vcombine.low %v4684_v58, %v4686_v60  ;;  %v4758_v63 = vcombine.low %v4725_v59, %v4727_v61 }
 0xf55   : > { %v4688_v0 = vpop.f32.mrf.mxu0  ;;  %v4729_v1 = vpop.f32.mrf.mxu1 }
 0xf56   : > { %v4765_v2 = vrot.slane %v4757_v62, %v8239_v45  ;;  %v4772_v3 = vrot.slane %v4758_v63, %v8239_v45 }
 0xf57   : > { %v4689_v6 = vpop.f32.mrf.mxu0  ;;  %v4730_v8 = vpop.f32.mrf.mxu1 }
 0xf58   : > { %v4773_v4 = vcombine.low %v4765_v2, %v4772_v3  ;;  %4783 = sbr.rel (%p6183_p2) target bundleno = 4201 (0x1069), region = 160 }
 0xf5a   : > { %v4777_v9 = vadd.f32 %v4773_v4, %v3797_v5 }
 0xf5c   : > { %4779 = vst [vmem:[#allocation3 + $0x8] sm:$0xff] %v4777_v9 }
 0xf5d   : > { %v6904_v10 = vld [vmem:[%s8567_s16 + $0x78] sm:$0xff]   ;;  %v6908_v12 = vld [vmem:[%s8567_s16 + $0x70] sm:$0xff]   ;;  %v6912_v7 = vld [vmem:[%s8567_s16 + $0x68] sm:$0xff]   ;;  %v4798_v41 = vsub.s32 2, %v7999_v16  ;;  %v4802_v44 = vsub.s32 3, %v7999_v16  ;;  %v4806_v60 = vsub.s32 4, %v7999_v16 }
 0xf5e   : > { %v6905_v37 = vld [vmem:[%s8567_s16 + $0xf8] sm:$0xff]   ;;  %6320 = vmatprep.subr.bf16.mxu0 %v6904_v10  ;;  %v6909_v14 = vld [vmem:[%s8567_s16 + $0xf0] sm:$0xff]   ;;  %v6913_v24 = vld [vmem:[%s8567_s16 + $0xe8] sm:$0xff]   ;;  %v4810_v61 = vsub.s32 5, %v7999_v16  ;;  %v4814_v0 = vsub.s32 6, %v7999_v16  ;;  %v4818_v1 = vsub.s32 7, %v7999_v16 }
 0xf5f   : > { %v6906_v19 = vld [vmem:[%s8567_s16 + $0x38] sm:$0xff]   ;;  %6342 = vmatprep.subr.bf16.mxu1 %v6905_v37  ;;  %v6910_v17 = vld [vmem:[%s8567_s16 + $0x30] sm:$0xff]   ;;  %v6914_v25 = vld [vmem:[%s8567_s16 + $0x28] sm:$0xff]   ;;  %vm5591_vm6 = vcmask 1024  }
 0xf60   : > { %v6907_v11 = vld [vmem:[%s8567_s16 + $0xb8] sm:$0xff]   ;;  %6321 = vmatpush3.bf16.msra.mxu0 %v6906_v19  ;;  %v6911_v23 = vld [vmem:[%s8567_s16 + $0xb0] sm:$0xff]   ;;  %v6915_v26 = vld [vmem:[%s8567_s16 + $0xa8] sm:$0xff]  }
 0xf61   : > { %6343 = vmatpush3.bf16.msra.mxu1 %v6907_v11  ;;  %6322 = vmatprep.subr.bf16.mxu0 %v6908_v12  ;;  %v6916_v27 = vld [vmem:[%s8567_s16 + $0x60] sm:$0xff]   ;;  %v6920_v30 = vld [vmem:[%s8567_s16 + $0x58] sm:$0xff]   ;;  %v6924_v33 = vld [vmem:[%s8567_s16 + $0x50] sm:$0xff]  }
 0xf62   : > { %6344 = vmatprep.subr.bf16.mxu1 %v6909_v14  ;;  %v6917_v18 = vld [vmem:[%s8567_s16 + $0xe0] sm:$0xff]   ;;  %v6921_v31 = vld [vmem:[%s8567_s16 + $0xd8] sm:$0xff]   ;;  %v6925_v34 = vld [vmem:[%s8567_s16 + $0xd0] sm:$0xff]  }
 0xf63   : > { %v6918_v20 = vld [vmem:[%s8567_s16 + $0x20] sm:$0xff]   ;;  %v6922_v28 = vld [vmem:[%s8567_s16 + $0x18] sm:$0xff]   ;;  %v6926_v35 = vld [vmem:[%s8567_s16 + $0x10] sm:$0xff]  }
 0xf64   : > { %6323 = vmatpush3.bf16.msra.mxu0 %v6910_v17  ;;  %v6919_v29 = vld [vmem:[%s8567_s16 + $0xa0] sm:$0xff]   ;;  %v6923_v32 = vld [vmem:[%s8567_s16 + $0x98] sm:$0xff]   ;;  %v6927_v36 = vld [vmem:[%s8567_s16 + $0x90] sm:$0xff]  }
 0xf65   : > { %6345 = vmatpush3.bf16.msra.mxu1 %v6911_v23  ;;  %6324 = vmatprep.subr.bf16.mxu0 %v6912_v7  ;;  %v6928_v21 = vld [vmem:[%s8567_s16 + $0x48] sm:$0xff]   ;;  %v6932_v40 = vld [vmem:[%s8567_s16 + $0x40] sm:$0xff]   ;;  %v6936_v53 = vld [vmem:[%s8567_s16 + $0x178] sm:$0xff]  }
 0xf66   : > { %6346 = vmatprep.subr.bf16.mxu1 %v6913_v24  ;;  %v6929_v22 = vld [vmem:[%s8567_s16 + $0xc8] sm:$0xff]   ;;  %v6933_v42 = vld [vmem:[%s8567_s16 + $0xc0] sm:$0xff]   ;;  %v6937_v54 = vld [vmem:[%s8567_s16 + $0x1f8] sm:$0xff]  }
 0xf67   : > { %v6930_v38 = vld [vmem:[%s8567_s16 + $0x8] sm:$0xff]   ;;  %v6934_v46 = vld [vmem:[%s8567_s16] sm:$0xff]   ;;  %v6938_v10 = vld [vmem:[%s8567_s16 + $0x138] sm:$0xff]  }
 0xf68   : > { %6325 = vmatpush3.bf16.msra.mxu0 %v6914_v25  ;;  %v6931_v39 = vld [vmem:[%s8567_s16 + $0x88] sm:$0xff]   ;;  %v6935_v47 = vld [vmem:[%s8567_s16 + $0x80] sm:$0xff]   ;;  %v6940_v12 = vld [vmem:[%s8567_s16 + $0x170] sm:$0xff]  }
 0xf69   : > { %6347 = vmatpush3.bf16.msra.mxu1 %v6915_v26  ;;  %6326 = vmatprep.subr.bf16.mxu0 %v6916_v27  ;;  %v4786_v48 = vld [vmem:[#allocation27] sm:$0xff]  ;;  %v6939_v14 = vld [vmem:[%s8567_s16 + $0x1b8] sm:$0xff]   ;;  %v6941_v17 = vld [vmem:[%s8567_s16 + $0x1f0] sm:$0xff]  }
 0xf6a   : > { %6348 = vmatprep.subr.bf16.mxu1 %v6917_v18  ;;  %v4791_v49 = vrot.slane %v4786_v48, %v2924_v13  ;;  %v4795_v50 = vrot.slane %v4786_v48, %v2928_v15  ;;  %v4799_v51 = vrot.slane %v4786_v48, %v4798_v41  ;;  %v4803_v52 = vrot.slane %v4786_v48, %v4802_v44  ;;  %v4784_v57 = vld [vmem:[#allocation3] sm:$0xff]  ;;  %v6942_v23 = vld [vmem:[%s8567_s16 + $0x130] sm:$0xff]  }
 0xf6b   : > { %v4807_v6 = vrot.slane %v4786_v48, %v4806_v60  ;;  %v4811_v8 = vrot.slane %v4786_v48, %v4810_v61  ;;  %v4815_v37 = vrot.slane %v4786_v48, %v4814_v0  ;;  %v4819_v19 = vrot.slane %v4786_v48, %v4818_v1  ;;  %v6944_v25 = vld [vmem:[%s8567_s16 + $0x168] sm:$0xff]   ;;  %v6943_v26 = vld [vmem:[%s8567_s16 + $0x1b0] sm:$0xff]  }
 0xf6c   : > { %6327 = vmatpush3.bf16.msra.mxu0 %v6918_v20  ;;  %v4820_v43 = vcombine.low %v4791_v49, %v4795_v50  ;;  %v4821_v55 = vcombine.low %v4799_v51, %v4803_v52  ;;  %v6945_v27 = vld [vmem:[%s8567_s16 + $0x1e8] sm:$0xff]   ;;  %v6958_v44 = vld [vmem:[%s8567_s16 + $0x110] sm:$0xff]  }
 0xf6d   : > { %6349 = vmatpush3.bf16.msra.mxu1 %v6919_v29  ;;  %6328 = vmatprep.subr.bf16.mxu0 %v6920_v30  ;;  %v4837_v7 = vcombine.low %v4807_v6, %v4811_v8  ;;  %v4838_v24 = vcombine.low %v4815_v37, %v4819_v19  ;;  %v6946_v18 = vld [vmem:[%s8567_s16 + $0x128] sm:$0xff]   ;;  %v6948_v30 = vld [vmem:[%s8567_s16 + $0x160] sm:$0xff]   ;;  %v6959_v49 = vld [vmem:[%s8567_s16 + $0x190] sm:$0xff]  }
 0xf6e   : > { %6350 = vmatprep.subr.bf16.mxu1 %v6921_v31  ;;  %v4828_v56 = vrot.slane %v4820_v43, %v8239_v45  ;;  %v4835_v13 = vrot.slane %v4821_v55, %v8239_v45  ;;  %v6947_v31 = vld [vmem:[%s8567_s16 + $0x1a8] sm:$0xff]   ;;  %v6964_v55 = vld [vmem:[%s8567_s16 + $0x140] sm:$0xff]   ;;  %v6184_v6 = vld [vmem:[#allocation4] ss:$0 sm:$0xff] }
 0xf6f   : > { %v4845_v20 = vrot.slane %v4837_v7, %v8239_v45  ;;  %v4852_v29 = vrot.slane %v4838_v24, %v8239_v45  ;;  %v6960_v48 = vld [vmem:[%s8567_s16 + $0x148] sm:$0xff]  }
 0xf70   : > { %6329 = vmatpush3.bf16.msra.mxu0 %v6922_v28  ;;  %v4836_v15 = vcombine.low %v4828_v56, %v4835_v13  ;;  %v6949_v28 = vld [vmem:[%s8567_s16 + $0x1e0] sm:$0xff]   ;;  %v6961_v52 = vld [vmem:[%s8567_s16 + $0x1c8] sm:$0xff]  }
 0xf71   : > { %6351 = vmatpush3.bf16.msra.mxu1 %v6923_v32  ;;  %6330 = vmatprep.subr.bf16.mxu0 %v6924_v33  ;;  %v6950_v32 = vld [vmem:[%s8567_s16 + $0x120] sm:$0xff]   ;;  %v4853_v33 = vcombine.low %v4845_v20, %v4852_v29 }
 0xf72   : > { %6352 = vmatprep.subr.bf16.mxu1 %v6925_v34  ;;  %v4856_v58 = vadd.f32 %v4836_v15, %v4784_v57  ;;  %v6952_v34 = vld [vmem:[%s8567_s16 + $0x158] sm:$0xff]   ;;  %v6965_v13 = vld [vmem:[%s8567_s16 + $0x1c0] sm:$0xff]  }
 0xf73   : > { %v6966_v57 = vld [vmem:[%s8567_s16 + $0x100] sm:$0xff]  }
 0xf74   : > { %6331 = vmatpush3.bf16.msra.mxu0 %v6926_v35  ;;  %v4858_v59 = vmax.f32 %v4856_v58, 0.0  ;;  %v6951_v35 = vld [vmem:[%s8567_s16 + $0x1a0] sm:$0xff]  }
 0xf75   : > { %6353 = vmatpush3.bf16.msra.mxu1 %v6927_v36  ;;  %6332 = vmatprep.subr.bf16.mxu0 %v6928_v21  ;;  %v6953_v36 = vld [vmem:[%s8567_s16 + $0x1d8] sm:$0xff]   ;;  %v4785_v21 = vld [vmem:[#allocation3 + $0x8] sm:$0xff]  ;;  %v6967_v15 = vld [vmem:[%s8567_s16 + $0x180] sm:$0xff]  }
 0xf76   : > { %6354 = vmatprep.subr.bf16.mxu1 %v6929_v22  ;;  %v4869_v62 = vrot.slane %v4858_v59, %v8239_v45  ;;  %v4862_v63 = vcombine.high %v4858_v59, %v4858_v59  ;;  %v6954_v22 = vld [vmem:[%s8567_s16 + $0x118] sm:$0xff]  }
 0xf78   : > { %6333 = vmatpush3.bf16.msra.mxu0 %v6930_v38  ;;  %v4877_v2 = vcombine.high %v4869_v62, %v4869_v62  ;;  %v4876_v3 = vrot.slane %v4862_v63, %v8239_v45  ;;  %v4904_v5 = vpack.c.bf16 %v4869_v62, %v4869_v62  ;;  %v4857_v38 = vadd.f32 %v4853_v33, %v4785_v21 }
 0xf79   : > { %6355 = vmatpush3.bf16.msra.mxu1 %v6931_v39  ;;  %6334 = vmatprep.subr.bf16.mxu0 %v6932_v40  ;;  %v6956_v39 = vld [vmem:[%s8567_s16 + $0x150] sm:$0xff]   ;;  %v6955_v40 = vld [vmem:[%s8567_s16 + $0x198] sm:$0xff]  }
 0xf7a   : > { %6356 = vmatprep.subr.bf16.mxu1 %v6933_v42  ;;  %v4905_v4 = vpack.c.bf16 %v4877_v2, %v4877_v2  ;;  %v4878_v9 = vcombine.high %v4876_v3, %v4876_v3  ;;  %v4906_v11 = vpack.c.bf16 %v4876_v3, %v4876_v3  ;;  %v4859_v41 = vmax.f32 %v4857_v38, 0.0  ;;  %v6957_v42 = vld [vmem:[%s8567_s16 + $0x1d0] sm:$0xff]  }
 0xf7c   : > { %6335 = vmatpush3.bf16.msra.mxu0 %v6934_v46  ;;  %5463 = vmatprep.mubr.bf16.mxu0 %v4905_v4  ;;  %v4907_v16 = vpack.c.bf16 %v4878_v9, %v4878_v9  ;;  %v4886_v46 = vrot.slane %v4859_v41, %v8239_v45 }
 0xf7d   : > { %6357 = vmatpush3.bf16.msra.mxu1 %v6935_v47  ;;  %6364 = vmatprep.subr.bf16.mxu0 %v6936_v53  ;;  %v4879_v47 = vcombine.high %v4859_v41, %v4859_v41  ;;  %v6962_v53 = vld [vmem:[%s8567_s16 + $0x108] sm:$0xff]  }
 0xf7e   : > { %6386 = vmatprep.subr.bf16.mxu1 %v6937_v54  ;;  %5503 = vmatprep.mubr.bf16.mxu1 %v4907_v16  ;;  %v4894_v50 = vcombine.high %v4886_v46, %v4886_v46  ;;  %v4908_v58 = vpack.c.bf16 %v4886_v46, %v4886_v46 }
 0xf7f   : > { %5464 = vmatmul.mubr.bf16.vlgmr.msra.gmra.mxu0 %v4904_v5  ;;  %v4893_v51 = vrot.slane %v4879_v47, %v8239_v45  ;;  %v6963_v45 = vld [vmem:[%s8567_s16 + $0x188] sm:$0xff]  }
 0xf80   : > { %6365 = vmatpush3.bf16.msra.mxu0 %v6938_v10  ;;  %5504 = vmatmul.mubr.bf16.vlgmr.msra.gmra.mxu1 %v4906_v11  ;;  %v4909_v54 = vpack.c.bf16 %v4894_v50, %v4894_v50 }
 0xf81   : > { %6366 = vmatprep.subr.bf16.mxu0 %v6940_v12  ;;  %6387 = vmatpush3.bf16.msra.mxu1 %v6939_v14  ;;  %v4895_v43 = vcombine.high %v4893_v51, %v4893_v51  ;;  %v4910_v59 = vpack.c.bf16 %v4893_v51, %v4893_v51 }
 0xf82   : > { %6388 = vmatprep.subr.bf16.mxu1 %v6941_v17  ;;  %5543 = vmatprep.mubr.bf16.mxu0 %v4909_v54 }
 0xf83   : > { %v4911_v56 = vpack.c.bf16 %v4895_v43, %v4895_v43 }
 0xf84   : > { %6367 = vmatpush3.bf16.msra.mxu0 %v6942_v23 }
 0xf85   : > { %6368 = vmatprep.subr.bf16.mxu0 %v6944_v25  ;;  %6389 = vmatpush3.bf16.msra.mxu1 %v6943_v26 }
 0xf86   : > { %6390 = vmatprep.subr.bf16.mxu1 %v6945_v27  ;;  %5583 = vmatprep.mubr.bf16.mxu1 %v4911_v56 }
 0xf88   : > { %6369 = vmatpush3.bf16.msra.mxu0 %v6946_v18 }
 0xf89   : > { %6370 = vmatprep.subr.bf16.mxu0 %v6948_v30  ;;  %6391 = vmatpush3.bf16.msra.mxu1 %v6947_v31 }
 0xf8a   : > { %6392 = vmatprep.subr.bf16.mxu1 %v6949_v28 }
 0xf8c   : > { %6371 = vmatpush3.bf16.msra.mxu0 %v6950_v32 }
 0xf8d   : > { %6372 = vmatprep.subr.bf16.mxu0 %v6952_v34  ;;  %6393 = vmatpush3.bf16.msra.mxu1 %v6951_v35 }
 0xf8e   : > { %6394 = vmatprep.subr.bf16.mxu1 %v6953_v36 }
 0xf90   : > { %6373 = vmatpush3.bf16.msra.mxu0 %v6954_v22 }
 0xf91   : > { %6374 = vmatprep.subr.bf16.mxu0 %v6956_v39  ;;  %6395 = vmatpush3.bf16.msra.mxu1 %v6955_v40 }
 0xf92   : > { %6396 = vmatprep.subr.bf16.mxu1 %v6957_v42 }
 0xf94   : > { %6375 = vmatpush3.bf16.msra.mxu0 %v6958_v44 }
 0xf95   : > { %6376 = vmatprep.subr.bf16.mxu0 %v6960_v48  ;;  %6397 = vmatpush3.bf16.msra.mxu1 %v6959_v49 }
 0xf96   : > { %6398 = vmatprep.subr.bf16.mxu1 %v6961_v52 }
 0xf98   : > { %6377 = vmatpush3.bf16.msra.mxu0 %v6962_v53 }
 0xf99   : > { %6378 = vmatprep.subr.bf16.mxu0 %v6964_v55  ;;  %6399 = vmatpush3.bf16.msra.mxu1 %v6963_v45 }
 0xf9a   : > { %6400 = vmatprep.subr.bf16.mxu1 %v6965_v13 }
 0xf9c   : > { %6379 = vmatpush3.bf16.msra.mxu0 %v6966_v57 }
 0xf9d   : > { %6401 = vmatpush3.bf16.msra.mxu1 %v6967_v15 }
 0xf9f   : > { %5544 = vmatmul.mubr.bf16.vlgmr.msra.gmra.mxu0 %v4908_v58 }
 0xfa0   : > { %5584 = vmatmul.mubr.bf16.vlgmr.msra.gmra.mxu1 %v4910_v59 }
0x103f   : > { %v6336_v60 = vpop.f32.mrf.mxu0 }
0x1040   : > { %v6358_v61 = vpop.f32.mrf.mxu1 }
0x1041   : > { %v6337_v62 = vpop.f32.mrf.mxu0 }
0x1042   : > { %v6359_v63 = vpop.f32.mrf.mxu1  ;;  %v6338_v5 = vadd.f32 %v6337_v62, %v6336_v60 }
0x1043   : > { %v6339_v0 = vpop.f32.mrf.mxu0  ;;  %v6360_v4 = vadd.f32 %v6359_v63, %v6358_v61 }
0x1044   : > { %v6361_v1 = vpop.f32.mrf.mxu1  ;;  %v5466_v8 = vadd.f32 %v6338_v5, %v6184_v6 }
0x1045   : > { %v6340_v2 = vpop.f32.mrf.mxu0 }
0x1046   : > { %v6362_v3 = vpop.f32.mrf.mxu1  ;;  %v5506_v19 = vadd.f32 %v6360_v4, %v5466_v8 }
0x105f   : > { %v6380_v9 = vpop.f32.mrf.mxu0 }
0x1060   : > { %v6402_v10 = vpop.f32.mrf.mxu1 }
0x1061   : > { %v6381_v37 = vpop.f32.mrf.mxu0 }
0x1062   : > { %v6382_v11 = vadd.f32 %v6381_v37, %v6380_v9  ;;  %v6403_v12 = vpop.f32.mrf.mxu1 }
0x1063   : > { %v6383_v16 = vpop.f32.mrf.mxu0  ;;  %v6404_v17 = vadd.f32 %v6403_v12, %v6402_v10 }
0x1064   : > { %v5546_v14 = vadd.f32 %v6382_v11, %v5506_v19  ;;  %v6405_v23 = vpop.f32.mrf.mxu1 }
0x1065   : > { %v6384_v7 = vpop.f32.mrf.mxu0 }
0x1066   : > { %v5586_v24 = vadd.f32 %v6404_v17, %v5546_v14  ;;  %v6406_v25 = vpop.f32.mrf.mxu1 }
0x1068   : > { %5592 = vst.msk [vmem:[%s8568_s18] sm:$0x3] %vm5591_vm6, %v5586_v24 }
0x1069 PF: > { %s8569_s19 = sld [smem:[#allocation37_spill]]  ;;  %s8571_s29 = smov %s7422_s30 }
0x106a   : > { %s8570_s10 = sld [smem:[#allocation38_spill]]  ;;  %s8572_s30 = smov %s7426_s0 }
0x106f   : > { %p39_p9 = scmp.ge.s32.totalorder %s8569_s19, 6  }
0x1070   : > { %s8573_s0 = smov %s8570_s10 }
0x1071   :  { %41 = sbr.rel (!%p39_p9) target bundleno = 25 (0x19), region = 218 }
0x1076   :  { %5604 = vsyncpa [#allocation6], 1 }
0x1077   :  { %5606 = vsyncpa [#allocation6 + $0x1], 1 }
0x1078   :  { %5607 = vsyncpa [#allocation8], 1 }
0x1079   :  { %5608 = vsyncpa [#allocation11], 1 }
0x107a   :  { %5609 = vsyncpa [#allocation14], 1 }
0x107b   :  { %5610 = vsyncpa [#allocation17], 1 }
0x107c   :  { %5611 = vsyncpa [#allocation20], 1 }
0x107d   :  { %5612 = vsyncpa [#allocation23], 1 }
0x107e   :  { %5614 = vsyncpa [#allocation23 + $0x1], 1 }
0x107f   :  { %5615 = vsyncpa [#allocation26], 1 }
0x1080   :  { %5617 = vsyncpa [#allocation26 + $0x1], 1 }

</bundles_post_ra>
